<compile_context>
chip_gen: v7x
topology: tpu7x:2x2x1
jax: 0.10.0
libtpu: 0.0.40
codegen_flags: <defaults>
</compile_context>

<pallas_src>
import math

import numpy as np

import jax
import jax.numpy as jnp
from jax.experimental import pallas as pl
from jax.experimental.pallas import tpu as pltpu


# ---------------------------------------------------------------------------
# Trace-time weight preparation
# ---------------------------------------------------------------------------

def _conv_band(w, in_w):
    """Banded matmul weights for a stride-1 'valid' conv in slab layout.

    w: (OC, IC, KH, KW) PyTorch Conv2d weight.
    Returns band of shape (KH, in_w*IC, OW*OC) with
        band[k, (ow + j)*IC + ic, ow*OC + oc] = w[oc, ic, k, j]
    so that for a slab window X (rows = output h, cols = (w, ic)):
        sum_k X_k @ band[k]  ==  conv output slab (rows = h, cols = (ow, oc)).
    """
    oc_n, ic_n, kh, kw = w.shape
    ow_n = in_w - kw + 1
    k_i, j_i, ow_i, ic_i, oc_i = np.meshgrid(
        np.arange(kh), np.arange(kw), np.arange(ow_n),
        np.arange(ic_n), np.arange(oc_n), indexing="ij")
    rows = ((ow_i + j_i) * ic_n + ic_i).ravel()
    cols = (ow_i * oc_n + oc_i).ravel()
    ks = k_i.ravel()
    vals = w[oc_i.ravel(), ic_i.ravel(), k_i.ravel(), j_i.ravel()]
    band = jnp.zeros((kh, in_w * ic_n, ow_n * oc_n), jnp.float32)
    return band.at[ks, rows, cols].set(vals)


# ---------------------------------------------------------------------------
# Parameters (PyTorch default init, same shapes as the torch module)
# ---------------------------------------------------------------------------

def init_qnet_params(key, in_dims, out_dim):
    C, H, W = in_dims
    K = 4

    def uni(k, shape, fan_in):
        bound = 1.0 / math.sqrt(fan_in)
        return jax.random.uniform(k, shape, jnp.float32, -bound, bound)

    ks = jax.random.split(key, 8)
    h1, w1 = H - (K - 1), W - (K - 1)
    h2, w2 = h1 - (K - 1), w1 - (K - 1)
    flattened = h2 * w2 * 10

    params = {
        "conv1_w": uni(ks[0], (5, C, K, K), C * K * K),
        "conv1_b": uni(ks[1], (5,), C * K * K),
        "bn1_g": jnp.ones((5,), jnp.float32),
        "bn1_b": jnp.zeros((5,), jnp.float32),
        "conv2_w": uni(ks[2], (10, 5, K, K), 5 * K * K),
        "conv2_b": uni(ks[3], (10,), 5 * K * K),
        "bn2_g": jnp.ones((10,), jnp.float32),
        "bn2_b": jnp.zeros((10,), jnp.float32),
        "fc1_w": uni(ks[4], (100, flattened), flattened),
        "fc1_b": uni(ks[5], (100,), flattened),
        "fc2_w": uni(ks[6], (out_dim, 100), 100),
        "fc2_b": uni(ks[7], (out_dim,), 100),
    }
    return params, flattened


# ---------------------------------------------------------------------------
# Fused forward pass (single pallas_call)
# ---------------------------------------------------------------------------

def qnet_forward(params, x):
    B, C, H, W = x.shape
    KH, KW = params["conv1_w"].shape[2:]
    OC1 = params["conv1_w"].shape[0]
    OC2 = params["conv2_w"].shape[0]
    OH1, OW1 = H - KH + 1, W - KW + 1
    OH2, OW2 = OH1 - KH + 1, OW1 - KW + 1
    HID = params["fc1_w"].shape[0]
    OUT = params["fc2_w"].shape[0]
    C1 = OW1 * OC1          # conv1 slab width (13*5 = 65)
    C2 = OW2 * OC2          # conv2 slab width (10*10 = 100)

    # ---- trace-time layout / weight prep (no activation traffic) ------------
    # Input slab: rows = (b, h), cols = (w, c).
    x_slab = x.transpose(0, 2, 3, 1).reshape(B * H, W * C)
    band1 = _conv_band(params["conv1_w"], W)        # (KH, W*C, C1)
    band2 = _conv_band(params["conv2_w"], OW1)      # (KH, C1,  C2)
    cb1 = jnp.tile(params["conv1_b"], OW1).reshape(1, C1)
    cb2 = jnp.tile(params["conv2_b"], OW2).reshape(1, C2)
    pool1 = jnp.asarray(np.kron(np.ones((OW1, 1), np.float32),
                                np.eye(OC1, dtype=np.float32)))   # (C1, OC1)
    pool1t = pool1.T
    pool2 = jnp.asarray(np.kron(np.ones((OW2, 1), np.float32),
                                np.eye(OC2, dtype=np.float32)))   # (C2, OC2)
    pool2t = pool2.T
    g1 = params["bn1_g"].reshape(1, OC1)
    be1 = params["bn1_b"].reshape(1, OC1)
    g2 = params["bn2_g"].reshape(1, OC2)
    be2 = params["bn2_b"].reshape(1, OC2)
    # torch flatten is channel-major (c, h, w): fold it into the fc1 weight so
    # v3[oh][ow*OC2 + oc, o] == fc1_w[o, oc*OH2*OW2 + oh*OW2 + ow].
    v3 = (params["fc1_w"].reshape(HID, OC2, OH2, OW2)
          .transpose(2, 3, 1, 0).reshape(OH2, C2, HID))
    f1b = params["fc1_b"].reshape(1, HID)
    f2wt = params["fc2_w"].T                        # (HID, OUT)
    f2b = params["fc2_b"].reshape(1, OUT)

    n1 = float(B * OH1 * OW1)
    n2 = float(B * OH2 * OW2)
    eps = 1e-5

    def kernel(x_ref, wb1_ref, cb1_ref, g1_ref, be1_ref, p1_ref, p1t_ref,
               wb2_ref, cb2_ref, g2_ref, be2_ref, p2_ref, p2t_ref,
               v3_ref, f1b_ref, f2wt_ref, f2b_ref, o_ref):
        xs = x_ref[...]                                           # (B*H, W*C)
        wb1 = [wb1_ref[k] for k in range(KH)]
        wb2 = [wb2_ref[k] for k in range(KH)]

        # ---- conv1 (+ bias): KH banded matmuls per batch element ------------
        y1 = []
        for b in range(B):
            acc = jnp.zeros((OH1, C1), jnp.float32)
            for k in range(KH):
                sl = xs[b * H + k: b * H + k + OH1, :]            # (OH1, W*C)
                acc = acc + jnp.dot(sl, wb1[k],
                                    preferred_element_type=jnp.float32)
            y1.append(acc + cb1_ref[...])

        # ---- bn1: training-mode batch stats over (B, OH1, OW1) per channel --
        cs = jnp.sum(y1[0], axis=0, keepdims=True)
        cq = jnp.sum(y1[0] * y1[0], axis=0, keepdims=True)
        for t in y1[1:]:
            cs = cs + jnp.sum(t, axis=0, keepdims=True)
            cq = cq + jnp.sum(t * t, axis=0, keepdims=True)
        mean = jnp.dot(cs, p1_ref[...], preferred_element_type=jnp.float32) / n1
        ex2 = jnp.dot(cq, p1_ref[...], preferred_element_type=jnp.float32) / n1
        var = ex2 - mean * mean                                   # biased (torch BN)
        scale = g1_ref[...] * jax.lax.rsqrt(var + eps)            # (1, OC1)
        shift = be1_ref[...] - mean * scale
        scale_w = jnp.dot(scale, p1t_ref[...], preferred_element_type=jnp.float32)
        shift_w = jnp.dot(shift, p1t_ref[...], preferred_element_type=jnp.float32)
        y1 = [t * scale_w + shift_w for t in y1]
        # TODO(synk): F.dropout(p=0.5, training=True) is stochastic; identity here.

        # ---- conv2 (+ bias) --------------------------------------------------
        y2 = []
        for b in range(B):
            acc = jnp.zeros((OH2, C2), jnp.float32)
            for k in range(KH):
                sl = y1[b][k: k + OH2, :]                         # (OH2, C1)
                acc = acc + jnp.dot(sl, wb2[k],
                                    preferred_element_type=jnp.float32)
            y2.append(acc + cb2_ref[...])

        # ---- bn2 -------------------------------------------------------------
        cs = jnp.sum(y2[0], axis=0, keepdims=True)
        cq = jnp.sum(y2[0] * y2[0], axis=0, keepdims=True)
        for t in y2[1:]:
            cs = cs + jnp.sum(t, axis=0, keepdims=True)
            cq = cq + jnp.sum(t * t, axis=0, keepdims=True)
        mean = jnp.dot(cs, p2_ref[...], preferred_element_type=jnp.float32) / n2
        ex2 = jnp.dot(cq, p2_ref[...], preferred_element_type=jnp.float32) / n2
        var = ex2 - mean * mean
        scale = g2_ref[...] * jax.lax.rsqrt(var + eps)            # (1, OC2)
        shift = be2_ref[...] - mean * scale
        scale_w = jnp.dot(scale, p2t_ref[...], preferred_element_type=jnp.float32)
        shift_w = jnp.dot(shift, p2t_ref[...], preferred_element_type=jnp.float32)
        y2 = [t * scale_w + shift_w for t in y2]
        # TODO(synk): dropout applied as identity.

        # ---- flatten (folded into v3) + fc1 + dropout(identity) + fc2 --------
        f2w = f2wt_ref[...]
        f2bv = f2b_ref[...]
        for b in range(B):
            h = f1b_ref[...]                                      # (1, HID)
            for r in range(OH2):
                h = h + jnp.dot(y2[b][r: r + 1, :], v3_ref[r],
                                preferred_element_type=jnp.float32)
            # TODO(synk): dropout applied as identity.
            o_ref[b: b + 1, :] = (jnp.dot(h, f2w,
                                          preferred_element_type=jnp.float32)
                                  + f2bv)

    operands = (x_slab, band1, cb1, g1, be1, pool1, pool1t,
                band2, cb2, g2, be2, pool2, pool2t,
                v3, f1b, f2wt, f2b)

    def full_spec(shape):
        nd = len(shape)
        return pl.BlockSpec(shape, lambda i: (0,) * nd)

    return pl.pallas_call(
        kernel,
        grid=(1,),
        in_specs=[full_spec(op.shape) for op in operands],
        out_specs=full_spec((B, OUT)),
        out_shape=jax.ShapeDtypeStruct((B, OUT), jnp.float32),
        compiler_params=pltpu.CompilerParams(
            dimension_semantics=("arbitrary",)),
    )(*operands)


if __name__ == "__main__":
    in_dims = (4, 16, 16)   # (C, H, W)
    out_dim = 8
    batch = 2

    key = jax.random.PRNGKey(0)
    k_params, k_x = jax.random.split(key)
    params, flattened = init_qnet_params(k_params, in_dims, out_dim)
    x = jax.random.normal(k_x, (batch,) + in_dims, jnp.float32)

    fwd = jax.jit(qnet_forward)
    out = jax.block_until_ready(fwd(params, x))

    assert out.shape == (batch, out_dim), out.shape
    assert bool(jnp.all(jnp.isfinite(out)))
    print("KERNEL_OK")
</pallas_src>

<mosaic_0001>
module attributes {stable_mosaic.version = 11 : i64} {
  func.func @kernel(%arg0: i32, %arg1: memref<32x64xf32, #tpu.memory_space<vmem>>, %arg2: memref<4x64x65xf32, #tpu.memory_space<vmem>>, %arg3: memref<1x65xf32, #tpu.memory_space<vmem>>, %arg4: memref<1x5xf32, #tpu.memory_space<vmem>>, %arg5: memref<1x5xf32, #tpu.memory_space<vmem>>, %arg6: memref<65x5xf32, #tpu.memory_space<vmem>>, %arg7: memref<5x65xf32, #tpu.memory_space<vmem>>, %arg8: memref<4x65x100xf32, #tpu.memory_space<vmem>>, %arg9: memref<1x100xf32, #tpu.memory_space<vmem>>, %arg10: memref<1x10xf32, #tpu.memory_space<vmem>>, %arg11: memref<1x10xf32, #tpu.memory_space<vmem>>, %arg12: memref<100x10xf32, #tpu.memory_space<vmem>>, %arg13: memref<10x100xf32, #tpu.memory_space<vmem>>, %arg14: memref<10x100x100xf32, #tpu.memory_space<vmem>>, %arg15: memref<1x100xf32, #tpu.memory_space<vmem>>, %arg16: memref<100x8xf32, #tpu.memory_space<vmem>>, %arg17: memref<1x8xf32, #tpu.memory_space<vmem>>, %arg18: memref<2x8xf32, #tpu.memory_space<vmem>>) attributes {dimension_semantics = [#tpu.dimension_semantics<arbitrary>], iteration_bounds = array<i64: 1>, scalar_prefetch = 0 : i64, scratch_operands = 0 : i64, tpu.core_type = #tpu.core_type<tc>, window_params = [{pipeline_mode = #tpu.pipeline_mode<synchronous>, transform_indices = @transform_0, window_bounds = array<i64: 32, 64>}, {pipeline_mode = #tpu.pipeline_mode<synchronous>, transform_indices = @transform_1, window_bounds = array<i64: 4, 64, 65>}, {pipeline_mode = #tpu.pipeline_mode<synchronous>, transform_indices = @transform_2, window_bounds = array<i64: 1, 65>}, {pipeline_mode = #tpu.pipeline_mode<synchronous>, transform_indices = @transform_3, window_bounds = array<i64: 1, 5>}, {pipeline_mode = #tpu.pipeline_mode<synchronous>, transform_indices = @transform_4, window_bounds = array<i64: 1, 5>}, {pipeline_mode = #tpu.pipeline_mode<synchronous>, transform_indices = @transform_5, window_bounds = array<i64: 65, 5>}, {pipeline_mode = #tpu.pipeline_mode<synchronous>, transform_indices = @transform_6, window_bounds = array<i64: 5, 65>}, {pipeline_mode = #tpu.pipeline_mode<synchronous>, transform_indices = @transform_7, window_bounds = array<i64: 4, 65, 100>}, {pipeline_mode = #tpu.pipeline_mode<synchronous>, transform_indices = @transform_8, window_bounds = array<i64: 1, 100>}, {pipeline_mode = #tpu.pipeline_mode<synchronous>, transform_indices = @transform_9, window_bounds = array<i64: 1, 10>}, {pipeline_mode = #tpu.pipeline_mode<synchronous>, transform_indices = @transform_10, window_bounds = array<i64: 1, 10>}, {pipeline_mode = #tpu.pipeline_mode<synchronous>, transform_indices = @transform_11, window_bounds = array<i64: 100, 10>}, {pipeline_mode = #tpu.pipeline_mode<synchronous>, transform_indices = @transform_12, window_bounds = array<i64: 10, 100>}, {pipeline_mode = #tpu.pipeline_mode<synchronous>, transform_indices = @transform_13, window_bounds = array<i64: 10, 100, 100>}, {pipeline_mode = #tpu.pipeline_mode<synchronous>, transform_indices = @transform_14, window_bounds = array<i64: 1, 100>}, {pipeline_mode = #tpu.pipeline_mode<synchronous>, transform_indices = @transform_15, window_bounds = array<i64: 100, 8>}, {pipeline_mode = #tpu.pipeline_mode<synchronous>, transform_indices = @transform_16, window_bounds = array<i64: 1, 8>}, {pipeline_mode = #tpu.pipeline_mode<synchronous>, transform_indices = @transform_17, window_bounds = array<i64: 2, 8>}]} {
    %c0 = arith.constant 0 : index
    %c0_0 = arith.constant 0 : index
    %0 = vector.load %arg1[%c0, %c0_0] : memref<32x64xf32, #tpu.memory_space<vmem>>, vector<32x64xf32>
    %c0_1 = arith.constant 0 : index
    %c0_2 = arith.constant 0 : index
    %c0_3 = arith.constant 0 : index
    %1 = vector.load %arg2[%c0_1, %c0_2, %c0_3] : memref<4x64x65xf32, #tpu.memory_space<vmem>>, vector<1x64x65xf32>
    %2 = vector.shape_cast %1 : vector<1x64x65xf32> to vector<64x65xf32>
    %c1 = arith.constant 1 : index
    %c0_4 = arith.constant 0 : index
    %c0_5 = arith.constant 0 : index
    %3 = vector.load %arg2[%c1, %c0_4, %c0_5] : memref<4x64x65xf32, #tpu.memory_space<vmem>>, vector<1x64x65xf32>
    %4 = vector.shape_cast %3 : vector<1x64x65xf32> to vector<64x65xf32>
    %c2 = arith.constant 2 : index
    %c0_6 = arith.constant 0 : index
    %c0_7 = arith.constant 0 : index
    %5 = vector.load %arg2[%c2, %c0_6, %c0_7] : memref<4x64x65xf32, #tpu.memory_space<vmem>>, vector<1x64x65xf32>
    %6 = vector.shape_cast %5 : vector<1x64x65xf32> to vector<64x65xf32>
    %c3 = arith.constant 3 : index
    %c0_8 = arith.constant 0 : index
    %c0_9 = arith.constant 0 : index
    %7 = vector.load %arg2[%c3, %c0_8, %c0_9] : memref<4x64x65xf32, #tpu.memory_space<vmem>>, vector<1x64x65xf32>
    %8 = vector.shape_cast %7 : vector<1x64x65xf32> to vector<64x65xf32>
    %c0_10 = arith.constant 0 : index
    %c0_11 = arith.constant 0 : index
    %c0_12 = arith.constant 0 : index
    %9 = vector.load %arg8[%c0_10, %c0_11, %c0_12] : memref<4x65x100xf32, #tpu.memory_space<vmem>>, vector<1x65x100xf32>
    %10 = vector.shape_cast %9 : vector<1x65x100xf32> to vector<65x100xf32>
    %c1_13 = arith.constant 1 : index
    %c0_14 = arith.constant 0 : index
    %c0_15 = arith.constant 0 : index
    %11 = vector.load %arg8[%c1_13, %c0_14, %c0_15] : memref<4x65x100xf32, #tpu.memory_space<vmem>>, vector<1x65x100xf32>
    %12 = vector.shape_cast %11 : vector<1x65x100xf32> to vector<65x100xf32>
    %c2_16 = arith.constant 2 : index
    %c0_17 = arith.constant 0 : index
    %c0_18 = arith.constant 0 : index
    %13 = vector.load %arg8[%c2_16, %c0_17, %c0_18] : memref<4x65x100xf32, #tpu.memory_space<vmem>>, vector<1x65x100xf32>
    %14 = vector.shape_cast %13 : vector<1x65x100xf32> to vector<65x100xf32>
    %c3_19 = arith.constant 3 : index
    %c0_20 = arith.constant 0 : index
    %c0_21 = arith.constant 0 : index
    %15 = vector.load %arg8[%c3_19, %c0_20, %c0_21] : memref<4x65x100xf32, #tpu.memory_space<vmem>>, vector<1x65x100xf32>
    %16 = vector.shape_cast %15 : vector<1x65x100xf32> to vector<65x100xf32>
    %cst = arith.constant 0.000000e+00 : f32
    %17 = vector.broadcast %cst : f32 to vector<13x65xf32>
    %18 = vector.extract_strided_slice %0 {offsets = [0, 0], sizes = [13, 64], strides = [1, 1]} : vector<32x64xf32> to vector<13x64xf32>
    %cst_22 = arith.constant dense<0.000000e+00> : vector<13x65xf32>
    %19 = tpu.matmul %18, %2, %cst_22 {dimension_numbers = #tpu.dot_dimension_numbers<[1], [0], [0], [1], [0, 0, 1, 1], [], []>} : vector<13x64xf32>, vector<64x65xf32>, vector<13x65xf32> -> vector<13x65xf32>
    %20 = arith.addf %17, %19 : vector<13x65xf32>
    %21 = vector.extract_strided_slice %0 {offsets = [1, 0], sizes = [13, 64], strides = [1, 1]} : vector<32x64xf32> to vector<13x64xf32>
    %cst_23 = arith.constant dense<0.000000e+00> : vector<13x65xf32>
    %22 = tpu.matmul %21, %4, %cst_23 {dimension_numbers = #tpu.dot_dimension_numbers<[1], [0], [0], [1], [0, 0, 1, 1], [], []>} : vector<13x64xf32>, vector<64x65xf32>, vector<13x65xf32> -> vector<13x65xf32>
    %23 = arith.addf %20, %22 : vector<13x65xf32>
    %24 = vector.extract_strided_slice %0 {offsets = [2, 0], sizes = [13, 64], strides = [1, 1]} : vector<32x64xf32> to vector<13x64xf32>
    %cst_24 = arith.constant dense<0.000000e+00> : vector<13x65xf32>
    %25 = tpu.matmul %24, %6, %cst_24 {dimension_numbers = #tpu.dot_dimension_numbers<[1], [0], [0], [1], [0, 0, 1, 1], [], []>} : vector<13x64xf32>, vector<64x65xf32>, vector<13x65xf32> -> vector<13x65xf32>
    %26 = arith.addf %23, %25 : vector<13x65xf32>
    %27 = vector.extract_strided_slice %0 {offsets = [3, 0], sizes = [13, 64], strides = [1, 1]} : vector<32x64xf32> to vector<13x64xf32>
    %cst_25 = arith.constant dense<0.000000e+00> : vector<13x65xf32>
    %28 = tpu.matmul %27, %8, %cst_25 {dimension_numbers = #tpu.dot_dimension_numbers<[1], [0], [0], [1], [0, 0, 1, 1], [], []>} : vector<13x64xf32>, vector<64x65xf32>, vector<13x65xf32> -> vector<13x65xf32>
    %29 = arith.addf %26, %28 : vector<13x65xf32>
    %c0_26 = arith.constant 0 : index
    %c0_27 = arith.constant 0 : index
    %30 = vector.load %arg3[%c0_26, %c0_27] : memref<1x65xf32, #tpu.memory_space<vmem>>, vector<1x65xf32>
    %31 = vector.broadcast %30 : vector<1x65xf32> to vector<13x65xf32>
    %32 = arith.addf %29, %31 : vector<13x65xf32>
    %cst_28 = arith.constant 0.000000e+00 : f32
    %33 = vector.broadcast %cst_28 : f32 to vector<13x65xf32>
    %34 = vector.extract_strided_slice %0 {offsets = [16, 0], sizes = [13, 64], strides = [1, 1]} : vector<32x64xf32> to vector<13x64xf32>
    %cst_29 = arith.constant dense<0.000000e+00> : vector<13x65xf32>
    %35 = tpu.matmul %34, %2, %cst_29 {dimension_numbers = #tpu.dot_dimension_numbers<[1], [0], [0], [1], [0, 0, 1, 1], [], []>} : vector<13x64xf32>, vector<64x65xf32>, vector<13x65xf32> -> vector<13x65xf32>
    %36 = arith.addf %33, %35 : vector<13x65xf32>
    %37 = vector.extract_strided_slice %0 {offsets = [17, 0], sizes = [13, 64], strides = [1, 1]} : vector<32x64xf32> to vector<13x64xf32>
    %cst_30 = arith.constant dense<0.000000e+00> : vector<13x65xf32>
    %38 = tpu.matmul %37, %4, %cst_30 {dimension_numbers = #tpu.dot_dimension_numbers<[1], [0], [0], [1], [0, 0, 1, 1], [], []>} : vector<13x64xf32>, vector<64x65xf32>, vector<13x65xf32> -> vector<13x65xf32>
    %39 = arith.addf %36, %38 : vector<13x65xf32>
    %40 = vector.extract_strided_slice %0 {offsets = [18, 0], sizes = [13, 64], strides = [1, 1]} : vector<32x64xf32> to vector<13x64xf32>
    %cst_31 = arith.constant dense<0.000000e+00> : vector<13x65xf32>
    %41 = tpu.matmul %40, %6, %cst_31 {dimension_numbers = #tpu.dot_dimension_numbers<[1], [0], [0], [1], [0, 0, 1, 1], [], []>} : vector<13x64xf32>, vector<64x65xf32>, vector<13x65xf32> -> vector<13x65xf32>
    %42 = arith.addf %39, %41 : vector<13x65xf32>
    %43 = vector.extract_strided_slice %0 {offsets = [19, 0], sizes = [13, 64], strides = [1, 1]} : vector<32x64xf32> to vector<13x64xf32>
    %cst_32 = arith.constant dense<0.000000e+00> : vector<13x65xf32>
    %44 = tpu.matmul %43, %8, %cst_32 {dimension_numbers = #tpu.dot_dimension_numbers<[1], [0], [0], [1], [0, 0, 1, 1], [], []>} : vector<13x64xf32>, vector<64x65xf32>, vector<13x65xf32> -> vector<13x65xf32>
    %45 = arith.addf %42, %44 : vector<13x65xf32>
    %c0_33 = arith.constant 0 : index
    %c0_34 = arith.constant 0 : index
    %46 = vector.load %arg3[%c0_33, %c0_34] : memref<1x65xf32, #tpu.memory_space<vmem>>, vector<1x65xf32>
    %47 = vector.broadcast %46 : vector<1x65xf32> to vector<13x65xf32>
    %48 = arith.addf %45, %47 : vector<13x65xf32>
    %cst_35 = arith.constant dense<0.000000e+00> : vector<65xf32>
    %49 = vector.multi_reduction <add>, %32, %cst_35 [0] : vector<13x65xf32> to vector<65xf32>
    %50 = vector.shape_cast %49 : vector<65xf32> to vector<1x65xf32>
    %51 = arith.mulf %32, %32 : vector<13x65xf32>
    %cst_36 = arith.constant dense<0.000000e+00> : vector<65xf32>
    %52 = vector.multi_reduction <add>, %51, %cst_36 [0] : vector<13x65xf32> to vector<65xf32>
    %53 = vector.shape_cast %52 : vector<65xf32> to vector<1x65xf32>
    %cst_37 = arith.constant dense<0.000000e+00> : vector<65xf32>
    %54 = vector.multi_reduction <add>, %48, %cst_37 [0] : vector<13x65xf32> to vector<65xf32>
    %55 = vector.shape_cast %54 : vector<65xf32> to vector<1x65xf32>
    %56 = arith.addf %50, %55 : vector<1x65xf32>
    %57 = arith.mulf %48, %48 : vector<13x65xf32>
    %cst_38 = arith.constant dense<0.000000e+00> : vector<65xf32>
    %58 = vector.multi_reduction <add>, %57, %cst_38 [0] : vector<13x65xf32> to vector<65xf32>
    %59 = vector.shape_cast %58 : vector<65xf32> to vector<1x65xf32>
    %60 = arith.addf %53, %59 : vector<1x65xf32>
    %c0_39 = arith.constant 0 : index
    %c0_40 = arith.constant 0 : index
    %61 = vector.load %arg6[%c0_39, %c0_40] : memref<65x5xf32, #tpu.memory_space<vmem>>, vector<65x5xf32>
    %cst_41 = arith.constant dense<0.000000e+00> : vector<1x5xf32>
    %62 = tpu.matmul %56, %61, %cst_41 {dimension_numbers = #tpu.dot_dimension_numbers<[1], [0], [0], [1], [0, 0, 1, 1], [], []>} : vector<1x65xf32>, vector<65x5xf32>, vector<1x5xf32> -> vector<1x5xf32>
    %cst_42 = arith.constant 3.380000e+02 : f32
    %63 = vector.broadcast %cst_42 : f32 to vector<1x5xf32>
    %64 = arith.divf %62, %63 : vector<1x5xf32>
    %c0_43 = arith.constant 0 : index
    %c0_44 = arith.constant 0 : index
    %65 = vector.load %arg6[%c0_43, %c0_44] : memref<65x5xf32, #tpu.memory_space<vmem>>, vector<65x5xf32>
    %cst_45 = arith.constant dense<0.000000e+00> : vector<1x5xf32>
    %66 = tpu.matmul %60, %65, %cst_45 {dimension_numbers = #tpu.dot_dimension_numbers<[1], [0], [0], [1], [0, 0, 1, 1], [], []>} : vector<1x65xf32>, vector<65x5xf32>, vector<1x5xf32> -> vector<1x5xf32>
    %cst_46 = arith.constant 3.380000e+02 : f32
    %67 = vector.broadcast %cst_46 : f32 to vector<1x5xf32>
    %68 = arith.divf %66, %67 : vector<1x5xf32>
    %69 = arith.mulf %64, %64 : vector<1x5xf32>
    %70 = arith.subf %68, %69 : vector<1x5xf32>
    %c0_47 = arith.constant 0 : index
    %c0_48 = arith.constant 0 : index
    %71 = vector.load %arg4[%c0_47, %c0_48] : memref<1x5xf32, #tpu.memory_space<vmem>>, vector<1x5xf32>
    %cst_49 = arith.constant 9.99999974E-6 : f32
    %72 = vector.broadcast %cst_49 : f32 to vector<1x5xf32>
    %73 = arith.addf %70, %72 : vector<1x5xf32>
    %74 = math.rsqrt %73 : vector<1x5xf32>
    %75 = arith.mulf %71, %74 : vector<1x5xf32>
    %c0_50 = arith.constant 0 : index
    %c0_51 = arith.constant 0 : index
    %76 = vector.load %arg5[%c0_50, %c0_51] : memref<1x5xf32, #tpu.memory_space<vmem>>, vector<1x5xf32>
    %77 = arith.mulf %64, %75 : vector<1x5xf32>
    %78 = arith.subf %76, %77 : vector<1x5xf32>
    %c0_52 = arith.constant 0 : index
    %c0_53 = arith.constant 0 : index
    %79 = vector.load %arg7[%c0_52, %c0_53] : memref<5x65xf32, #tpu.memory_space<vmem>>, vector<5x65xf32>
    %cst_54 = arith.constant dense<0.000000e+00> : vector<1x65xf32>
    %80 = tpu.matmul %75, %79, %cst_54 {dimension_numbers = #tpu.dot_dimension_numbers<[1], [0], [0], [1], [0, 0, 1, 1], [], []>} : vector<1x5xf32>, vector<5x65xf32>, vector<1x65xf32> -> vector<1x65xf32>
    %c0_55 = arith.constant 0 : index
    %c0_56 = arith.constant 0 : index
    %81 = vector.load %arg7[%c0_55, %c0_56] : memref<5x65xf32, #tpu.memory_space<vmem>>, vector<5x65xf32>
    %cst_57 = arith.constant dense<0.000000e+00> : vector<1x65xf32>
    %82 = tpu.matmul %78, %81, %cst_57 {dimension_numbers = #tpu.dot_dimension_numbers<[1], [0], [0], [1], [0, 0, 1, 1], [], []>} : vector<1x5xf32>, vector<5x65xf32>, vector<1x65xf32> -> vector<1x65xf32>
    %83 = vector.broadcast %80 : vector<1x65xf32> to vector<13x65xf32>
    %84 = arith.mulf %32, %83 : vector<13x65xf32>
    %85 = vector.broadcast %82 : vector<1x65xf32> to vector<13x65xf32>
    %86 = arith.addf %84, %85 : vector<13x65xf32>
    %87 = vector.broadcast %80 : vector<1x65xf32> to vector<13x65xf32>
    %88 = arith.mulf %48, %87 : vector<13x65xf32>
    %89 = vector.broadcast %82 : vector<1x65xf32> to vector<13x65xf32>
    %90 = arith.addf %88, %89 : vector<13x65xf32>
    %cst_58 = arith.constant 0.000000e+00 : f32
    %91 = vector.broadcast %cst_58 : f32 to vector<10x100xf32>
    %92 = vector.extract_strided_slice %86 {offsets = [0, 0], sizes = [10, 65], strides = [1, 1]} : vector<13x65xf32> to vector<10x65xf32>
    %cst_59 = arith.constant dense<0.000000e+00> : vector<10x100xf32>
    %93 = tpu.matmul %92, %10, %cst_59 {dimension_numbers = #tpu.dot_dimension_numbers<[1], [0], [0], [1], [0, 0, 1, 1], [], []>} : vector<10x65xf32>, vector<65x100xf32>, vector<10x100xf32> -> vector<10x100xf32>
    %94 = arith.addf %91, %93 : vector<10x100xf32>
    %95 = vector.extract_strided_slice %86 {offsets = [1, 0], sizes = [10, 65], strides = [1, 1]} : vector<13x65xf32> to vector<10x65xf32>
    %cst_60 = arith.constant dense<0.000000e+00> : vector<10x100xf32>
    %96 = tpu.matmul %95, %12, %cst_60 {dimension_numbers = #tpu.dot_dimension_numbers<[1], [0], [0], [1], [0, 0, 1, 1], [], []>} : vector<10x65xf32>, vector<65x100xf32>, vector<10x100xf32> -> vector<10x100xf32>
    %97 = arith.addf %94, %96 : vector<10x100xf32>
    %98 = vector.extract_strided_slice %86 {offsets = [2, 0], sizes = [10, 65], strides = [1, 1]} : vector<13x65xf32> to vector<10x65xf32>
    %cst_61 = arith.constant dense<0.000000e+00> : vector<10x100xf32>
    %99 = tpu.matmul %98, %14, %cst_61 {dimension_numbers = #tpu.dot_dimension_numbers<[1], [0], [0], [1], [0, 0, 1, 1], [], []>} : vector<10x65xf32>, vector<65x100xf32>, vector<10x100xf32> -> vector<10x100xf32>
    %100 = arith.addf %97, %99 : vector<10x100xf32>
    %101 = vector.extract_strided_slice %86 {offsets = [3, 0], sizes = [10, 65], strides = [1, 1]} : vector<13x65xf32> to vector<10x65xf32>
    %cst_62 = arith.constant dense<0.000000e+00> : vector<10x100xf32>
    %102 = tpu.matmul %101, %16, %cst_62 {dimension_numbers = #tpu.dot_dimension_numbers<[1], [0], [0], [1], [0, 0, 1, 1], [], []>} : vector<10x65xf32>, vector<65x100xf32>, vector<10x100xf32> -> vector<10x100xf32>
    %103 = arith.addf %100, %102 : vector<10x100xf32>
    %c0_63 = arith.constant 0 : index
    %c0_64 = arith.constant 0 : index
    %104 = vector.load %arg9[%c0_63, %c0_64] : memref<1x100xf32, #tpu.memory_space<vmem>>, vector<1x100xf32>
    %105 = vector.broadcast %104 : vector<1x100xf32> to vector<10x100xf32>
    %106 = arith.addf %103, %105 : vector<10x100xf32>
    %cst_65 = arith.constant 0.000000e+00 : f32
    %107 = vector.broadcast %cst_65 : f32 to vector<10x100xf32>
    %108 = vector.extract_strided_slice %90 {offsets = [0, 0], sizes = [10, 65], strides = [1, 1]} : vector<13x65xf32> to vector<10x65xf32>
    %cst_66 = arith.constant dense<0.000000e+00> : vector<10x100xf32>
    %109 = tpu.matmul %108, %10, %cst_66 {dimension_numbers = #tpu.dot_dimension_numbers<[1], [0], [0], [1], [0, 0, 1, 1], [], []>} : vector<10x65xf32>, vector<65x100xf32>, vector<10x100xf32> -> vector<10x100xf32>
    %110 = arith.addf %107, %109 : vector<10x100xf32>
    %111 = vector.extract_strided_slice %90 {offsets = [1, 0], sizes = [10, 65], strides = [1, 1]} : vector<13x65xf32> to vector<10x65xf32>
    %cst_67 = arith.constant dense<0.000000e+00> : vector<10x100xf32>
    %112 = tpu.matmul %111, %12, %cst_67 {dimension_numbers = #tpu.dot_dimension_numbers<[1], [0], [0], [1], [0, 0, 1, 1], [], []>} : vector<10x65xf32>, vector<65x100xf32>, vector<10x100xf32> -> vector<10x100xf32>
    %113 = arith.addf %110, %112 : vector<10x100xf32>
    %114 = vector.extract_strided_slice %90 {offsets = [2, 0], sizes = [10, 65], strides = [1, 1]} : vector<13x65xf32> to vector<10x65xf32>
    %cst_68 = arith.constant dense<0.000000e+00> : vector<10x100xf32>
    %115 = tpu.matmul %114, %14, %cst_68 {dimension_numbers = #tpu.dot_dimension_numbers<[1], [0], [0], [1], [0, 0, 1, 1], [], []>} : vector<10x65xf32>, vector<65x100xf32>, vector<10x100xf32> -> vector<10x100xf32>
    %116 = arith.addf %113, %115 : vector<10x100xf32>
    %117 = vector.extract_strided_slice %90 {offsets = [3, 0], sizes = [10, 65], strides = [1, 1]} : vector<13x65xf32> to vector<10x65xf32>
    %cst_69 = arith.constant dense<0.000000e+00> : vector<10x100xf32>
    %118 = tpu.matmul %117, %16, %cst_69 {dimension_numbers = #tpu.dot_dimension_numbers<[1], [0], [0], [1], [0, 0, 1, 1], [], []>} : vector<10x65xf32>, vector<65x100xf32>, vector<10x100xf32> -> vector<10x100xf32>
    %119 = arith.addf %116, %118 : vector<10x100xf32>
    %c0_70 = arith.constant 0 : index
    %c0_71 = arith.constant 0 : index
    %120 = vector.load %arg9[%c0_70, %c0_71] : memref<1x100xf32, #tpu.memory_space<vmem>>, vector<1x100xf32>
    %121 = vector.broadcast %120 : vector<1x100xf32> to vector<10x100xf32>
    %122 = arith.addf %119, %121 : vector<10x100xf32>
    %cst_72 = arith.constant dense<0.000000e+00> : vector<100xf32>
    %123 = vector.multi_reduction <add>, %106, %cst_72 [0] : vector<10x100xf32> to vector<100xf32>
    %124 = vector.shape_cast %123 : vector<100xf32> to vector<1x100xf32>
    %125 = arith.mulf %106, %106 : vector<10x100xf32>
    %cst_73 = arith.constant dense<0.000000e+00> : vector<100xf32>
    %126 = vector.multi_reduction <add>, %125, %cst_73 [0] : vector<10x100xf32> to vector<100xf32>
    %127 = vector.shape_cast %126 : vector<100xf32> to vector<1x100xf32>
    %cst_74 = arith.constant dense<0.000000e+00> : vector<100xf32>
    %128 = vector.multi_reduction <add>, %122, %cst_74 [0] : vector<10x100xf32> to vector<100xf32>
    %129 = vector.shape_cast %128 : vector<100xf32> to vector<1x100xf32>
    %130 = arith.addf %124, %129 : vector<1x100xf32>
    %131 = arith.mulf %122, %122 : vector<10x100xf32>
    %cst_75 = arith.constant dense<0.000000e+00> : vector<100xf32>
    %132 = vector.multi_reduction <add>, %131, %cst_75 [0] : vector<10x100xf32> to vector<100xf32>
    %133 = vector.shape_cast %132 : vector<100xf32> to vector<1x100xf32>
    %134 = arith.addf %127, %133 : vector<1x100xf32>
    %c0_76 = arith.constant 0 : index
    %c0_77 = arith.constant 0 : index
    %135 = vector.load %arg12[%c0_76, %c0_77] : memref<100x10xf32, #tpu.memory_space<vmem>>, vector<100x10xf32>
    %cst_78 = arith.constant dense<0.000000e+00> : vector<1x10xf32>
    %136 = tpu.matmul %130, %135, %cst_78 {dimension_numbers = #tpu.dot_dimension_numbers<[1], [0], [0], [1], [0, 0, 1, 1], [], []>} : vector<1x100xf32>, vector<100x10xf32>, vector<1x10xf32> -> vector<1x10xf32>
    %cst_79 = arith.constant 2.000000e+02 : f32
    %137 = vector.broadcast %cst_79 : f32 to vector<1x10xf32>
    %138 = arith.divf %136, %137 : vector<1x10xf32>
    %c0_80 = arith.constant 0 : index
    %c0_81 = arith.constant 0 : index
    %139 = vector.load %arg12[%c0_80, %c0_81] : memref<100x10xf32, #tpu.memory_space<vmem>>, vector<100x10xf32>
    %cst_82 = arith.constant dense<0.000000e+00> : vector<1x10xf32>
    %140 = tpu.matmul %134, %139, %cst_82 {dimension_numbers = #tpu.dot_dimension_numbers<[1], [0], [0], [1], [0, 0, 1, 1], [], []>} : vector<1x100xf32>, vector<100x10xf32>, vector<1x10xf32> -> vector<1x10xf32>
    %cst_83 = arith.constant 2.000000e+02 : f32
    %141 = vector.broadcast %cst_83 : f32 to vector<1x10xf32>
    %142 = arith.divf %140, %141 : vector<1x10xf32>
    %143 = arith.mulf %138, %138 : vector<1x10xf32>
    %144 = arith.subf %142, %143 : vector<1x10xf32>
    %c0_84 = arith.constant 0 : index
    %c0_85 = arith.constant 0 : index
    %145 = vector.load %arg10[%c0_84, %c0_85] : memref<1x10xf32, #tpu.memory_space<vmem>>, vector<1x10xf32>
    %cst_86 = arith.constant 9.99999974E-6 : f32
    %146 = vector.broadcast %cst_86 : f32 to vector<1x10xf32>
    %147 = arith.addf %144, %146 : vector<1x10xf32>
    %148 = math.rsqrt %147 : vector<1x10xf32>
    %149 = arith.mulf %145, %148 : vector<1x10xf32>
    %c0_87 = arith.constant 0 : index
    %c0_88 = arith.constant 0 : index
    %150 = vector.load %arg11[%c0_87, %c0_88] : memref<1x10xf32, #tpu.memory_space<vmem>>, vector<1x10xf32>
    %151 = arith.mulf %138, %149 : vector<1x10xf32>
    %152 = arith.subf %150, %151 : vector<1x10xf32>
    %c0_89 = arith.constant 0 : index
    %c0_90 = arith.constant 0 : index
    %153 = vector.load %arg13[%c0_89, %c0_90] : memref<10x100xf32, #tpu.memory_space<vmem>>, vector<10x100xf32>
    %cst_91 = arith.constant dense<0.000000e+00> : vector<1x100xf32>
    %154 = tpu.matmul %149, %153, %cst_91 {dimension_numbers = #tpu.dot_dimension_numbers<[1], [0], [0], [1], [0, 0, 1, 1], [], []>} : vector<1x10xf32>, vector<10x100xf32>, vector<1x100xf32> -> vector<1x100xf32>
    %c0_92 = arith.constant 0 : index
    %c0_93 = arith.constant 0 : index
    %155 = vector.load %arg13[%c0_92, %c0_93] : memref<10x100xf32, #tpu.memory_space<vmem>>, vector<10x100xf32>
    %cst_94 = arith.constant dense<0.000000e+00> : vector<1x100xf32>
    %156 = tpu.matmul %152, %155, %cst_94 {dimension_numbers = #tpu.dot_dimension_numbers<[1], [0], [0], [1], [0, 0, 1, 1], [], []>} : vector<1x10xf32>, vector<10x100xf32>, vector<1x100xf32> -> vector<1x100xf32>
    %157 = vector.broadcast %154 : vector<1x100xf32> to vector<10x100xf32>
    %158 = arith.mulf %106, %157 : vector<10x100xf32>
    %159 = vector.broadcast %156 : vector<1x100xf32> to vector<10x100xf32>
    %160 = arith.addf %158, %159 : vector<10x100xf32>
    %161 = vector.broadcast %154 : vector<1x100xf32> to vector<10x100xf32>
    %162 = arith.mulf %122, %161 : vector<10x100xf32>
    %163 = vector.broadcast %156 : vector<1x100xf32> to vector<10x100xf32>
    %164 = arith.addf %162, %163 : vector<10x100xf32>
    %c0_95 = arith.constant 0 : index
    %c0_96 = arith.constant 0 : index
    %165 = vector.load %arg16[%c0_95, %c0_96] : memref<100x8xf32, #tpu.memory_space<vmem>>, vector<100x8xf32>
    %c0_97 = arith.constant 0 : index
    %c0_98 = arith.constant 0 : index
    %166 = vector.load %arg17[%c0_97, %c0_98] : memref<1x8xf32, #tpu.memory_space<vmem>>, vector<1x8xf32>
    %c0_99 = arith.constant 0 : index
    %c0_100 = arith.constant 0 : index
    %167 = vector.load %arg15[%c0_99, %c0_100] : memref<1x100xf32, #tpu.memory_space<vmem>>, vector<1x100xf32>
    %168 = vector.extract_strided_slice %160 {offsets = [0, 0], sizes = [1, 100], strides = [1, 1]} : vector<10x100xf32> to vector<1x100xf32>
    %c0_101 = arith.constant 0 : index
    %c0_102 = arith.constant 0 : index
    %c0_103 = arith.constant 0 : index
    %169 = vector.load %arg14[%c0_101, %c0_102, %c0_103] : memref<10x100x100xf32, #tpu.memory_space<vmem>>, vector<1x100x100xf32>
    %170 = vector.shape_cast %169 : vector<1x100x100xf32> to vector<100x100xf32>
    %cst_104 = arith.constant dense<0.000000e+00> : vector<1x100xf32>
    %171 = tpu.matmul %168, %170, %cst_104 {dimension_numbers = #tpu.dot_dimension_numbers<[1], [0], [0], [1], [0, 0, 1, 1], [], []>} : vector<1x100xf32>, vector<100x100xf32>, vector<1x100xf32> -> vector<1x100xf32>
    %172 = arith.addf %167, %171 : vector<1x100xf32>
    %173 = vector.extract_strided_slice %160 {offsets = [1, 0], sizes = [1, 100], strides = [1, 1]} : vector<10x100xf32> to vector<1x100xf32>
    %c1_105 = arith.constant 1 : index
    %c0_106 = arith.constant 0 : index
    %c0_107 = arith.constant 0 : index
    %174 = vector.load %arg14[%c1_105, %c0_106, %c0_107] : memref<10x100x100xf32, #tpu.memory_space<vmem>>, vector<1x100x100xf32>
    %175 = vector.shape_cast %174 : vector<1x100x100xf32> to vector<100x100xf32>
    %cst_108 = arith.constant dense<0.000000e+00> : vector<1x100xf32>
    %176 = tpu.matmul %173, %175, %cst_108 {dimension_numbers = #tpu.dot_dimension_numbers<[1], [0], [0], [1], [0, 0, 1, 1], [], []>} : vector<1x100xf32>, vector<100x100xf32>, vector<1x100xf32> -> vector<1x100xf32>
    %177 = arith.addf %172, %176 : vector<1x100xf32>
    %178 = vector.extract_strided_slice %160 {offsets = [2, 0], sizes = [1, 100], strides = [1, 1]} : vector<10x100xf32> to vector<1x100xf32>
    %c2_109 = arith.constant 2 : index
    %c0_110 = arith.constant 0 : index
    %c0_111 = arith.constant 0 : index
    %179 = vector.load %arg14[%c2_109, %c0_110, %c0_111] : memref<10x100x100xf32, #tpu.memory_space<vmem>>, vector<1x100x100xf32>
    %180 = vector.shape_cast %179 : vector<1x100x100xf32> to vector<100x100xf32>
    %cst_112 = arith.constant dense<0.000000e+00> : vector<1x100xf32>
    %181 = tpu.matmul %178, %180, %cst_112 {dimension_numbers = #tpu.dot_dimension_numbers<[1], [0], [0], [1], [0, 0, 1, 1], [], []>} : vector<1x100xf32>, vector<100x100xf32>, vector<1x100xf32> -> vector<1x100xf32>
    %182 = arith.addf %177, %181 : vector<1x100xf32>
    %183 = vector.extract_strided_slice %160 {offsets = [3, 0], sizes = [1, 100], strides = [1, 1]} : vector<10x100xf32> to vector<1x100xf32>
    %c3_113 = arith.constant 3 : index
    %c0_114 = arith.constant 0 : index
    %c0_115 = arith.constant 0 : index
    %184 = vector.load %arg14[%c3_113, %c0_114, %c0_115] : memref<10x100x100xf32, #tpu.memory_space<vmem>>, vector<1x100x100xf32>
    %185 = vector.shape_cast %184 : vector<1x100x100xf32> to vector<100x100xf32>
    %cst_116 = arith.constant dense<0.000000e+00> : vector<1x100xf32>
    %186 = tpu.matmul %183, %185, %cst_116 {dimension_numbers = #tpu.dot_dimension_numbers<[1], [0], [0], [1], [0, 0, 1, 1], [], []>} : vector<1x100xf32>, vector<100x100xf32>, vector<1x100xf32> -> vector<1x100xf32>
    %187 = arith.addf %182, %186 : vector<1x100xf32>
    %188 = vector.extract_strided_slice %160 {offsets = [4, 0], sizes = [1, 100], strides = [1, 1]} : vector<10x100xf32> to vector<1x100xf32>
    %c4 = arith.constant 4 : index
    %c0_117 = arith.constant 0 : index
    %c0_118 = arith.constant 0 : index
    %189 = vector.load %arg14[%c4, %c0_117, %c0_118] : memref<10x100x100xf32, #tpu.memory_space<vmem>>, vector<1x100x100xf32>
    %190 = vector.shape_cast %189 : vector<1x100x100xf32> to vector<100x100xf32>
    %cst_119 = arith.constant dense<0.000000e+00> : vector<1x100xf32>
    %191 = tpu.matmul %188, %190, %cst_119 {dimension_numbers = #tpu.dot_dimension_numbers<[1], [0], [0], [1], [0, 0, 1, 1], [], []>} : vector<1x100xf32>, vector<100x100xf32>, vector<1x100xf32> -> vector<1x100xf32>
    %192 = arith.addf %187, %191 : vector<1x100xf32>
    %193 = vector.extract_strided_slice %160 {offsets = [5, 0], sizes = [1, 100], strides = [1, 1]} : vector<10x100xf32> to vector<1x100xf32>
    %c5 = arith.constant 5 : index
    %c0_120 = arith.constant 0 : index
    %c0_121 = arith.constant 0 : index
    %194 = vector.load %arg14[%c5, %c0_120, %c0_121] : memref<10x100x100xf32, #tpu.memory_space<vmem>>, vector<1x100x100xf32>
    %195 = vector.shape_cast %194 : vector<1x100x100xf32> to vector<100x100xf32>
    %cst_122 = arith.constant dense<0.000000e+00> : vector<1x100xf32>
    %196 = tpu.matmul %193, %195, %cst_122 {dimension_numbers = #tpu.dot_dimension_numbers<[1], [0], [0], [1], [0, 0, 1, 1], [], []>} : vector<1x100xf32>, vector<100x100xf32>, vector<1x100xf32> -> vector<1x100xf32>
    %197 = arith.addf %192, %196 : vector<1x100xf32>
    %198 = vector.extract_strided_slice %160 {offsets = [6, 0], sizes = [1, 100], strides = [1, 1]} : vector<10x100xf32> to vector<1x100xf32>
    %c6 = arith.constant 6 : index
    %c0_123 = arith.constant 0 : index
    %c0_124 = arith.constant 0 : index
    %199 = vector.load %arg14[%c6, %c0_123, %c0_124] : memref<10x100x100xf32, #tpu.memory_space<vmem>>, vector<1x100x100xf32>
    %200 = vector.shape_cast %199 : vector<1x100x100xf32> to vector<100x100xf32>
    %cst_125 = arith.constant dense<0.000000e+00> : vector<1x100xf32>
    %201 = tpu.matmul %198, %200, %cst_125 {dimension_numbers = #tpu.dot_dimension_numbers<[1], [0], [0], [1], [0, 0, 1, 1], [], []>} : vector<1x100xf32>, vector<100x100xf32>, vector<1x100xf32> -> vector<1x100xf32>
    %202 = arith.addf %197, %201 : vector<1x100xf32>
    %203 = vector.extract_strided_slice %160 {offsets = [7, 0], sizes = [1, 100], strides = [1, 1]} : vector<10x100xf32> to vector<1x100xf32>
    %c7 = arith.constant 7 : index
    %c0_126 = arith.constant 0 : index
    %c0_127 = arith.constant 0 : index
    %204 = vector.load %arg14[%c7, %c0_126, %c0_127] : memref<10x100x100xf32, #tpu.memory_space<vmem>>, vector<1x100x100xf32>
    %205 = vector.shape_cast %204 : vector<1x100x100xf32> to vector<100x100xf32>
    %cst_128 = arith.constant dense<0.000000e+00> : vector<1x100xf32>
    %206 = tpu.matmul %203, %205, %cst_128 {dimension_numbers = #tpu.dot_dimension_numbers<[1], [0], [0], [1], [0, 0, 1, 1], [], []>} : vector<1x100xf32>, vector<100x100xf32>, vector<1x100xf32> -> vector<1x100xf32>
    %207 = arith.addf %202, %206 : vector<1x100xf32>
    %208 = vector.extract_strided_slice %160 {offsets = [8, 0], sizes = [1, 100], strides = [1, 1]} : vector<10x100xf32> to vector<1x100xf32>
    %c8 = arith.constant 8 : index
    %c0_129 = arith.constant 0 : index
    %c0_130 = arith.constant 0 : index
    %209 = vector.load %arg14[%c8, %c0_129, %c0_130] : memref<10x100x100xf32, #tpu.memory_space<vmem>>, vector<1x100x100xf32>
    %210 = vector.shape_cast %209 : vector<1x100x100xf32> to vector<100x100xf32>
    %cst_131 = arith.constant dense<0.000000e+00> : vector<1x100xf32>
    %211 = tpu.matmul %208, %210, %cst_131 {dimension_numbers = #tpu.dot_dimension_numbers<[1], [0], [0], [1], [0, 0, 1, 1], [], []>} : vector<1x100xf32>, vector<100x100xf32>, vector<1x100xf32> -> vector<1x100xf32>
    %212 = arith.addf %207, %211 : vector<1x100xf32>
    %213 = vector.extract_strided_slice %160 {offsets = [9, 0], sizes = [1, 100], strides = [1, 1]} : vector<10x100xf32> to vector<1x100xf32>
    %c9 = arith.constant 9 : index
    %c0_132 = arith.constant 0 : index
    %c0_133 = arith.constant 0 : index
    %214 = vector.load %arg14[%c9, %c0_132, %c0_133] : memref<10x100x100xf32, #tpu.memory_space<vmem>>, vector<1x100x100xf32>
    %215 = vector.shape_cast %214 : vector<1x100x100xf32> to vector<100x100xf32>
    %cst_134 = arith.constant dense<0.000000e+00> : vector<1x100xf32>
    %216 = tpu.matmul %213, %215, %cst_134 {dimension_numbers = #tpu.dot_dimension_numbers<[1], [0], [0], [1], [0, 0, 1, 1], [], []>} : vector<1x100xf32>, vector<100x100xf32>, vector<1x100xf32> -> vector<1x100xf32>
    %217 = arith.addf %212, %216 : vector<1x100xf32>
    %cst_135 = arith.constant dense<0.000000e+00> : vector<1x8xf32>
    %218 = tpu.matmul %217, %165, %cst_135 {dimension_numbers = #tpu.dot_dimension_numbers<[1], [0], [0], [1], [0, 0, 1, 1], [], []>} : vector<1x100xf32>, vector<100x8xf32>, vector<1x8xf32> -> vector<1x8xf32>
    %219 = arith.addf %218, %166 : vector<1x8xf32>
    %c0_136 = arith.constant 0 : index
    %c0_137 = arith.constant 0 : index
    %220 = vector.load %arg18[%c0_136, %c0_137] : memref<2x8xf32, #tpu.memory_space<vmem>>, vector<1x8xf32>
    tpu.vector_store %arg18[%c0_136, %c0_137], %219 {strides = array<i32>} : memref<2x8xf32, #tpu.memory_space<vmem>>, vector<1x8xf32>,
    %c0_138 = arith.constant 0 : index
    %c0_139 = arith.constant 0 : index
    %221 = vector.load %arg15[%c0_138, %c0_139] : memref<1x100xf32, #tpu.memory_space<vmem>>, vector<1x100xf32>
    %222 = vector.extract_strided_slice %164 {offsets = [0, 0], sizes = [1, 100], strides = [1, 1]} : vector<10x100xf32> to vector<1x100xf32>
    %c0_140 = arith.constant 0 : index
    %c0_141 = arith.constant 0 : index
    %c0_142 = arith.constant 0 : index
    %223 = vector.load %arg14[%c0_140, %c0_141, %c0_142] : memref<10x100x100xf32, #tpu.memory_space<vmem>>, vector<1x100x100xf32>
    %224 = vector.shape_cast %223 : vector<1x100x100xf32> to vector<100x100xf32>
    %cst_143 = arith.constant dense<0.000000e+00> : vector<1x100xf32>
    %225 = tpu.matmul %222, %224, %cst_143 {dimension_numbers = #tpu.dot_dimension_numbers<[1], [0], [0], [1], [0, 0, 1, 1], [], []>} : vector<1x100xf32>, vector<100x100xf32>, vector<1x100xf32> -> vector<1x100xf32>
    %226 = arith.addf %221, %225 : vector<1x100xf32>
    %227 = vector.extract_strided_slice %164 {offsets = [1, 0], sizes = [1, 100], strides = [1, 1]} : vector<10x100xf32> to vector<1x100xf32>
    %c1_144 = arith.constant 1 : index
    %c0_145 = arith.constant 0 : index
    %c0_146 = arith.constant 0 : index
    %228 = vector.load %arg14[%c1_144, %c0_145, %c0_146] : memref<10x100x100xf32, #tpu.memory_space<vmem>>, vector<1x100x100xf32>
    %229 = vector.shape_cast %228 : vector<1x100x100xf32> to vector<100x100xf32>
    %cst_147 = arith.constant dense<0.000000e+00> : vector<1x100xf32>
    %230 = tpu.matmul %227, %229, %cst_147 {dimension_numbers = #tpu.dot_dimension_numbers<[1], [0], [0], [1], [0, 0, 1, 1], [], []>} : vector<1x100xf32>, vector<100x100xf32>, vector<1x100xf32> -> vector<1x100xf32>
    %231 = arith.addf %226, %230 : vector<1x100xf32>
    %232 = vector.extract_strided_slice %164 {offsets = [2, 0], sizes = [1, 100], strides = [1, 1]} : vector<10x100xf32> to vector<1x100xf32>
    %c2_148 = arith.constant 2 : index
    %c0_149 = arith.constant 0 : index
    %c0_150 = arith.constant 0 : index
    %233 = vector.load %arg14[%c2_148, %c0_149, %c0_150] : memref<10x100x100xf32, #tpu.memory_space<vmem>>, vector<1x100x100xf32>
    %234 = vector.shape_cast %233 : vector<1x100x100xf32> to vector<100x100xf32>
    %cst_151 = arith.constant dense<0.000000e+00> : vector<1x100xf32>
    %235 = tpu.matmul %232, %234, %cst_151 {dimension_numbers = #tpu.dot_dimension_numbers<[1], [0], [0], [1], [0, 0, 1, 1], [], []>} : vector<1x100xf32>, vector<100x100xf32>, vector<1x100xf32> -> vector<1x100xf32>
    %236 = arith.addf %231, %235 : vector<1x100xf32>
    %237 = vector.extract_strided_slice %164 {offsets = [3, 0], sizes = [1, 100], strides = [1, 1]} : vector<10x100xf32> to vector<1x100xf32>
    %c3_152 = arith.constant 3 : index
    %c0_153 = arith.constant 0 : index
    %c0_154 = arith.constant 0 : index
    %238 = vector.load %arg14[%c3_152, %c0_153, %c0_154] : memref<10x100x100xf32, #tpu.memory_space<vmem>>, vector<1x100x100xf32>
    %239 = vector.shape_cast %238 : vector<1x100x100xf32> to vector<100x100xf32>
    %cst_155 = arith.constant dense<0.000000e+00> : vector<1x100xf32>
    %240 = tpu.matmul %237, %239, %cst_155 {dimension_numbers = #tpu.dot_dimension_numbers<[1], [0], [0], [1], [0, 0, 1, 1], [], []>} : vector<1x100xf32>, vector<100x100xf32>, vector<1x100xf32> -> vector<1x100xf32>
    %241 = arith.addf %236, %240 : vector<1x100xf32>
    %242 = vector.extract_strided_slice %164 {offsets = [4, 0], sizes = [1, 100], strides = [1, 1]} : vector<10x100xf32> to vector<1x100xf32>
    %c4_156 = arith.constant 4 : index
    %c0_157 = arith.constant 0 : index
    %c0_158 = arith.constant 0 : index
    %243 = vector.load %arg14[%c4_156, %c0_157, %c0_158] : memref<10x100x100xf32, #tpu.memory_space<vmem>>, vector<1x100x100xf32>
    %244 = vector.shape_cast %243 : vector<1x100x100xf32> to vector<100x100xf32>
    %cst_159 = arith.constant dense<0.000000e+00> : vector<1x100xf32>
    %245 = tpu.matmul %242, %244, %cst_159 {dimension_numbers = #tpu.dot_dimension_numbers<[1], [0], [0], [1], [0, 0, 1, 1], [], []>} : vector<1x100xf32>, vector<100x100xf32>, vector<1x100xf32> -> vector<1x100xf32>
    %246 = arith.addf %241, %245 : vector<1x100xf32>
    %247 = vector.extract_strided_slice %164 {offsets = [5, 0], sizes = [1, 100], strides = [1, 1]} : vector<10x100xf32> to vector<1x100xf32>
    %c5_160 = arith.constant 5 : index
    %c0_161 = arith.constant 0 : index
    %c0_162 = arith.constant 0 : index
    %248 = vector.load %arg14[%c5_160, %c0_161, %c0_162] : memref<10x100x100xf32, #tpu.memory_space<vmem>>, vector<1x100x100xf32>
    %249 = vector.shape_cast %248 : vector<1x100x100xf32> to vector<100x100xf32>
    %cst_163 = arith.constant dense<0.000000e+00> : vector<1x100xf32>
    %250 = tpu.matmul %247, %249, %cst_163 {dimension_numbers = #tpu.dot_dimension_numbers<[1], [0], [0], [1], [0, 0, 1, 1], [], []>} : vector<1x100xf32>, vector<100x100xf32>, vector<1x100xf32> -> vector<1x100xf32>
    %251 = arith.addf %246, %250 : vector<1x100xf32>
    %252 = vector.extract_strided_slice %164 {offsets = [6, 0], sizes = [1, 100], strides = [1, 1]} : vector<10x100xf32> to vector<1x100xf32>
    %c6_164 = arith.constant 6 : index
    %c0_165 = arith.constant 0 : index
    %c0_166 = arith.constant 0 : index
    %253 = vector.load %arg14[%c6_164, %c0_165, %c0_166] : memref<10x100x100xf32, #tpu.memory_space<vmem>>, vector<1x100x100xf32>
    %254 = vector.shape_cast %253 : vector<1x100x100xf32> to vector<100x100xf32>
    %cst_167 = arith.constant dense<0.000000e+00> : vector<1x100xf32>
    %255 = tpu.matmul %252, %254, %cst_167 {dimension_numbers = #tpu.dot_dimension_numbers<[1], [0], [0], [1], [0, 0, 1, 1], [], []>} : vector<1x100xf32>, vector<100x100xf32>, vector<1x100xf32> -> vector<1x100xf32>
    %256 = arith.addf %251, %255 : vector<1x100xf32>
    %257 = vector.extract_strided_slice %164 {offsets = [7, 0], sizes = [1, 100], strides = [1, 1]} : vector<10x100xf32> to vector<1x100xf32>
    %c7_168 = arith.constant 7 : index
    %c0_169 = arith.constant 0 : index
    %c0_170 = arith.constant 0 : index
    %258 = vector.load %arg14[%c7_168, %c0_169, %c0_170] : memref<10x100x100xf32, #tpu.memory_space<vmem>>, vector<1x100x100xf32>
    %259 = vector.shape_cast %258 : vector<1x100x100xf32> to vector<100x100xf32>
    %cst_171 = arith.constant dense<0.000000e+00> : vector<1x100xf32>
    %260 = tpu.matmul %257, %259, %cst_171 {dimension_numbers = #tpu.dot_dimension_numbers<[1], [0], [0], [1], [0, 0, 1, 1], [], []>} : vector<1x100xf32>, vector<100x100xf32>, vector<1x100xf32> -> vector<1x100xf32>
    %261 = arith.addf %256, %260 : vector<1x100xf32>
    %262 = vector.extract_strided_slice %164 {offsets = [8, 0], sizes = [1, 100], strides = [1, 1]} : vector<10x100xf32> to vector<1x100xf32>
    %c8_172 = arith.constant 8 : index
    %c0_173 = arith.constant 0 : index
    %c0_174 = arith.constant 0 : index
    %263 = vector.load %arg14[%c8_172, %c0_173, %c0_174] : memref<10x100x100xf32, #tpu.memory_space<vmem>>, vector<1x100x100xf32>
    %264 = vector.shape_cast %263 : vector<1x100x100xf32> to vector<100x100xf32>
    %cst_175 = arith.constant dense<0.000000e+00> : vector<1x100xf32>
    %265 = tpu.matmul %262, %264, %cst_175 {dimension_numbers = #tpu.dot_dimension_numbers<[1], [0], [0], [1], [0, 0, 1, 1], [], []>} : vector<1x100xf32>, vector<100x100xf32>, vector<1x100xf32> -> vector<1x100xf32>
    %266 = arith.addf %261, %265 : vector<1x100xf32>
    %267 = vector.extract_strided_slice %164 {offsets = [9, 0], sizes = [1, 100], strides = [1, 1]} : vector<10x100xf32> to vector<1x100xf32>
    %c9_176 = arith.constant 9 : index
    %c0_177 = arith.constant 0 : index
    %c0_178 = arith.constant 0 : index
    %268 = vector.load %arg14[%c9_176, %c0_177, %c0_178] : memref<10x100x100xf32, #tpu.memory_space<vmem>>, vector<1x100x100xf32>
    %269 = vector.shape_cast %268 : vector<1x100x100xf32> to vector<100x100xf32>
    %cst_179 = arith.constant dense<0.000000e+00> : vector<1x100xf32>
    %270 = tpu.matmul %267, %269, %cst_179 {dimension_numbers = #tpu.dot_dimension_numbers<[1], [0], [0], [1], [0, 0, 1, 1], [], []>} : vector<1x100xf32>, vector<100x100xf32>, vector<1x100xf32> -> vector<1x100xf32>
    %271 = arith.addf %266, %270 : vector<1x100xf32>
    %cst_180 = arith.constant dense<0.000000e+00> : vector<1x8xf32>
    %272 = tpu.matmul %271, %165, %cst_180 {dimension_numbers = #tpu.dot_dimension_numbers<[1], [0], [0], [1], [0, 0, 1, 1], [], []>} : vector<1x100xf32>, vector<100x8xf32>, vector<1x8xf32> -> vector<1x8xf32>
    %273 = arith.addf %272, %166 : vector<1x8xf32>
    %c1_181 = arith.constant 1 : index
    %c0_182 = arith.constant 0 : index
    %274 = vector.load %arg18[%c1_181, %c0_182] : memref<2x8xf32, #tpu.memory_space<vmem>>, vector<1x8xf32>
    tpu.vector_store %arg18[%c1_181, %c0_182], %273 {strides = array<i32>} : memref<2x8xf32, #tpu.memory_space<vmem>>, vector<1x8xf32>,
    return
  }
  func.func @transform_0(%arg0: i32) -> (i32, i32) {
    %c0_i32 = arith.constant 0 : i32
    %c0_i32_0 = arith.constant 0 : i32
    %c0_i32_1 = arith.constant 0 : i32
    return %c0_i32, %c0_i32_0 : i32, i32
  }
  func.func @transform_1(%arg0: i32) -> (i32, i32, i32) {
    %c0_i32 = arith.constant 0 : i32
    %c0_i32_0 = arith.constant 0 : i32
    %c0_i32_1 = arith.constant 0 : i32
    %c0_i32_2 = arith.constant 0 : i32
    return %c0_i32, %c0_i32_0, %c0_i32_1 : i32, i32, i32
  }
  func.func @transform_2(%arg0: i32) -> (i32, i32) {
    %c0_i32 = arith.constant 0 : i32
    %c0_i32_0 = arith.constant 0 : i32
    %c0_i32_1 = arith.constant 0 : i32
    return %c0_i32, %c0_i32_0 : i32, i32
  }
  func.func @transform_3(%arg0: i32) -> (i32, i32) {
    %c0_i32 = arith.constant 0 : i32
    %c0_i32_0 = arith.constant 0 : i32
    %c0_i32_1 = arith.constant 0 : i32
    return %c0_i32, %c0_i32_0 : i32, i32
  }
  func.func @transform_4(%arg0: i32) -> (i32, i32) {
    %c0_i32 = arith.constant 0 : i32
    %c0_i32_0 = arith.constant 0 : i32
    %c0_i32_1 = arith.constant 0 : i32
    return %c0_i32, %c0_i32_0 : i32, i32
  }
  func.func @transform_5(%arg0: i32) -> (i32, i32) {
    %c0_i32 = arith.constant 0 : i32
    %c0_i32_0 = arith.constant 0 : i32
    %c0_i32_1 = arith.constant 0 : i32
    return %c0_i32, %c0_i32_0 : i32, i32
  }
  func.func @transform_6(%arg0: i32) -> (i32, i32) {
    %c0_i32 = arith.constant 0 : i32
    %c0_i32_0 = arith.constant 0 : i32
    %c0_i32_1 = arith.constant 0 : i32
    return %c0_i32, %c0_i32_0 : i32, i32
  }
  func.func @transform_7(%arg0: i32) -> (i32, i32, i32) {
    %c0_i32 = arith.constant 0 : i32
    %c0_i32_0 = arith.constant 0 : i32
    %c0_i32_1 = arith.constant 0 : i32
    %c0_i32_2 = arith.constant 0 : i32
    return %c0_i32, %c0_i32_0, %c0_i32_1 : i32, i32, i32
  }
  func.func @transform_8(%arg0: i32) -> (i32, i32) {
    %c0_i32 = arith.constant 0 : i32
    %c0_i32_0 = arith.constant 0 : i32
    %c0_i32_1 = arith.constant 0 : i32
    return %c0_i32, %c0_i32_0 : i32, i32
  }
  func.func @transform_9(%arg0: i32) -> (i32, i32) {
    %c0_i32 = arith.constant 0 : i32
    %c0_i32_0 = arith.constant 0 : i32
    %c0_i32_1 = arith.constant 0 : i32
    return %c0_i32, %c0_i32_0 : i32, i32
  }
  func.func @transform_10(%arg0: i32) -> (i32, i32) {
    %c0_i32 = arith.constant 0 : i32
    %c0_i32_0 = arith.constant 0 : i32
    %c0_i32_1 = arith.constant 0 : i32
    return %c0_i32, %c0_i32_0 : i32, i32
  }
  func.func @transform_11(%arg0: i32) -> (i32, i32) {
    %c0_i32 = arith.constant 0 : i32
    %c0_i32_0 = arith.constant 0 : i32
    %c0_i32_1 = arith.constant 0 : i32
    return %c0_i32, %c0_i32_0 : i32, i32
  }
  func.func @transform_12(%arg0: i32) -> (i32, i32) {
    %c0_i32 = arith.constant 0 : i32
    %c0_i32_0 = arith.constant 0 : i32
    %c0_i32_1 = arith.constant 0 : i32
    return %c0_i32, %c0_i32_0 : i32, i32
  }
  func.func @transform_13(%arg0: i32) -> (i32, i32, i32) {
    %c0_i32 = arith.constant 0 : i32
    %c0_i32_0 = arith.constant 0 : i32
    %c0_i32_1 = arith.constant 0 : i32
    %c0_i32_2 = arith.constant 0 : i32
    return %c0_i32, %c0_i32_0, %c0_i32_1 : i32, i32, i32
  }
  func.func @transform_14(%arg0: i32) -> (i32, i32) {
    %c0_i32 = arith.constant 0 : i32
    %c0_i32_0 = arith.constant 0 : i32
    %c0_i32_1 = arith.constant 0 : i32
    return %c0_i32, %c0_i32_0 : i32, i32
  }
  func.func @transform_15(%arg0: i32) -> (i32, i32) {
    %c0_i32 = arith.constant 0 : i32
    %c0_i32_0 = arith.constant 0 : i32
    %c0_i32_1 = arith.constant 0 : i32
    return %c0_i32, %c0_i32_0 : i32, i32
  }
  func.func @transform_16(%arg0: i32) -> (i32, i32) {
    %c0_i32 = arith.constant 0 : i32
    %c0_i32_0 = arith.constant 0 : i32
    %c0_i32_1 = arith.constant 0 : i32
    return %c0_i32, %c0_i32_0 : i32, i32
  }
  func.func @transform_17(%arg0: i32) -> (i32, i32) {
    %c0_i32 = arith.constant 0 : i32
    %c0_i32_0 = arith.constant 0 : i32
    %c0_i32_1 = arith.constant 0 : i32
    return %c0_i32, %c0_i32_0 : i32, i32
  }
}

</mosaic_0001>

<bundles_post_ra>
// kernel: tile.14
= control target key start
LH: loop header
LB: loop body
LE: loop exit
PB: predicated region body
PF: predicated region fallthrough
CT: control target
= control target key end

     0   :  { %s107_s10 = smov 60   ;;  %s108_s11 = smov 50   ;;  %vm3_vm0 = vcmask 39936   ;;  %vm9_vm1 = vcmask 531936   ;;  %vm15_vm2 = vcmask 490936   ;;  %vm21_vm3 = vcmask 449936   ;;  %s171_s0 = inlined_call_operand.vmem [shape: f32[13,5], index: 0, kind: input, shape index: {}]   ;;  %s172_s1 = inlined_call_operand.vmem [shape: f32[1,65], index: 1, kind: output, shape index: {}]  }
   0x1   :  { %v83_v0 = vld [vmem:[%s171_s0 + $0xc] sm:$0x1]   ;;  %v85_v1 = vld [vmem:[%s171_s0 + $0xa] sm:$0x1]   ;;  %v84_v2 = vld [vmem:[%s171_s0 + $0xb] sm:$0x1]  }
   0x2   :  { %7 = vrot.lane.b32.xlu0 %v83_v0, %s107_s10  ;;  %19 = vrot.lane.b32.xlu1 %v85_v1, %s108_s11  ;;  %v86_v3 = vld [vmem:[%s171_s0 + $0x9] sm:$0x1]   ;;  %s109_s16 = smov 55   ;;  %s110_s17 = smov 45   ;;  %v87_v4 = vld [vmem:[%s171_s0 + $0x8] sm:$0x1]  }
   0x3   :  { %v88_v5 = vld [vmem:[%s171_s0 + $0x7] sm:$0x1]   ;;  %v2_v6 = vld [vmem:[%s171_s0] sm:$0x1]   ;;  %s111_s24 = smov 40   ;;  %s112_s25 = smov 35  }
   0x4   :  { %4 = vst.msk [vmem:[#allocation0] sm:$0x1] %vm3_vm0, %v2_v6   ;;  %v89_v7 = vld [vmem:[%s171_s0 + $0x6] sm:$0x1]   ;;  %v90_v8 = vld [vmem:[%s171_s0 + $0x5] sm:$0x1]  }
   0x5   :  { %s113_s30 = smov 30   ;;  %s114_s2 = smov 25   ;;  %v91_v9 = vld [vmem:[%s171_s0 + $0x4] sm:$0x1]   ;;  %v92_v10 = vld [vmem:[%s171_s0 + $0x3] sm:$0x1]  }
   0x6   :  { %13 = vrot.lane.b32.xlu0 %v84_v2, %s109_s16  ;;  %25 = vrot.lane.b32.xlu1 %v86_v3, %s110_s17  ;;  %s115_s7 = smov 20   ;;  %s116_s8 = smov 15   ;;  %v93_v11 = vld [vmem:[%s171_s0 + $0x2] sm:$0x1]   ;;  %v94_v12 = vld [vmem:[%s171_s0 + $0x1] sm:$0x1]  }
   0x7   :  { %s117_s0 = smov 10   ;;  %s118_s13 = smov 5   ;;  %vm27_vm4 = vcmask 408936   ;;  %vm33_vm5 = vcmask 367936   ;;  %vm39_vm6 = vcmask 326936   ;;  %vm45_vm7 = vcmask 285936  }
   0x8   :  { %vm51_vm8 = vcmask 244936   ;;  %vm57_vm9 = vcmask 203936   ;;  %vm63_vm10 = vcmask 162936   ;;  %vm69_vm11 = vcmask 121936  }
   0x9   :  { %vm75_vm12 = vcmask 80936  }
   0xa   :  { %31 = vrot.lane.b32.xlu0 %v87_v4, %s111_s24  ;;  %37 = vrot.lane.b32.xlu1 %v88_v5, %s112_s25 }
   0xe   :  { %43 = vrot.lane.b32.xlu0 %v89_v7, %s113_s30  ;;  %49 = vrot.lane.b32.xlu1 %v90_v8, %s114_s2 }
  0x12   :  { %55 = vrot.lane.b32.xlu0 %v91_v9, %s115_s7  ;;  %61 = vrot.lane.b32.xlu1 %v92_v10, %s116_s8 }
  0x16   :  { %67 = vrot.lane.b32.xlu0 %v93_v11, %s117_s0  ;;  %73 = vrot.lane.b32.xlu1 %v94_v12, %s118_s13 }
  0x74   :  { %v8_v13 = vpop.permute.xlu0 %7   ;;  %v20_v14 = vpop.permute.xlu1 %19  }
  0x75   :  { %10 = vst.msk [vmem:[#allocation0] sm:$0x1] %vm9_vm1, %v8_v13  }
  0x78   :  { %v14_v15 = vpop.permute.xlu0 %13   ;;  %v26_v16 = vpop.permute.xlu1 %25  }
  0x79   :  { %16 = vst.msk [vmem:[#allocation0] sm:$0x1] %vm15_vm2, %v14_v15  }
  0x7a   :  { %22 = vst.msk [vmem:[#allocation0] sm:$0x1] %vm21_vm3, %v20_v14  }
  0x7b   :  { %28 = vst.msk [vmem:[#allocation0] sm:$0x1] %vm27_vm4, %v26_v16  }
  0x7c   :  { %v32_v17 = vpop.permute.xlu0 %31   ;;  %v38_v18 = vpop.permute.xlu1 %37  }
  0x7d   :  { %34 = vst.msk [vmem:[#allocation0] sm:$0x1] %vm33_vm5, %v32_v17  }
  0x7e   :  { %40 = vst.msk [vmem:[#allocation0] sm:$0x1] %vm39_vm6, %v38_v18  }
  0x80   :  { %v44_v19 = vpop.permute.xlu0 %43   ;;  %v50_v20 = vpop.permute.xlu1 %49  }
  0x81   :  { %46 = vst.msk [vmem:[#allocation0] sm:$0x1] %vm45_vm7, %v44_v19  }
  0x82   :  { %52 = vst.msk [vmem:[#allocation0] sm:$0x1] %vm51_vm8, %v50_v20  }
  0x84   :  { %v56_v21 = vpop.permute.xlu0 %55   ;;  %v62_v22 = vpop.permute.xlu1 %61  }
  0x85   :  { %58 = vst.msk [vmem:[#allocation0] sm:$0x1] %vm57_vm9, %v56_v21  }
  0x86   :  { %64 = vst.msk [vmem:[#allocation0] sm:$0x1] %vm63_vm10, %v62_v22  }
  0x88   :  { %v68_v23 = vpop.permute.xlu0 %67   ;;  %v74_v24 = vpop.permute.xlu1 %73  }
  0x89   :  { %70 = vst.msk [vmem:[#allocation0] sm:$0x1] %vm69_vm11, %v68_v23  }
  0x8a   :  { %76 = vst.msk [vmem:[#allocation0] sm:$0x1] %vm75_vm12, %v74_v24  }
  0x91   :  { %v80_v25 = vld [vmem:[#allocation0] sm:$0x1] }
  0x92   :  { %82 = vst [vmem:[%s172_s1] sm:$0x1] %v80_v25 }

// kernel: tile.18
= control target key start
LH: loop header
LB: loop body
LE: loop exit
PB: predicated region body
PF: predicated region fallthrough
CT: control target
= control target key end

     0   :  { %s28_s0 = inlined_call_operand.vmem [shape: f32[10], index: 0, kind: input, shape index: {}]   ;;  %s29_s1 = inlined_call_operand.vmem [shape: f32[10,10], index: 1, kind: output, shape index: {}]  }
   0x1   :  { %v4_v0 = vld [vmem:[%s28_s0] ss:$0 sm:$0xff] }
   0x2   :  { %5 = vst [vmem:[%s29_s1] sm:$0xff] %v4_v0  ;;  %8 = vst [vmem:[%s29_s1 + $0x8] sm:$0xff] %v4_v0 }

// kernel: tile.13
= control target key start
LH: loop header
LB: loop body
LE: loop exit
PB: predicated region body
PF: predicated region fallthrough
CT: control target
= control target key end

     0   :  { %s28_s0 = inlined_call_operand.vmem [shape: f32[5], index: 0, kind: input, shape index: {}]   ;;  %s29_s1 = inlined_call_operand.vmem [shape: f32[13,5], index: 1, kind: output, shape index: {}]  }
   0x1   :  { %v4_v0 = vld [vmem:[%s28_s0] ss:$0 sm:$0xff] }
   0x2   :  { %5 = vst [vmem:[%s29_s1] sm:$0xff] %v4_v0  ;;  %8 = vst [vmem:[%s29_s1 + $0x8] sm:$0xff] %v4_v0 }

// kernel: tile.19
= control target key start
LH: loop header
LB: loop body
LE: loop exit
PB: predicated region body
PF: predicated region fallthrough
CT: control target
= control target key end

     0   :  { %s83_s10 = smov 90   ;;  %s84_s11 = smov 70   ;;  %vm3_vm0 = vcmask 80896   ;;  %vm9_vm1 = vcmask 818896   ;;  %vm15_vm2 = vcmask 736896   ;;  %vm21_vm3 = vcmask 654896   ;;  %s135_s0 = inlined_call_operand.vmem [shape: f32[10,10], index: 0, kind: input, shape index: {}]   ;;  %s136_s1 = inlined_call_operand.vmem [shape: f32[1,100], index: 1, kind: output, shape index: {}]  }
   0x1   :  { %v65_v0 = vld [vmem:[%s135_s0 + $0x9] sm:$0x1]   ;;  %v67_v1 = vld [vmem:[%s135_s0 + $0x7] sm:$0x1]   ;;  %v66_v2 = vld [vmem:[%s135_s0 + $0x8] sm:$0x1]  }
   0x2   :  { %7 = vrot.lane.b32.xlu0 %v65_v0, %s83_s10  ;;  %19 = vrot.lane.b32.xlu1 %v67_v1, %s84_s11  ;;  %v68_v3 = vld [vmem:[%s135_s0 + $0x6] sm:$0x1]   ;;  %v2_v4 = vld [vmem:[%s135_s0] sm:$0x1]   ;;  %s85_s18 = smov 80   ;;  %s86_s19 = smov 60  }
   0x3   :  { %v69_v5 = vld [vmem:[%s135_s0 + $0x5] sm:$0x1]   ;;  %v70_v6 = vld [vmem:[%s135_s0 + $0x4] sm:$0x1]   ;;  %4 = vst.msk [vmem:[#allocation0] sm:$0x1] %vm3_vm0, %v2_v4  }
   0x4   :  { %s87_s24 = smov 50   ;;  %s88_s25 = smov 40   ;;  %v71_v7 = vld [vmem:[%s135_s0 + $0x3] sm:$0x1]   ;;  %v72_v8 = vld [vmem:[%s135_s0 + $0x2] sm:$0x1]  }
   0x5   :  { %s89_s30 = smov 30   ;;  %s90_s2 = smov 20   ;;  %v73_v9 = vld [vmem:[%s135_s0 + $0x1] sm:$0x1]   ;;  %vm27_vm4 = vcmask 572896   ;;  %vm33_vm5 = vcmask 490896  }
   0x6   :  { %13 = vrot.lane.b32.xlu0 %v66_v2, %s85_s18  ;;  %25 = vrot.lane.b32.xlu1 %v68_v3, %s86_s19  ;;  %s91_s0 = smov 10   ;;  %vm39_vm6 = vcmask 408896   ;;  %vm45_vm7 = vcmask 326896   ;;  %vm51_vm8 = vcmask 244896   ;;  %vm57_vm9 = vcmask 162896  }
   0xa   :  { %31 = vrot.lane.b32.xlu0 %v69_v5, %s87_s24  ;;  %37 = vrot.lane.b32.xlu1 %v70_v6, %s88_s25 }
   0xe   :  { %43 = vrot.lane.b32.xlu0 %v71_v7, %s89_s30  ;;  %49 = vrot.lane.b32.xlu1 %v72_v8, %s90_s2 }
  0x12   :  { %55 = vrot.lane.b32.xlu0 %v73_v9, %s91_s0 }
  0x74   :  { %v8_v10 = vpop.permute.xlu0 %7   ;;  %v20_v11 = vpop.permute.xlu1 %19  }
  0x75   :  { %10 = vst.msk [vmem:[#allocation0] sm:$0x1] %vm9_vm1, %v8_v10  }
  0x78   :  { %v14_v12 = vpop.permute.xlu0 %13   ;;  %v26_v13 = vpop.permute.xlu1 %25  }
  0x79   :  { %16 = vst.msk [vmem:[#allocation0] sm:$0x1] %vm15_vm2, %v14_v12  }
  0x7a   :  { %22 = vst.msk [vmem:[#allocation0] sm:$0x1] %vm21_vm3, %v20_v11  }
  0x7b   :  { %28 = vst.msk [vmem:[#allocation0] sm:$0x1] %vm27_vm4, %v26_v13  }
  0x7c   :  { %v32_v14 = vpop.permute.xlu0 %31   ;;  %v38_v15 = vpop.permute.xlu1 %37  }
  0x7d   :  { %34 = vst.msk [vmem:[#allocation0] sm:$0x1] %vm33_vm5, %v32_v14  }
  0x7e   :  { %40 = vst.msk [vmem:[#allocation0] sm:$0x1] %vm39_vm6, %v38_v15  }
  0x80   :  { %v44_v16 = vpop.permute.xlu0 %43   ;;  %v50_v17 = vpop.permute.xlu1 %49  }
  0x81   :  { %46 = vst.msk [vmem:[#allocation0] sm:$0x1] %vm45_vm7, %v44_v16  }
  0x82   :  { %52 = vst.msk [vmem:[#allocation0] sm:$0x1] %vm51_vm8, %v50_v17  }
  0x84   :  { %v56_v18 = vpop.permute.xlu0 %55  }
  0x85   :  { %58 = vst.msk [vmem:[#allocation0] sm:$0x1] %vm57_vm9, %v56_v18  }
  0x8c   :  { %v62_v19 = vld [vmem:[#allocation0] sm:$0x1] }
  0x8d   :  { %64 = vst [vmem:[%s136_s1] sm:$0x1] %v62_v19 }

// kernel: qnet_forward.1
= control target key start
LH: loop header
LB: loop body
LE: loop exit
PB: predicated region body
PF: predicated region fallthrough
CT: control target
= control target key end

     0   :  { %s8738_s0 = inlined_call_operand.vmem [shape: f32[32,64], index: 0, kind: input, shape index: {}]   ;;  %s8739_s1 = inlined_call_operand.vmem [shape: f32[4,64,65], index: 1, kind: input, shape index: {}]   ;;  %s8740_s2 = inlined_call_operand.vmem [shape: f32[1,65], index: 2, kind: input, shape index: {}]   ;;  %s8741_s3 = inlined_call_operand.vmem [shape: f32[1,5], index: 3, kind: input, shape index: {}]   ;;  %s8742_s4 = inlined_call_operand.vmem [shape: f32[1,5], index: 4, kind: input, shape index: {}]   ;;  %s8743_s5 = inlined_call_operand.vmem [shape: f32[65,5], index: 5, kind: input, shape index: {}]   ;;  %s8744_s6 = inlined_call_operand.vmem [shape: f32[5,65], index: 6, kind: input, shape index: {}]   ;;  %s8745_s7 = inlined_call_operand.vmem [shape: f32[4,65,100], index: 7, kind: input, shape index: {}]   ;;  %s8746_s8 = inlined_call_operand.vmem [shape: f32[1,100], index: 8, kind: input, shape index: {}]   ;;  %s8747_s9 = inlined_call_operand.vmem [shape: f32[1,10], index: 9, kind: input, shape index: {}]   ;;  %s8748_s10 = inlined_call_operand.vmem [shape: f32[1,10], index: 10, kind: input, shape index: {}]   ;;  %s8749_s11 = inlined_call_operand.vmem [shape: f32[100,10], index: 11, kind: input, shape index: {}]   ;;  %s8750_s12 = inlined_call_operand.vmem [shape: f32[10,100], index: 12, kind: input, shape index: {}]   ;;  %s8751_s13 = inlined_call_operand.vmem [shape: f32[10,100,100], index: 13, kind: input, shape index: {}]   ;;  %s8752_s14 = inlined_call_operand.vmem [shape: f32[1,100], index: 14, kind: input, shape index: {}]   ;;  %s8753_s15 = inlined_call_operand.vmem [shape: f32[100,8], index: 15, kind: input, shape index: {}]   ;;  %s8754_s16 = inlined_call_operand.vmem [shape: f32[1,8], index: 16, kind: input, shape index: {}]   ;;  %s8755_s17 = inlined_call_operand.hbm [shape: f32[2,8], index: 17, kind: output, shape index: {}]  }
   0x1   :  { %8773 = sst [smem:[#allocation16_spill]] %s8738_s0 }
   0x2   :  { %8774 = sst [smem:[#allocation17_spill]] %s8739_s1 }
   0x3   :  { %s8775_s26 = sld [smem:[#allocation17_spill]]  ;;  %s8776_s24 = sld [smem:[#allocation16_spill]]  ;;  %vm137_vm0 = vcmask 1046528   ;;  %vm141_vm1 = vcmask 523264  }
   0x9   :  { %v4258_v0 = vld [vmem:[%s8775_s26 + $0x40] sm:$0xff]  ;;  %v4259_v1 = vld [vmem:[%s8775_s26 + $0x48] sm:$0xff]  ;;  %v4260_v2 = vld [vmem:[%s8775_s26 + $0x50] sm:$0xff] }
   0xa   :  { %v6261_v3 = vpack.c.bf16 %v4259_v1, %v4258_v0  ;;  %v4261_v4 = vld [vmem:[%s8775_s26 + $0x58] sm:$0xff]  ;;  %v4262_v6 = vld [vmem:[%s8775_s26 + $0x60] sm:$0xff]  ;;  %v4263_v7 = vld [vmem:[%s8775_s26 + $0x68] sm:$0xff] }
   0xb   :  { %v6265_v5 = vpack.c.bf16 %v4261_v4, %v4260_v2  ;;  %v7192_v8 = vld [vmem:[%s8776_s24] sm:$0xff]  ;;  %v7197_v9 = vld [vmem:[%s8776_s24 + $0x8] sm:$0xff]  ;;  %v7204_v12 = vld [vmem:[%s8776_s24 + $0x10] sm:$0xff]  ;;  %v6269_v14 = vpack.c.bf16 %v4263_v7, %v4262_v6 }
   0xc   :  { %6262 = vmatprep.subr.bf16.mxu0 %v6261_v3  ;;  %6326 = vmatprep.subr.bf16.mxu1 %v6261_v3  ;;  %v138_v10 = vrot.slane %v7192_v8, 1  ;;  %v139_v11 = vrot.slane %v7197_v9, 1  ;;  %v7209_v13 = vld [vmem:[%s8776_s24 + $0x18] sm:$0xff]  ;;  %v481_v15 = vrot.slane %v7204_v12, 1  ;;  %v4264_v17 = vld [vmem:[%s8775_s26 + $0x70] sm:$0xff]  ;;  %v61_v22 = vld [vmem:[%s8775_s26] sm:$0xff] }
   0xd   :  { %6264 = vmatpush3.bf16.msra.mxu0 %v6261_v3  ;;  %6328 = vmatpush3.bf16.msra.mxu1 %v6261_v3  ;;  %v482_v16 = vrot.slane %v7209_v13, 1  ;;  %v4265_v18 = vld [vmem:[%s8775_s26 + $0x78] sm:$0xff]  ;;  %v62_v23 = vld [vmem:[%s8775_s26 + $0x8] sm:$0xff] }
   0xe   :  { %6266 = vmatprep.subr.bf16.mxu0 %v6265_v5  ;;  %6330 = vmatprep.subr.bf16.mxu1 %v6265_v5  ;;  %v140_v19 = vsel %vm137_vm0, %v138_v10, %v139_v11  ;;  %v6273_v21 = vpack.c.bf16 %v4265_v18, %v4264_v17 }
   0xf   :  { %5195 = vmatprep.mubr.msk.f32.mxu0 %vm141_vm1, %v140_v19  ;;  %v483_v20 = vsel %vm137_vm0, %v481_v15, %v482_v16 }
  0x10   :  { %5271 = vmatprep.mubr.msk.f32.mxu1 %vm141_vm1, %v483_v20 }
  0x11   :  { %6268 = vmatpush3.bf16.msra.mxu0 %v6265_v5  ;;  %6332 = vmatpush3.bf16.msra.mxu1 %v6265_v5 }
  0x12   :  { %6270 = vmatprep.subr.bf16.mxu0 %v6269_v14  ;;  %6334 = vmatprep.subr.bf16.mxu1 %v6269_v14 }
  0x15   :  { %6272 = vmatpush3.bf16.msra.mxu0 %v6269_v14  ;;  %6336 = vmatpush3.bf16.msra.mxu1 %v6269_v14 }
  0x16   :  { %22 = vsyncpa [#allocation3], 0  ;;  %6274 = vmatprep.subr.bf16.mxu0 %v6273_v21  ;;  %6338 = vmatprep.subr.bf16.mxu1 %v6273_v21  ;;  %v6277_v24 = vpack.c.bf16 %v62_v23, %v61_v22  ;;  %v63_v25 = vld [vmem:[%s8775_s26 + $0x10] sm:$0xff]  ;;  %v64_v26 = vld [vmem:[%s8775_s26 + $0x18] sm:$0xff]  ;;  %v301_v39 = vrot.slane %v7192_v8, 2  ;;  %v302_v40 = vrot.slane %v7197_v9, 2 }
  0x17   :  { %v6281_v27 = vpack.c.bf16 %v64_v26, %v63_v25  ;;  %v65_v28 = vld [vmem:[%s8775_s26 + $0x20] sm:$0xff]  ;;  %v66_v29 = vld [vmem:[%s8775_s26 + $0x28] sm:$0xff]  ;;  %v67_v31 = vld [vmem:[%s8775_s26 + $0x30] sm:$0xff]  ;;  %v642_v41 = vrot.slane %v7204_v12, 2  ;;  %v643_v42 = vrot.slane %v7209_v13, 2  ;;  %vm300_vm2 = vcmask 1045504  }
  0x18   :  { %v6285_v30 = vpack.c.bf16 %v66_v29, %v65_v28  ;;  %v68_v32 = vld [vmem:[%s8775_s26 + $0x38] sm:$0xff]  ;;  %v4266_v34 = vld [vmem:[%s8775_s26 + $0x80] sm:$0xff]  ;;  %v4267_v35 = vld [vmem:[%s8775_s26 + $0x88] sm:$0xff]  ;;  %v303_v46 = vsel %vm300_vm2, %v301_v39, %v302_v40  ;;  %v386_v57 = vrot.slane %v7192_v8, 3  ;;  %v387_v58 = vrot.slane %v7197_v9, 3  ;;  %s7080_s21 = smov [#allocation2]  }
  0x19   :  { %6276 = vmatpush3.bf16.msra.mxu0 %v6273_v21  ;;  %6340 = vmatpush3.bf16.msra.mxu1 %v6273_v21  ;;  %v6289_v33 = vpack.c.bf16 %v68_v32, %v67_v31  ;;  %v6293_v36 = vpack.c.bf16 %v4267_v35, %v4266_v34  ;;  %v4268_v37 = vld [vmem:[%s8775_s26 + $0x90] sm:$0xff]  ;;  %v4269_v38 = vld [vmem:[%s8775_s26 + $0x98] sm:$0xff]  ;;  %v4270_v44 = vld [vmem:[%s8775_s26 + $0xa0] sm:$0xff]  ;;  %v644_v47 = vsel %vm300_vm2, %v642_v41, %v643_v42  ;;  %v726_v59 = vrot.slane %v7204_v12, 3  ;;  %s4250_s22 = sshll.u32 %s7080_s21, 4  ;;  %s4251_s22 = int_to_ptr.vmem [resolvable:$true] %s4250_s22 }
  0x1a   :  { %6278 = vmatprep.subr.bf16.mxu0 %v6277_v24  ;;  %6342 = vmatprep.subr.bf16.mxu1 %v6277_v24  ;;  %v6297_v43 = vpack.c.bf16 %v4269_v38, %v4268_v37  ;;  %v4271_v45 = vld [vmem:[%s8775_s26 + $0xa8] sm:$0xff]  ;;  %v4272_v49 = vld [vmem:[%s8775_s26 + $0xb0] sm:$0xff]  ;;  %v4273_v50 = vld [vmem:[%s8775_s26 + $0xb8] sm:$0xff]  ;;  %v727_v60 = vrot.slane %v7209_v13, 3  ;;  %vm385_vm3 = vcmask 1044480   ;;  %vm868_vm4 = vcmask 1040384   ;;  %p7057_p1 = scmp.lt.s32.totalorder %s4251_s22, %s4251_s22 }
  0x1b   :  { %v6301_v48 = vpack.c.bf16 %v4271_v45, %v4270_v44  ;;  %v6305_v51 = vpack.c.bf16 %v4273_v50, %v4272_v49  ;;  %v4274_v52 = vld [vmem:[%s8775_s26 + $0xc0] sm:$0xff]  ;;  %v4275_v53 = vld [vmem:[%s8775_s26 + $0xc8] sm:$0xff]  ;;  %v4276_v55 = vld [vmem:[%s8775_s26 + $0xd0] sm:$0xff]  ;;  %v388_v0 = vsel %vm385_vm3, %v386_v57, %v387_v58  ;;  %v8762_v20 = vmov 0.0  }
  0x1c   :  { %5196 = vmatmul.mubr.msk.f32.vlgmr.msra.gmra.mrb[0].mxu0 %vm141_vm1, %v139_v11  ;;  %5272 = vmatmul.mubr.msk.f32.vlgmr.msra.gmra.mrb[0].mxu1 %vm141_vm1, %v482_v16  ;;  %v6309_v54 = vpack.c.bf16 %v4275_v53, %v4274_v52  ;;  %v4277_v56 = vld [vmem:[%s8775_s26 + $0xd8] sm:$0xff]  ;;  %v4278_v62 = vld [vmem:[%s8775_s26 + $0xe0] sm:$0xff]  ;;  %v4279_v63 = vld [vmem:[%s8775_s26 + $0xe8] sm:$0xff]  ;;  %v728_v1 = vsel %vm385_vm3, %v726_v59, %v727_v60  ;;  %vm7078_vm5 = vmmov 0   ;;  %vm814_vm6 = vcmask 528384  }
  0x1d   :  { %6280 = vmatpush3.bf16.msra.mxu0 %v6277_v24  ;;  %6344 = vmatpush3.bf16.msra.mxu1 %v6277_v24  ;;  %v6313_v61 = vpack.c.bf16 %v4277_v56, %v4276_v55  ;;  %v6317_v2 = vpack.c.bf16 %v4279_v63, %v4278_v62  ;;  %v4280_v3 = vld [vmem:[%s8775_s26 + $0xf0] sm:$0xff]  ;;  %v4281_v4 = vld [vmem:[%s8775_s26 + $0xf8] sm:$0xff]  ;;  %v856_v6 = vld [vmem:[%s8743_s5] sm:$0xff]  ;;  %vm812_vm7 = vcmask 531456   ;;  %vm1028_vm8 = vcmask 39936  }
  0x1e   :  { %6282 = vmatprep.subr.bf16.mxu0 %v6281_v27  ;;  %6346 = vmatprep.subr.bf16.mxu1 %v6281_v27  ;;  %v6321_v5 = vpack.c.bf16 %v4281_v4, %v4280_v3  ;;  %v857_v7 = vld [vmem:[%s8743_s5 + $0x8] sm:$0xff]  ;;  %v858_v10 = vld [vmem:[%s8743_s5 + $0x10] sm:$0xff]  ;;  %v859_v11 = vld [vmem:[%s8743_s5 + $0x18] sm:$0xff]  ;;  %vm1939_vm9 = vcmask 1043456   ;;  %vm1881_vm10 = vcmask 812032   ;;  %vm1879_vm11 = vcmask 818176  }
  0x1f   :  { %5214 = vmatprep.mubr.msk.f32.mxu0 %vm141_vm1, %v7192_v8  ;;  %5290 = vmatprep.mubr.msk.f32.mxu1 %vm141_vm1, %v7204_v12  ;;  %v6390_v8 = vpack.c.bf16 %v857_v7, %v856_v6  ;;  %v6393_v12 = vpack.c.bf16 %v859_v11, %v858_v10  ;;  %v861_v14 = vld [vmem:[%s8743_s5 + $0x28] sm:$0xff]  ;;  %v862_v16 = vld [vmem:[%s8743_s5 + $0x30] sm:$0xff]  ;;  %v863_v17 = vld [vmem:[%s8743_s5 + $0x38] sm:$0xff]  ;;  %vm2104_vm12 = vcmask 1041408   ;;  %vm7079_vm13 = vmmov 1  }
  0x20   :  { %v6399_v18 = vpack.c.bf16 %v863_v17, %v862_v16  ;;  %v864_v19 = vld [vmem:[%s8743_s5 + $0x40] sm:$0x1]  ;;  %v4282_v10 = vld [vmem:[%s8745_s7 + $0x48] sm:$0xff]  ;;  %v4283_v11 = vld [vmem:[%s8745_s7 + $0x50] sm:$0xff]  ;;  %vm2100_vm15 = vcmask 80896  }
  0x21   :  { %6284 = vmatpush3.bf16.msra.mxu0 %v6281_v27  ;;  %6348 = vmatpush3.bf16.msra.mxu1 %v6281_v27  ;;  %v4317_v21 = vld [vmem:[%s8740_s2] ss:$0 sm:$0xff]  ;;  %vm6579_vm14 = vmpackc.low %vm2104_vm12, %vm7079_vm13 }
  0x22   :  { %6286 = vmatprep.subr.bf16.mxu0 %v6285_v30  ;;  %6350 = vmatprep.subr.bf16.mxu1 %v6285_v30 }
  0x25   :  { %6288 = vmatpush3.bf16.msra.mxu0 %v6285_v30  ;;  %6352 = vmatpush3.bf16.msra.mxu1 %v6285_v30 }
  0x26   :  { %6290 = vmatprep.subr.bf16.mxu0 %v6289_v33  ;;  %6354 = vmatprep.subr.bf16.mxu1 %v6289_v33 }
  0x29   :  { %6292 = vmatpush3.bf16.msra.mxu0 %v6289_v33  ;;  %6356 = vmatpush3.bf16.msra.mxu1 %v6289_v33 }
  0x2a   :  { %6294 = vmatprep.subr.bf16.mxu0 %v6293_v36  ;;  %6358 = vmatprep.subr.bf16.mxu1 %v6293_v36 }
  0x2c   :  { %5215 = vmatmul.mubr.msk.f32.vlgmr.msra.gmra.mrb[0].mxu0 %vm141_vm1, %v7197_v9  ;;  %5291 = vmatmul.mubr.msk.f32.vlgmr.msra.gmra.mrb[0].mxu1 %vm141_vm1, %v7209_v13  ;;  %v8759_v9 = vmov 0.0|0.0   ;;  %v860_v13 = vld [vmem:[%s8743_s5 + $0x20] sm:$0xff] }
  0x2d   :  { %6296 = vmatpush3.bf16.msra.mxu0 %v6293_v36  ;;  %6360 = vmatpush3.bf16.msra.mxu1 %v6293_v36  ;;  %v6396_v15 = vpack.c.bf16 %v861_v14, %v860_v13 }
  0x2e   :  { %6298 = vmatprep.subr.bf16.mxu0 %v6297_v43  ;;  %6362 = vmatprep.subr.bf16.mxu1 %v6297_v43 }
  0x2f   :  { %5233 = vmatprep.mubr.msk.f32.mxu0 %vm141_vm1, %v303_v46  ;;  %5309 = vmatprep.mubr.msk.f32.mxu1 %vm141_vm1, %v644_v47 }
  0x31   :  { %6300 = vmatpush3.bf16.msra.mxu0 %v6297_v43  ;;  %6364 = vmatpush3.bf16.msra.mxu1 %v6297_v43 }
  0x32   :  { %6302 = vmatprep.subr.bf16.mxu0 %v6301_v48  ;;  %6366 = vmatprep.subr.bf16.mxu1 %v6301_v48 }
  0x35   :  { %6304 = vmatpush3.bf16.msra.mxu0 %v6301_v48  ;;  %6368 = vmatpush3.bf16.msra.mxu1 %v6301_v48 }
  0x36   :  { %6306 = vmatprep.subr.bf16.mxu0 %v6305_v51  ;;  %6370 = vmatprep.subr.bf16.mxu1 %v6305_v51 }
  0x39   :  { %6308 = vmatpush3.bf16.msra.mxu0 %v6305_v51  ;;  %6372 = vmatpush3.bf16.msra.mxu1 %v6305_v51 }
  0x3a   :  { %6310 = vmatprep.subr.bf16.mxu0 %v6309_v54  ;;  %6374 = vmatprep.subr.bf16.mxu1 %v6309_v54 }
  0x3c   :  { %5234 = vmatmul.mubr.msk.f32.vlgmr.msra.gmra.mrb[0].mxu0 %vm141_vm1, %v302_v40  ;;  %5310 = vmatmul.mubr.msk.f32.vlgmr.msra.gmra.mrb[0].mxu1 %vm141_vm1, %v643_v42 }
  0x3d   :  { %6312 = vmatpush3.bf16.msra.mxu0 %v6309_v54  ;;  %6376 = vmatpush3.bf16.msra.mxu1 %v6309_v54 }
  0x3e   :  { %6314 = vmatprep.subr.bf16.mxu0 %v6313_v61  ;;  %6378 = vmatprep.subr.bf16.mxu1 %v6313_v61 }
  0x3f   :  { %5252 = vmatprep.mubr.msk.f32.mxu0 %vm141_vm1, %v388_v0  ;;  %5328 = vmatprep.mubr.msk.f32.mxu1 %vm141_vm1, %v728_v1 }
  0x41   :  { %6316 = vmatpush3.bf16.msra.mxu0 %v6313_v61  ;;  %6380 = vmatpush3.bf16.msra.mxu1 %v6313_v61 }
  0x42   :  { %6318 = vmatprep.subr.bf16.mxu0 %v6317_v2  ;;  %6382 = vmatprep.subr.bf16.mxu1 %v6317_v2 }
  0x45   :  { %6320 = vmatpush3.bf16.msra.mxu0 %v6317_v2  ;;  %6384 = vmatpush3.bf16.msra.mxu1 %v6317_v2 }
  0x46   :  { %6322 = vmatprep.subr.bf16.mxu0 %v6321_v5  ;;  %6386 = vmatprep.subr.bf16.mxu1 %v6321_v5 }
  0x49   :  { %6324 = vmatpush3.bf16.msra.mxu0 %v6321_v5  ;;  %6388 = vmatpush3.bf16.msra.mxu1 %v6321_v5 }
  0x4a   :  { %6389 = vmatprep.subr.bf16.mxu0 %v8759_v9  ;;  %6401 = vmatprep.subr.bf16.mxu1 %v8759_v9 }
  0x4c   :  { %5253 = vmatmul.mubr.msk.f32.vlgmr.msra.gmra.mrb[0].mxu0 %vm141_vm1, %v387_v58  ;;  %5329 = vmatmul.mubr.msk.f32.vlgmr.msra.gmra.mrb[0].mxu1 %vm141_vm1, %v727_v60 }
  0x4d   :  { %6391 = vmatpush3.bf16.msra.mxu0 %v6390_v8  ;;  %6403 = vmatpush3.bf16.msra.mxu1 %v6390_v8  ;;  %v1027_v8 = vld [vmem:[%s8744_s6] sm:$0x1f] }
  0x4e   :  { %6392 = vmatprep.subr.bf16.mxu0 %v8759_v9  ;;  %6404 = vmatprep.subr.bf16.mxu1 %v8759_v9 }
  0x4f   :  { %5349 = vmatprep.mubr.msk.f32.mxu0 %vm7078_vm5, %v8762_v20  ;;  %5370 = vmatprep.mubr.msk.f32.mxu1 %vm7078_vm5, %v8762_v20 }
  0x51   :  { %6394 = vmatpush3.bf16.msra.mxu0 %v6393_v12  ;;  %6406 = vmatpush3.bf16.msra.mxu1 %v6393_v12  ;;  %v6413_v12 = vpack.c.bf16 %v4283_v11, %v4282_v10  ;;  %v100_v11 = vld [vmem:[%s8745_s7 + $0x20] sm:$0xff] }
  0x52   :  { %6395 = vmatprep.subr.bf16.mxu0 %v8759_v9  ;;  %6407 = vmatprep.subr.bf16.mxu1 %v8759_v9 }
  0x55   :  { %6397 = vmatpush3.bf16.msra.mxu0 %v6396_v15  ;;  %6409 = vmatpush3.bf16.msra.mxu1 %v6396_v15 }
  0x56   :  { %6398 = vmatprep.subr.bf16.mxu0 %v8759_v9  ;;  %6410 = vmatprep.subr.bf16.mxu1 %v8759_v9 }
  0x59   :  { %6400 = vmatpush3.bf16.msra.mxu0 %v6399_v18  ;;  %6412 = vmatpush3.bf16.msra.mxu1 %v6399_v18 }
  0x5a   :  { %5347 = vmatprep.subr.mxu0 %v8762_v20  ;;  %5368 = vmatprep.subr.mxu1 %v8762_v20 }
  0x5d   :  { %5348 = vmatpush3.msk.msra.mxu0 %vm868_vm4, %v864_v19  ;;  %5369 = vmatpush3.msk.msra.mxu1 %vm868_vm4, %v864_v19 }
  0x5e   :  { %5373 = vmatprep.subr.mxu0 %v8762_v20  ;;  %5378 = vmatprep.subr.mxu1 %v8762_v20 }
 0x11f   :  { %v5254_v22 = vpop.f32.mrb[0].mxu0  ;;  %v5330_v23 = vpop.f32.mrb[0].mxu1 }
 0x120   :  { %v7373_v24 = vadd.f32 %v5254_v22, %v4317_v21  ;;  %v7375_v25 = vadd.f32 %v5330_v23, %v4317_v21  ;;  %v459_v26 = vpop.f32.mrb[1].mxu0  ;;  %v799_v27 = vpop.f32.mrb[1].mxu1  ;;  %v1020_v23 = vld [vmem:[%s8741_s3] sm:$0x1] }
 0x121   :  { %v7377_v28 = vadd.f32 %v4317_v21, %v459_v26  ;;  %v7379_v29 = vadd.f32 %v4317_v21, %v799_v27  ;;  %v4284_v26 = vld [vmem:[%s8745_s7 + $0x58] sm:$0xff]  ;;  %v4285_v27 = vld [vmem:[%s8745_s7 + $0x60] sm:$0xff] }
 0x122   :  { %v815_v30 = vsel %vm814_vm6, %v7373_v24, 0.0  ;;  %v824_v31 = vmul.f32 %v7373_v24, %v7373_v24  ;;  %v835_v32 = vsel %vm814_vm6, %v7375_v25, 0.0  ;;  %v845_v33 = vmul.f32 %v7375_v25, %v7375_v25 }
 0x123   :  { %v813_v34 = vsel %vm812_vm7, %v7377_v28, 0.0  ;;  %v823_v35 = vmul.f32 %v7377_v28, %v7377_v28  ;;  %v834_v36 = vsel %vm812_vm7, %v7379_v29, 0.0  ;;  %v844_v37 = vmul.f32 %v7379_v29, %v7379_v29 }
 0x124   :  { %v826_v38 = vsel %vm814_vm6, %v824_v31, 0.0  ;;  %v847_v39 = vsel %vm814_vm6, %v845_v33, 0.0  ;;  %v816_v40 = vadd.f32 %v815_v30, %v813_v34  ;;  %v836_v41 = vadd.f32 %v835_v32, %v834_v36  ;;  %v1024_v33 = vld [vmem:[%s8742_s4] sm:$0x1]  ;;  %v4286_v36 = vld [vmem:[%s8745_s7 + $0x68] sm:$0xff] }
 0x125   :  { %v825_v42 = vsel %vm812_vm7, %v823_v35, 0.0  ;;  %v846_v43 = vsel %vm812_vm7, %v844_v37, 0.0  ;;  %v6417_v32 = vpack.c.bf16 %v4285_v27, %v4284_v26  ;;  %v4287_v37 = vld [vmem:[%s8745_s7 + $0x70] sm:$0xff]  ;;  %v104_v26 = vld [vmem:[%s8745_s7 + $0x40] sm:$0x1] }
 0x126   :  { %v817_v44 = vrot.slane %v816_v40, 4  ;;  %v827_v45 = vadd.f32 %v826_v38, %v825_v42  ;;  %v837_v46 = vrot.slane %v836_v41, 4  ;;  %v848_v47 = vadd.f32 %v847_v39, %v846_v43  ;;  %v4288_v39 = vld [vmem:[%s8745_s7 + $0x78] sm:$0xff]  ;;  %v4290_v42 = vld [vmem:[%s8745_s7 + $0x88] sm:$0x1]  ;;  %v96_v43 = vld [vmem:[%s8745_s7] sm:$0xff] }
 0x127   :  { %v6421_v38 = vpack.c.bf16 %v4287_v37, %v4286_v36  ;;  %v4291_v27 = vld [vmem:[%s8745_s7 + $0x90] sm:$0xff]  ;;  %v4296_v36 = vld [vmem:[%s8745_s7 + $0xb8] sm:$0xff] }
 0x128   :  { %v818_v48 = vadd.f32 %v817_v44, %v816_v40  ;;  %v828_v49 = vrot.slane %v827_v45, 4  ;;  %v838_v50 = vadd.f32 %v837_v46, %v836_v41  ;;  %v849_v51 = vrot.slane %v848_v47, 4  ;;  %v4289_v40 = vld [vmem:[%s8745_s7 + $0x80] sm:$0xff]  ;;  %v97_v44 = vld [vmem:[%s8745_s7 + $0x8] sm:$0xff] }
 0x129   :  { %v6425_v41 = vpack.c.bf16 %v4289_v40, %v4288_v39  ;;  %v1178_v46 = vlaneseq  ;;  %v4298_v39 = vld [vmem:[%s8745_s7 + $0xc8] sm:$0xff] }
 0x12a   :  { %v819_v52 = vrot.slane %v818_v48, 2  ;;  %v829_v53 = vadd.f32 %v828_v49, %v827_v45  ;;  %v839_v54 = vrot.slane %v838_v50, 2  ;;  %v850_v55 = vadd.f32 %v849_v51, %v848_v47 }
 0x12b   :  { %v6429_v45 = vpack.c.bf16 %v97_v44, %v96_v43  ;;  %v1179_v47 = vshrl.u32 %v1178_v46, 7  ;;  %v4301_v43 = vld [vmem:[%s8745_s7 + $0xe0] sm:$0xff]  ;;  %v4303_v46 = vld [vmem:[%s8745_s7 + $0xf0] sm:$0xff] }
 0x12c   :  { %v820_v56 = vadd.f32 %v819_v52, %v818_v48  ;;  %v830_v57 = vrot.slane %v829_v53, 2  ;;  %v840_v58 = vadd.f32 %v839_v54, %v838_v50  ;;  %v851_v59 = vrot.slane %v850_v55, 2 }
 0x12d   :  { %v7455_v48 = vsub.s32 0, %v1179_v47 }
 0x12e   :  { %v821_v60 = vrot.slane %v820_v56, 1  ;;  %v831_v61 = vadd.f32 %v830_v57, %v829_v53  ;;  %v841_v62 = vrot.slane %v840_v58, 1  ;;  %v852_v63 = vadd.f32 %v851_v59, %v850_v55  ;;  %v98_v59 = vld [vmem:[%s8745_s7 + $0x10] sm:$0xff] }
 0x130   :  { %v822_v0 = vadd.f32 %v821_v60, %v820_v56  ;;  %v832_v1 = vrot.slane %v831_v61, 1  ;;  %v842_v2 = vadd.f32 %v841_v62, %v840_v58  ;;  %v853_v3 = vrot.slane %v852_v63, 1  ;;  %v99_v60 = vld [vmem:[%s8745_s7 + $0x18] sm:$0xff] }
 0x132   :  { %v843_v4 = vadd.f32 %v842_v2, %v822_v0  ;;  %v833_v5 = vadd.f32 %v832_v1, %v831_v61  ;;  %v854_v6 = vadd.f32 %v853_v3, %v852_v63 }
 0x134   :  { %5350 = vmatmul.mubr.msk.f32.vlgmr.msra.gmra.mrb[2].mxu0 %vm812_vm7, %v843_v4  ;;  %v855_v7 = vadd.f32 %v854_v6, %v833_v5 }
 0x135   :  { %5375 = vmatprep.mubr.msk.f32.mxu0 %vm7078_vm5, %v8762_v20  ;;  %5374 = vmatpush3.msk.msra.mxu0 %vm385_vm3, %v1027_v8 }
 0x136   :  { %5371 = vmatmul.mubr.msk.f32.vlgmr.msra.gmra.mrb[2].mxu1 %vm812_vm7, %v855_v7  ;;  %6414 = vmatprep.subr.bf16.mxu0 %v6413_v12 }
 0x137   :  { %5380 = vmatprep.mubr.msk.f32.mxu1 %vm7078_vm5, %v8762_v20  ;;  %5379 = vmatpush3.msk.msra.mxu1 %vm385_vm3, %v1027_v8 }
 0x138   :  { %6478 = vmatprep.subr.bf16.mxu1 %v6413_v12 }
 0x207   :  { %v938_v13 = vpop.f32.mrb[2].mxu0 }
 0x208   :  { %v943_v14 = vmul.f32 0.00295858, %v938_v13  ;;  %v5351_v15 = vpop.f32.mrb[3].mxu0 }
 0x209   :  { %v1013_v16 = vpop.f32.mrb[2].mxu1 }
 0x20a   :  { %v1018_v17 = vmul.f32 %v943_v14, %v943_v14  ;;  %v1017_v18 = vmul.f32 0.00295858, %v1013_v16  ;;  %v5372_v19 = vpop.f32.mrb[3].mxu1 }
 0x20c   :  { %v1019_v21 = vsub.f32 %v1017_v18, %v1018_v17 }
 0x20e   :  { %v1021_v22 = vadd.f32 1e-05, %v1019_v21  ;;  %v102_v21 = vld [vmem:[%s8745_s7 + $0x30] sm:$0xff] }
 0x210   :  { %7048 = vrsqrt.f32 %v1021_v22  ;;  %v103_v22 = vld [vmem:[%s8745_s7 + $0x38] sm:$0xff] }
 0x21a   :  { %v7049_v30 = vpop.eup %7048 }
 0x21b   :  { %v1023_v31 = vmul.f32 %v7049_v30, %v1020_v23  ;;  %v6441_v23 = vpack.c.bf16 %v103_v22, %v102_v21  ;;  %v4292_v30 = vld [vmem:[%s8745_s7 + $0x98] sm:$0xff] }
 0x21d   :  { %5376 = vmatmul.mubr.msk.f32.vlgmr.msra.gmra.mrb[4].mxu0 %vm1028_vm8, %v1023_v31  ;;  %v1025_v34 = vmul.f32 %v1023_v31, %v943_v14  ;;  %v6445_v31 = vpack.c.bf16 %v4292_v30, %v4291_v27 }
 0x21e   :  { %6416 = vmatpush3.bf16.msra.mxu0 %v6413_v12 }
 0x21f   :  { %v1026_v35 = vsub.f32 %v1024_v33, %v1025_v34  ;;  %6418 = vmatprep.subr.bf16.mxu0 %v6417_v32  ;;  %v4294_v33 = vld [vmem:[%s8745_s7 + $0xa8] sm:$0xff] }
 0x221   :  { %5381 = vmatmul.mubr.msk.f32.vlgmr.msra.gmra.mrb[4].mxu1 %vm1028_vm8, %v1026_v35  ;;  %v4295_v35 = vld [vmem:[%s8745_s7 + $0xb0] sm:$0xff] }
 0x222   :  { %6480 = vmatpush3.bf16.msra.mxu1 %v6413_v12  ;;  %6420 = vmatpush3.bf16.msra.mxu0 %v6417_v32  ;;  %v101_v12 = vld [vmem:[%s8745_s7 + $0x28] sm:$0xff]  ;;  %v6453_v37 = vpack.c.bf16 %v4296_v36, %v4295_v35 }
 0x223   :  { %6482 = vmatprep.subr.bf16.mxu1 %v6417_v32  ;;  %6422 = vmatprep.subr.bf16.mxu0 %v6421_v38  ;;  %v6437_v19 = vpack.c.bf16 %v101_v12, %v100_v11 }
 0x226   :  { %6484 = vmatpush3.bf16.msra.mxu1 %v6417_v32  ;;  %6424 = vmatpush3.bf16.msra.mxu0 %v6421_v38  ;;  %v4293_v32 = vld [vmem:[%s8745_s7 + $0xa0] sm:$0xff] }
 0x227   :  { %6486 = vmatprep.subr.bf16.mxu1 %v6421_v38  ;;  %6426 = vmatprep.subr.bf16.mxu0 %v6425_v41  ;;  %v6449_v34 = vpack.c.bf16 %v4294_v33, %v4293_v32 }
 0x22a   :  { %6488 = vmatpush3.bf16.msra.mxu1 %v6421_v38  ;;  %6428 = vmatpush3.bf16.msra.mxu0 %v6425_v41  ;;  %v4297_v38 = vld [vmem:[%s8745_s7 + $0xc0] sm:$0xff] }
 0x22b   :  { %6490 = vmatprep.subr.bf16.mxu1 %v6425_v41  ;;  %5399 = vmatprep.subr.msk.mxu0 %vm868_vm4, %v4290_v42  ;;  %v6457_v40 = vpack.c.bf16 %v4298_v39, %v4297_v38 }
 0x22e   :  { %6492 = vmatpush3.bf16.msra.mxu1 %v6425_v41  ;;  %5400 = vmatpush3.msk.msra.mxu0 %vm868_vm4, %v4290_v42  ;;  %v4299_v41 = vld [vmem:[%s8745_s7 + $0xd0] sm:$0x1] }
 0x22f   :  { %5483 = vmatprep.subr.msk.mxu1 %vm868_vm4, %v4290_v42  ;;  %6430 = vmatprep.subr.bf16.mxu0 %v6429_v45 }
 0x232   :  { %5484 = vmatpush3.msk.msra.mxu1 %vm868_vm4, %v4290_v42  ;;  %v4300_v42 = vld [vmem:[%s8745_s7 + $0xd8] sm:$0xff] }
 0x233   :  { %6494 = vmatprep.subr.bf16.mxu1 %v6429_v45  ;;  %v6461_v44 = vpack.c.bf16 %v4301_v43, %v4300_v42 }
 0x2f0   :  { %v1101_v49 = vpop.f32.mrb[4].mxu0 }
 0x2f1   :  { %v1181_v50 = vrot.slane %v1101_v49, %v7455_v48  ;;  %v5377_v51 = vpop.f32.mrb[5].mxu0  ;;  %v4304_v49 = vld [vmem:[%s8745_s7 + $0xf8] sm:$0xff] }
 0x2f3   :  { %v1182_v52 = vmul.f32 %v1181_v50, %v7377_v28  ;;  %v1183_v54 = vmul.f32 %v1181_v50, %v7373_v24  ;;  %v1190_v55 = vmul.f32 %v1181_v50, %v7379_v29  ;;  %v1191_v56 = vmul.f32 %v1181_v50, %v7375_v25  ;;  %v4305_v50 = vld [vmem:[%s8745_s7 + $0x100] sm:$0xff] }
 0x2f4   :  { %v1174_v53 = vpop.f32.mrb[4].mxu1  ;;  %v6433_v29 = vpack.c.bf16 %v99_v60, %v98_v59  ;;  %v6469_v51 = vpack.c.bf16 %v4305_v50, %v4304_v49  ;;  %v1925_v59 = vld [vmem:[%s8749_s11 + $0x10] sm:$0xff]  ;;  %v1926_v60 = vld [vmem:[%s8749_s11 + $0x18] sm:$0xff] }
 0x2f5   :  { %v1187_v57 = vrot.slane %v1174_v53, %v7455_v48  ;;  %v5382_v58 = vpop.f32.mrb[5].mxu1  ;;  %v4307_v53 = vld [vmem:[%s8745_s7 + $0x110] sm:$0xff] }
 0x2f7   :  { %v1188_v61 = vadd.f32 %v1187_v57, %v1182_v52  ;;  %v7469_v28 = vadd.f32 %v1187_v57, %v1183_v54  ;;  %v1192_v62 = vadd.f32 %v1190_v55, %v1187_v57  ;;  %v7471_v24 = vadd.f32 %v1191_v56, %v1187_v57  ;;  %v4306_v52 = vld [vmem:[%s8745_s7 + $0x108] sm:$0xff]  ;;  %v4308_v55 = vld [vmem:[%s8745_s7 + $0x118] sm:$0x1]  ;;  %v1923_v56 = vld [vmem:[%s8749_s11] sm:$0xff] }
 0x2f8   :  { %v6473_v54 = vpack.c.bf16 %v4307_v53, %v4306_v52  ;;  %v1924_v57 = vld [vmem:[%s8749_s11 + $0x8] sm:$0xff] }
 0x2f9   :  { %v1196_v63 = vrot.slane %v1188_v61, 1  ;;  %v1197_v25 = vrot.slane %v7469_v28, 1  ;;  %v1548_v0 = vrot.slane %v1192_v62, 1  ;;  %v1549_v1 = vrot.slane %v7471_v24, 1 }
 0x2fa   :  { %v1363_v2 = vrot.slane %v1188_v61, 2  ;;  %v1364_v3 = vrot.slane %v7469_v28, 2  ;;  %v1709_v4 = vrot.slane %v1192_v62, 2  ;;  %v1710_v5 = vrot.slane %v7471_v24, 2 }
 0x2fb   :  { %v1198_v6 = vsel %vm137_vm0, %v1196_v63, %v1197_v25  ;;  %v1550_v7 = vsel %vm137_vm0, %v1548_v0, %v1549_v1  ;;  %v1450_v8 = vrot.slane %v1188_v61, 3  ;;  %v1451_v10 = vrot.slane %v7469_v28, 3  ;;  %v1930_v63 = vld [vmem:[%s8749_s11 + $0x38] sm:$0xff]  ;;  %v1931_v0 = vld [vmem:[%s8749_s11 + $0x40] sm:$0xff] }
 0x2fc   :  { %5401 = vmatprep.mubr.msk.f32.mxu0 %vm812_vm7, %v1198_v6  ;;  %5485 = vmatprep.mubr.msk.f32.mxu1 %vm812_vm7, %v1550_v7  ;;  %v1365_v13 = vsel %vm300_vm2, %v1363_v2, %v1364_v3  ;;  %v1711_v14 = vsel %vm300_vm2, %v1709_v4, %v1710_v5  ;;  %v1793_v15 = vrot.slane %v1192_v62, 3  ;;  %v1794_v16 = vrot.slane %v7471_v24, 3  ;;  %v1934_v4 = vld [vmem:[%s8749_s11 + $0x58] sm:$0xff]  ;;  %v1935_v6 = vld [vmem:[%s8749_s11 + $0x60] sm:$0xf] }
 0x2fd   :  { %5402 = vmatmul.mubr.msk.f32.vlgmr.msra.gmra.mrb[6].mxu0 %vm812_vm7, %v1197_v25  ;;  %5486 = vmatmul.mubr.msk.f32.vlgmr.msra.gmra.mrb[6].mxu1 %vm812_vm7, %v1549_v1  ;;  %v7500_v17 = vsel %vm385_vm3, %v1450_v8, %v1451_v10  ;;  %v6542_v58 = vpack.c.bf16 %v1924_v57, %v1923_v56  ;;  %v1932_v1 = vld [vmem:[%s8749_s11 + $0x48] sm:$0xff]  ;;  %v4346_v7 = vld [vmem:[%s8746_s8] ss:$0 sm:$0xff]  ;;  %vm3267_vm0 = vcmask 57344  }
 0x2fe   :  { %6432 = vmatpush3.bf16.msra.mxu0 %v6429_v45  ;;  %6496 = vmatpush3.bf16.msra.mxu1 %v6429_v45  ;;  %v7505_v18 = vsel %vm385_vm3, %v1793_v15, %v1794_v16  ;;  %v4302_v45 = vld [vmem:[%s8745_s7 + $0xe8] sm:$0xff]  ;;  %v6554_v2 = vpack.c.bf16 %v1932_v1, %v1931_v0 }
 0x2ff   :  { %5422 = vmatprep.mubr.msk.f32.mxu0 %vm812_vm7, %v1188_v61  ;;  %5506 = vmatprep.mubr.msk.f32.mxu1 %vm812_vm7, %v1192_v62  ;;  %v6465_v47 = vpack.c.bf16 %v4303_v46, %v4302_v45  ;;  %v6545_v61 = vpack.c.bf16 %v1926_v60, %v1925_v59  ;;  %v1928_v62 = vld [vmem:[%s8749_s11 + $0x28] sm:$0xff] }
 0x300   :  { %6434 = vmatprep.subr.bf16.mxu0 %v6433_v29  ;;  %6498 = vmatprep.subr.bf16.mxu1 %v6433_v29 }
 0x302   :  { %6436 = vmatpush3.bf16.msra.mxu0 %v6433_v29  ;;  %6500 = vmatpush3.bf16.msra.mxu1 %v6433_v29  ;;  %v1929_v29 = vld [vmem:[%s8749_s11 + $0x30] sm:$0xff] }
 0x303   :  { %6438 = vmatprep.subr.bf16.mxu0 %v6437_v19  ;;  %6502 = vmatprep.subr.bf16.mxu1 %v6437_v19  ;;  %v6551_v25 = vpack.c.bf16 %v1930_v63, %v1929_v29  ;;  %v2098_v29 = vld [vmem:[%s8750_s12] sm:$0xff]  ;;  %v2099_v63 = vld [vmem:[%s8750_s12 + $0x8] sm:$0x3] }
 0x306   :  { %6440 = vmatpush3.bf16.msra.mxu0 %v6437_v19  ;;  %6504 = vmatpush3.bf16.msra.mxu1 %v6437_v19 }
 0x307   :  { %6442 = vmatprep.subr.bf16.mxu0 %v6441_v23  ;;  %6506 = vmatprep.subr.bf16.mxu1 %v6441_v23 }
 0x30a   :  { %6444 = vmatpush3.bf16.msra.mxu0 %v6441_v23  ;;  %6508 = vmatpush3.bf16.msra.mxu1 %v6441_v23 }
 0x30b   :  { %5420 = vmatprep.subr.msk.mxu0 %vm868_vm4, %v104_v26  ;;  %5504 = vmatprep.subr.msk.mxu1 %vm868_vm4, %v104_v26 }
 0x30e   :  { %5421 = vmatpush3.msk.msra.mxu0 %vm868_vm4, %v104_v26  ;;  %5505 = vmatpush3.msk.msra.mxu1 %vm868_vm4, %v104_v26 }
 0x30f   :  { %5423 = vmatmul.mubr.msk.f32.vlgmr.msra.gmra.mrb[6].mxu0 %vm812_vm7, %v7469_v28  ;;  %6446 = vmatprep.subr.bf16.mxu0 %v6445_v31  ;;  %v1927_v28 = vld [vmem:[%s8749_s11 + $0x20] sm:$0xff] }
 0x310   :  { %5507 = vmatmul.mubr.msk.f32.vlgmr.msra.gmra.mrb[6].mxu1 %vm812_vm7, %v7471_v24  ;;  %6510 = vmatprep.subr.bf16.mxu1 %v6445_v31  ;;  %v6548_v24 = vpack.c.bf16 %v1928_v62, %v1927_v28 }
 0x311   :  { %6448 = vmatpush3.bf16.msra.mxu0 %v6445_v31  ;;  %5443 = vmatprep.mubr.msk.f32.mxu0 %vm812_vm7, %v1365_v13 }
 0x312   :  { %6512 = vmatpush3.bf16.msra.mxu1 %v6445_v31  ;;  %5527 = vmatprep.mubr.msk.f32.mxu1 %vm812_vm7, %v1711_v14 }
 0x313   :  { %6450 = vmatprep.subr.bf16.mxu0 %v6449_v34  ;;  %6514 = vmatprep.subr.bf16.mxu1 %v6449_v34 }
 0x315   :  { %6452 = vmatpush3.bf16.msra.mxu0 %v6449_v34 }
 0x316   :  { %6516 = vmatpush3.bf16.msra.mxu1 %v6449_v34  ;;  %6454 = vmatprep.subr.bf16.mxu0 %v6453_v37 }
 0x317   :  { %6518 = vmatprep.subr.bf16.mxu1 %v6453_v37 }
 0x319   :  { %6456 = vmatpush3.bf16.msra.mxu0 %v6453_v37 }
 0x31a   :  { %6520 = vmatpush3.bf16.msra.mxu1 %v6453_v37  ;;  %6458 = vmatprep.subr.bf16.mxu0 %v6457_v40 }
 0x31b   :  { %6522 = vmatprep.subr.bf16.mxu1 %v6457_v40 }
 0x31d   :  { %6460 = vmatpush3.bf16.msra.mxu0 %v6457_v40 }
 0x31e   :  { %6524 = vmatpush3.bf16.msra.mxu1 %v6457_v40  ;;  %5441 = vmatprep.subr.msk.mxu0 %vm868_vm4, %v4299_v41 }
 0x31f   :  { %5525 = vmatprep.subr.msk.mxu1 %vm868_vm4, %v4299_v41 }
 0x321   :  { %5442 = vmatpush3.msk.msra.mxu0 %vm868_vm4, %v4299_v41 }
 0x322   :  { %5526 = vmatpush3.msk.msra.mxu1 %vm868_vm4, %v4299_v41  ;;  %5444 = vmatmul.mubr.msk.f32.vlgmr.msra.gmra.mrb[6].mxu0 %vm812_vm7, %v1364_v3  ;;  %v1933_v3 = vld [vmem:[%s8749_s11 + $0x50] sm:$0xff] }
 0x323   :  { %6462 = vmatprep.subr.bf16.mxu0 %v6461_v44  ;;  %5528 = vmatmul.mubr.msk.f32.vlgmr.msra.gmra.mrb[6].mxu1 %vm812_vm7, %v1710_v5  ;;  %v6557_v5 = vpack.c.bf16 %v1934_v4, %v1933_v3 }
 0x324   :  { %6526 = vmatprep.subr.bf16.mxu1 %v6461_v44  ;;  %6464 = vmatpush3.bf16.msra.mxu0 %v6461_v44 }
 0x325   :  { %5464 = vmatprep.mubr.msk.f32.mxu0 %vm812_vm7, %v7500_v17  ;;  %6528 = vmatpush3.bf16.msra.mxu1 %v6461_v44 }
 0x326   :  { %5548 = vmatprep.mubr.msk.f32.mxu1 %vm812_vm7, %v7505_v18  ;;  %6466 = vmatprep.subr.bf16.mxu0 %v6465_v47 }
 0x327   :  { %6530 = vmatprep.subr.bf16.mxu1 %v6465_v47 }
 0x328   :  { %6468 = vmatpush3.bf16.msra.mxu0 %v6465_v47 }
 0x329   :  { %6532 = vmatpush3.bf16.msra.mxu1 %v6465_v47  ;;  %6470 = vmatprep.subr.bf16.mxu0 %v6469_v51 }
 0x32a   :  { %6534 = vmatprep.subr.bf16.mxu1 %v6469_v51 }
 0x32c   :  { %6472 = vmatpush3.bf16.msra.mxu0 %v6469_v51 }
 0x32d   :  { %6536 = vmatpush3.bf16.msra.mxu1 %v6469_v51  ;;  %6474 = vmatprep.subr.bf16.mxu0 %v6473_v54 }
 0x32e   :  { %6538 = vmatprep.subr.bf16.mxu1 %v6473_v54 }
 0x330   :  { %6476 = vmatpush3.bf16.msra.mxu0 %v6473_v54 }
 0x331   :  { %6540 = vmatpush3.bf16.msra.mxu1 %v6473_v54  ;;  %5462 = vmatprep.subr.msk.mxu0 %vm868_vm4, %v4308_v55 }
 0x332   :  { %5546 = vmatprep.subr.msk.mxu1 %vm868_vm4, %v4308_v55 }
 0x334   :  { %5463 = vmatpush3.msk.msra.mxu0 %vm868_vm4, %v4308_v55 }
 0x335   :  { %5547 = vmatpush3.msk.msra.mxu1 %vm868_vm4, %v4308_v55  ;;  %5465 = vmatmul.mubr.msk.f32.vlgmr.msra.gmra.mrb[6].mxu0 %vm812_vm7, %v1451_v10 }
 0x336   :  { %5549 = vmatmul.mubr.msk.f32.vlgmr.msra.gmra.mrb[6].mxu1 %vm812_vm7, %v1794_v16  ;;  %6541 = vmatprep.subr.bf16.mxu0 %v8759_v9 }
 0x337   :  { %6543 = vmatpush3.bf16.msra.mxu0 %v6542_v58  ;;  %6559 = vmatprep.subr.bf16.mxu1 %v8759_v9 }
 0x338   :  { %6561 = vmatpush3.bf16.msra.mxu1 %v6542_v58  ;;  %6544 = vmatprep.subr.bf16.mxu0 %v8759_v9 }
 0x339   :  { %6562 = vmatprep.subr.bf16.mxu1 %v8759_v9  ;;  %5577 = vmatprep.mubr.msk.f32.mxu0 %vm7078_vm5, %v8762_v20 }
 0x33a   :  { %5606 = vmatprep.mubr.msk.f32.mxu1 %vm7078_vm5, %v8762_v20 }
 0x33b   :  { %6546 = vmatpush3.bf16.msra.mxu0 %v6545_v61 }
 0x33c   :  { %6564 = vmatpush3.bf16.msra.mxu1 %v6545_v61  ;;  %6547 = vmatprep.subr.bf16.mxu0 %v8759_v9 }
 0x33d   :  { %6565 = vmatprep.subr.bf16.mxu1 %v8759_v9 }
 0x33f   :  { %6549 = vmatpush3.bf16.msra.mxu0 %v6548_v24 }
 0x340   :  { %6567 = vmatpush3.bf16.msra.mxu1 %v6548_v24  ;;  %6550 = vmatprep.subr.bf16.mxu0 %v8759_v9 }
 0x341   :  { %6568 = vmatprep.subr.bf16.mxu1 %v8759_v9 }
 0x343   :  { %6552 = vmatpush3.bf16.msra.mxu0 %v6551_v25 }
 0x344   :  { %6570 = vmatpush3.bf16.msra.mxu1 %v6551_v25  ;;  %6553 = vmatprep.subr.bf16.mxu0 %v8759_v9  ;;  %v6578_v25 = vpack.c.bf16 %v2099_v63, %v2098_v29  ;;  %v4377_v63 = vld [vmem:[%s8751_s13 + $0xa8] sm:$0xff] }
 0x345   :  { %6571 = vmatprep.subr.bf16.mxu1 %v8759_v9 }
 0x347   :  { %6555 = vmatpush3.bf16.msra.mxu0 %v6554_v2 }
 0x348   :  { %6573 = vmatpush3.bf16.msra.mxu1 %v6554_v2  ;;  %6556 = vmatprep.subr.bf16.mxu0 %v8759_v9 }
 0x349   :  { %6574 = vmatprep.subr.bf16.mxu1 %v8759_v9 }
 0x34b   :  { %6558 = vmatpush3.bf16.msra.mxu0 %v6557_v5 }
 0x34c   :  { %6576 = vmatpush3.bf16.msra.mxu1 %v6557_v5  ;;  %5575 = vmatprep.subr.mxu0 %v8762_v20 }
 0x34d   :  { %5604 = vmatprep.subr.mxu1 %v8762_v20 }
 0x34f   :  { %5576 = vmatpush3.msk.msra.mxu0 %vm1939_vm9, %v1935_v6 }
 0x350   :  { %5605 = vmatpush3.msk.msra.mxu1 %vm1939_vm9, %v1935_v6  ;;  %6577 = vmatprep.subr.bf16.mxu0 %v8759_v9 }
 0x351   :  { %6581 = vmatprep.subr.bf16.mxu1 %v8759_v9 }
 0x408   :  { %v5466_v8 = vpop.f32.mrb[6].mxu0 }
 0x409   :  { %v7670_v10 = vadd.f32 %v5466_v8, %v4346_v7  ;;  %v5550_v11 = vpop.f32.mrb[6].mxu1  ;;  %v1526_v12 = vpop.f32.mrb[7].mxu0 }
 0x40a   :  { %v7672_v13 = vadd.f32 %v5550_v11, %v4346_v7  ;;  %v7674_v14 = vadd.f32 %v4346_v7, %v1526_v12  ;;  %v1866_v15 = vpop.f32.mrb[7].mxu1  ;;  %v2282_v11 = vld [vmem:[%s8751_s13] sm:$0xff]  ;;  %v2283_v12 = vld [vmem:[%s8751_s13 + $0x8] sm:$0xff] }
 0x40b   :  { %v1882_v16 = vsel %vm1881_vm10, %v7670_v10, 0.0  ;;  %v1891_v17 = vmul.f32 %v7670_v10, %v7670_v10  ;;  %v7680_v18 = vadd.f32 %v4346_v7, %v1866_v15  ;;  %v2091_v15 = vld [vmem:[%s8747_s9] sm:$0x1] }
 0x40c   :  { %v1902_v19 = vsel %vm1881_vm10, %v7672_v13, 0.0  ;;  %v1912_v21 = vmul.f32 %v7672_v13, %v7672_v13  ;;  %v1880_v22 = vsel %vm1879_vm11, %v7674_v14, 0.0  ;;  %v1890_v23 = vmul.f32 %v7674_v14, %v7674_v14 }
 0x40d   :  { %v1893_v26 = vsel %vm1881_vm10, %v1891_v17, 0.0  ;;  %v1883_v27 = vadd.f32 %v1882_v16, %v1880_v22  ;;  %v1901_v30 = vsel %vm1879_vm11, %v7680_v18, 0.0  ;;  %v1911_v31 = vmul.f32 %v7680_v18, %v7680_v18  ;;  %v2285_v22 = vld [vmem:[%s8751_s13 + $0x18] sm:$0xff] }
 0x40e   :  { %v1914_v32 = vsel %vm1881_vm10, %v1912_v21, 0.0  ;;  %v1892_v33 = vsel %vm1879_vm11, %v1890_v23, 0.0  ;;  %v1903_v34 = vadd.f32 %v1902_v19, %v1901_v30  ;;  %v7721_v17 = vpack.c.bf16 %v2283_v12, %v2282_v11  ;;  %v2284_v21 = vld [vmem:[%s8751_s13 + $0x10] sm:$0xff]  ;;  %v2095_v23 = vld [vmem:[%s8748_s10] sm:$0x1]  ;;  %v4387_v12 = vld [vmem:[%s8751_s13 + $0xe8] sm:$0xff] }
 0x40f   :  { %v1884_v35 = vrot.slane %v1883_v27, 4  ;;  %v1894_v36 = vadd.f32 %v1893_v26, %v1892_v33  ;;  %v1913_v37 = vsel %vm1879_vm11, %v1911_v31, 0.0  ;;  %v2286_v31 = vld [vmem:[%s8751_s13 + $0x20] sm:$0xff] }
 0x410   :  { %v1904_v38 = vrot.slane %v1903_v34, 4  ;;  %v1915_v39 = vadd.f32 %v1914_v32, %v1913_v37  ;;  %v2287_v32 = vld [vmem:[%s8751_s13 + $0x28] sm:$0xff]  ;;  %v2290_v37 = vld [vmem:[%s8751_s13 + $0x40] sm:$0xff] }
 0x411   :  { %v1885_v40 = vadd.f32 %v1884_v35, %v1883_v27  ;;  %v1895_v41 = vrot.slane %v1894_v36, 4  ;;  %v7733_v27 = vpack.c.bf16 %v2285_v22, %v2284_v21  ;;  %v7745_v33 = vpack.c.bf16 %v2287_v32, %v2286_v31  ;;  %v2289_v35 = vld [vmem:[%s8751_s13 + $0x38] sm:$0xff]  ;;  %v4386_v11 = vld [vmem:[%s8751_s13 + $0xe0] sm:$0xff] }
 0x412   :  { %v1905_v42 = vadd.f32 %v1904_v38, %v1903_v34  ;;  %v1916_v43 = vrot.slane %v1915_v39, 4  ;;  %v2288_v34 = vld [vmem:[%s8751_s13 + $0x30] sm:$0xff]  ;;  %v2291_v38 = vld [vmem:[%s8751_s13 + $0x48] sm:$0xff]  ;;  %v4390_v22 = vld [vmem:[%s8751_s13 + $0x100] sm:$0xff] }
 0x413   :  { %v1886_v44 = vrot.slane %v1885_v40, 2  ;;  %v1896_v45 = vadd.f32 %v1895_v41, %v1894_v36  ;;  %v7757_v36 = vpack.c.bf16 %v2289_v35, %v2288_v34  ;;  %v2293_v41 = vld [vmem:[%s8751_s13 + $0x58] sm:$0xff]  ;;  %v4394_v34 = vld [vmem:[%s8751_s13 + $0x120] sm:$0xff]  ;;  %v4395_v35 = vld [vmem:[%s8751_s13 + $0x128] sm:$0xff] }
 0x414   :  { %v1906_v46 = vrot.slane %v1905_v42, 2  ;;  %v1917_v47 = vadd.f32 %v1916_v43, %v1915_v39  ;;  %v7767_v39 = vpack.c.bf16 %v2291_v38, %v2290_v37  ;;  %v2294_v43 = vld [vmem:[%s8751_s13 + $0x60] sm:$0xf]  ;;  %v4393_v31 = vld [vmem:[%s8751_s13 + $0x118] sm:$0xff]  ;;  %v7929_v37 = vpack.c.bf16 %v4395_v35, %v4394_v34 }
 0x415   :  { %v1887_v49 = vadd.f32 %v1886_v44, %v1885_v40  ;;  %v1897_v50 = vrot.slane %v1896_v45, 2  ;;  %v2292_v40 = vld [vmem:[%s8751_s13 + $0x50] sm:$0xff]  ;;  %v4399_v38 = vld [vmem:[%s8751_s13 + $0x138] sm:$0xff] }
 0x416   :  { %v1907_v51 = vadd.f32 %v1906_v46, %v1905_v42  ;;  %v1918_v52 = vrot.slane %v1917_v47, 2  ;;  %v7778_v42 = vpack.c.bf16 %v2293_v41, %v2292_v40  ;;  %v4400_v40 = vld [vmem:[%s8751_s13 + $0x140] sm:$0xff]  ;;  %v4396_v41 = vld [vmem:[%s8751_s13 + $0x130] sm:$0xf]  ;;  %v4425_v34 = vld [vmem:[%s8751_s13 + $0x1f8] sm:$0xff] }
 0x417   :  { %v1888_v53 = vrot.slane %v1887_v49, 1  ;;  %v1898_v54 = vadd.f32 %v1897_v50, %v1896_v45 }
 0x418   :  { %v1908_v55 = vrot.slane %v1907_v51, 1  ;;  %v1919_v56 = vadd.f32 %v1918_v52, %v1917_v47  ;;  %v4369_v47 = vld [vmem:[%s8751_s13 + $0x68] sm:$0xff] }
 0x419   :  { %v1889_v57 = vadd.f32 %v1888_v53, %v1887_v49  ;;  %v1899_v58 = vrot.slane %v1898_v54, 1  ;;  %v4370_v49 = vld [vmem:[%s8751_s13 + $0x70] sm:$0xff] }
 0x41a   :  { %v1909_v59 = vadd.f32 %v1908_v55, %v1907_v51  ;;  %v1920_v60 = vrot.slane %v1919_v56, 1 }
 0x41b   :  { %v1900_v61 = vadd.f32 %v1899_v58, %v1898_v54 }
 0x41c   :  { %v1910_v28 = vadd.f32 %v1909_v59, %v1889_v57  ;;  %v1921_v62 = vadd.f32 %v1920_v60, %v1919_v56  ;;  %v7799_v57 = vpack.c.bf16 %v4370_v49, %v4369_v47  ;;  %v4403_v49 = vld [vmem:[%s8751_s13 + $0x158] sm:$0xff] }
 0x41e   :  { %5578 = vmatmul.mubr.msk.f32.vlgmr.msra.gmra.mrb[8].mxu0 %vm1879_vm11, %v1910_v28  ;;  %v1922_v24 = vadd.f32 %v1921_v62, %v1900_v61  ;;  %v4375_v62 = vld [vmem:[%s8751_s13 + $0x98] sm:$0xff] }
 0x41f   :  { %5613 = vmatprep.mubr.msk.f32.mxu0 %vm7078_vm5, %v8762_v20  ;;  %6580 = vmatpush3.bf16.msk.msra.mxu0 %vm6579_vm14, %v6578_v25 }
 0x420   :  { %5607 = vmatmul.mubr.msk.f32.vlgmr.msra.gmra.mrb[8].mxu1 %vm1879_vm11, %v1922_v24  ;;  %6585 = vmatprep.subr.bf16.mxu0 %v8759_v9  ;;  %v4376_v24 = vld [vmem:[%s8751_s13 + $0xa0] sm:$0xff] }
 0x421   :  { %5620 = vmatprep.mubr.msk.f32.mxu1 %vm7078_vm5, %v8762_v20  ;;  %6584 = vmatpush3.bf16.msk.msra.mxu1 %vm6579_vm14, %v6578_v25  ;;  %v7840_v29 = vpack.c.bf16 %v4376_v24, %v4375_v62  ;;  %v4378_v25 = vld [vmem:[%s8751_s13 + $0xb0] sm:$0xff]  ;;  %v4414_v62 = vld [vmem:[%s8751_s13 + $0x1a0] sm:$0xff]  ;;  %v4415_v24 = vld [vmem:[%s8751_s13 + $0x1a8] sm:$0xff] }
 0x422   :  { %6765 = vmatprep.subr.bf16.mxu1 %v8759_v9 }
 0x4f1   :  { %v2009_v0 = vpop.f32.mrb[8].mxu0 }
 0x4f2   :  { %v2014_v1 = vmul.f32 0.005, %v2009_v0  ;;  %v5579_v2 = vpop.f32.mrb[9].mxu0  ;;  %v7850_v0 = vpack.c.bf16 %v4378_v25, %v4377_v63  ;;  %v4411_v63 = vld [vmem:[%s8751_s13 + $0x198] sm:$0xf]  ;;  %v8012_v25 = vpack.c.bf16 %v4415_v24, %v4414_v62 }
 0x4f3   :  { %v2084_v3 = vpop.f32.mrb[8].mxu1  ;;  %v4380_v2 = vld [vmem:[%s8751_s13 + $0xc0] sm:$0xff]  ;;  %v2270_v62 = vld [vmem:[%s8753_s15 + $0x18] sm:$0xff] }
 0x4f4   :  { %v2089_v4 = vmul.f32 %v2014_v1, %v2014_v1  ;;  %v2088_v5 = vmul.f32 0.005, %v2084_v3  ;;  %v5608_v6 = vpop.f32.mrb[9].mxu1 }
 0x4f5   :  { %v4381_v6 = vld [vmem:[%s8751_s13 + $0xc8] sm:$0xf] }
 0x4f6   :  { %v2090_v7 = vsub.f32 %v2088_v5, %v2089_v4  ;;  %v4384_v4 = vld [vmem:[%s8751_s13 + $0xd0] sm:$0xff]  ;;  %v4385_v5 = vld [vmem:[%s8751_s13 + $0xd8] sm:$0xff] }
 0x4f8   :  { %v2092_v8 = vadd.f32 1e-05, %v2090_v7  ;;  %v7874_v7 = vpack.c.bf16 %v4385_v5, %v4384_v4  ;;  %v4417_v4 = vld [vmem:[%s8751_s13 + $0x1b8] sm:$0xff] }
 0x4fa   :  { %7050 = vrsqrt.f32 %v2092_v8 }
 0x504   :  { %v7051_v16 = vpop.eup %7050 }
 0x505   :  { %v2094_v19 = vmul.f32 %v7051_v16, %v2091_v15  ;;  %v7887_v15 = vpack.c.bf16 %v4387_v12, %v4386_v11  ;;  %v4388_v16 = vld [vmem:[%s8751_s13 + $0xf0] sm:$0xff] }
 0x506   :  { %v4420_v12 = vld [vmem:[%s8751_s13 + $0x1d0] sm:$0xff] }
 0x507   :  { %5614 = vmatmul.mubr.msk.f32.vlgmr.msra.gmra.mrb[10].mxu0 %vm2100_vm15, %v2094_v19  ;;  %v2096_v26 = vmul.f32 %v2094_v19, %v2014_v1  ;;  %v4379_v1 = vld [vmem:[%s8751_s13 + $0xb8] sm:$0xff] }
 0x508   :  { %6587 = vmatpush3.bf16.msra.mxu0 %v7721_v17  ;;  %5649 = vmatprep.mubr.msk.f32.mxu0 %vm7078_vm5, %v8762_v20  ;;  %v7860_v3 = vpack.c.bf16 %v4380_v2, %v4379_v1  ;;  %v4389_v19 = vld [vmem:[%s8751_s13 + $0xf8] sm:$0xff]  ;;  %v4416_v2 = vld [vmem:[%s8751_s13 + $0x1b0] sm:$0xff] }
 0x509   :  { %v2097_v30 = vsub.f32 %v2095_v23, %v2096_v26  ;;  %6588 = vmatprep.subr.bf16.mxu0 %v8759_v9  ;;  %v7899_v21 = vpack.c.bf16 %v4389_v19, %v4388_v16  ;;  %v4391_v23 = vld [vmem:[%s8751_s13 + $0x108] sm:$0xff]  ;;  %v8025_v5 = vpack.c.bf16 %v4417_v4, %v4416_v2  ;;  %v4421_v16 = vld [vmem:[%s8751_s13 + $0x1d8] sm:$0xff]  ;;  %v4436_v2 = vld [vmem:[%s8751_s13 + $0x240] sm:$0xff] }
 0x50a   :  { %v7909_v26 = vpack.c.bf16 %v4391_v23, %v4390_v22  ;;  %v8047_v19 = vpack.c.bf16 %v4421_v16, %v4420_v12  ;;  %v4422_v22 = vld [vmem:[%s8751_s13 + $0x1e0] sm:$0xff]  ;;  %v4423_v23 = vld [vmem:[%s8751_s13 + $0x1e8] sm:$0xff] }
 0x50b   :  { %5621 = vmatmul.mubr.msk.f32.vlgmr.msra.gmra.mrb[10].mxu1 %vm2100_vm15, %v2097_v30  ;;  %v4392_v30 = vld [vmem:[%s8751_s13 + $0x110] sm:$0xff]  ;;  %v2271_v4 = vld [vmem:[%s8753_s15 + $0x20] sm:$0xff]  ;;  %v4437_v12 = vld [vmem:[%s8751_s13 + $0x248] sm:$0xff] }
 0x50c   :  { %6590 = vmatpush3.bf16.msra.mxu0 %v7733_v27  ;;  %5939 = vmatprep.mubr.msk.f32.mxu1 %vm7078_vm5, %v8762_v20  ;;  %v7919_v32 = vpack.c.bf16 %v4393_v31, %v4392_v30  ;;  %v8057_v30 = vpack.c.bf16 %v4423_v23, %v4422_v22  ;;  %v4424_v31 = vld [vmem:[%s8751_s13 + $0x1f0] sm:$0xff] }
 0x50d   :  { %6591 = vmatprep.subr.bf16.mxu0 %v8759_v9  ;;  %v8067_v35 = vpack.c.bf16 %v4425_v34, %v4424_v31  ;;  %v4438_v22 = vld [vmem:[%s8751_s13 + $0x250] sm:$0xff]  ;;  %v2274_v31 = vld [vmem:[%s8753_s15 + $0x38] sm:$0xff] }
 0x50e   :  { %v2273_v23 = vld [vmem:[%s8753_s15 + $0x30] sm:$0xff]  ;;  %v8160_v34 = vpack.c.bf16 %v4438_v22, %v4437_v12  ;;  %v4447_v12 = vld [vmem:[%s8751_s13 + $0x288] sm:$0xff] }
 0x510   :  { %6593 = vmatpush3.bf16.msra.mxu0 %v7745_v33 }
 0x511   :  { %6594 = vmatprep.subr.bf16.mxu0 %v8759_v9 }
 0x514   :  { %6596 = vmatpush3.bf16.msra.mxu0 %v7757_v36 }
 0x515   :  { %6597 = vmatprep.subr.bf16.mxu0 %v8759_v9 }
 0x518   :  { %6599 = vmatpush3.bf16.msra.mxu0 %v7767_v39 }
 0x519   :  { %6600 = vmatprep.subr.bf16.mxu0 %v8759_v9 }
 0x51c   :  { %6602 = vmatpush3.bf16.msra.mxu0 %v7778_v42 }
 0x51d   :  { %5647 = vmatprep.subr.mxu0 %v8762_v20 }
 0x520   :  { %5648 = vmatpush3.msk.msra.mxu0 %vm1939_vm9, %v2294_v43  ;;  %v7943_v43 = vpack.c.bf16 %v4400_v40, %v4399_v38  ;;  %v4429_v38 = vld [vmem:[%s8751_s13 + $0x208] sm:$0xff]  ;;  %v4430_v40 = vld [vmem:[%s8751_s13 + $0x210] sm:$0xff] }
 0x521   :  { %6603 = vmatprep.subr.bf16.mxu0 %v8759_v9 }
 0x5da   :  { %v2174_v44 = vpop.f32.mrb[10].mxu0 }
 0x5db   :  { %v2254_v45 = vrot.slane %v2174_v44, %v7455_v48  ;;  %v5615_v46 = vpop.f32.mrb[11].mxu0 }
 0x5dc   :  { %v4402_v46 = vld [vmem:[%s8751_s13 + $0x150] sm:$0xff] }
 0x5dd   :  { %v2255_v50 = vmul.f32 %v2254_v45, %v7674_v14  ;;  %v2256_v52 = vmul.f32 %v2254_v45, %v7670_v10  ;;  %v2263_v53 = vmul.f32 %v2254_v45, %v7680_v18  ;;  %v2264_v54 = vmul.f32 %v2254_v45, %v7672_v13  ;;  %v4371_v10 = vld [vmem:[%s8751_s13 + $0x78] sm:$0xff]  ;;  %v4372_v13 = vld [vmem:[%s8751_s13 + $0x80] sm:$0xff]  ;;  %v4373_v14 = vld [vmem:[%s8751_s13 + $0x88] sm:$0xff] }
 0x5de   :  { %v2247_v51 = vpop.f32.mrb[10].mxu1  ;;  %v4374_v18 = vld [vmem:[%s8751_s13 + $0x90] sm:$0xff]  ;;  %v4401_v45 = vld [vmem:[%s8751_s13 + $0x148] sm:$0xff] }
 0x5df   :  { %v2260_v55 = vrot.slane %v2247_v51, %v7455_v48  ;;  %v5622_v56 = vpop.f32.mrb[11].mxu1  ;;  %v7818_v48 = vpack.c.bf16 %v4372_v13, %v4371_v10  ;;  %v7830_v28 = vpack.c.bf16 %v4374_v18, %v4373_v14  ;;  %v7956_v47 = vpack.c.bf16 %v4402_v46, %v4401_v45  ;;  %v4409_v13 = vld [vmem:[%s8751_s13 + $0x188] sm:$0xff]  ;;  %v4410_v14 = vld [vmem:[%s8751_s13 + $0x190] sm:$0xff]  ;;  %v4431_v46 = vld [vmem:[%s8751_s13 + $0x218] sm:$0xff] }
 0x5e0   :  { %v4408_v56 = vld [vmem:[%s8751_s13 + $0x180] sm:$0xff]  ;;  %v7998_v18 = vpack.c.bf16 %v4410_v14, %v4409_v13  ;;  %v2269_v13 = vld [vmem:[%s8753_s15 + $0x10] sm:$0xff] }
 0x5e1   :  { %v7801_v58 = vadd.f32 %v2260_v55, %v2255_v50  ;;  %v7803_v59 = vadd.f32 %v2260_v55, %v2256_v52  ;;  %v7805_v60 = vadd.f32 %v2263_v53, %v2260_v55  ;;  %v7807_v61 = vadd.f32 %v2264_v54, %v2260_v55  ;;  %v4404_v50 = vld [vmem:[%s8751_s13 + $0x160] sm:$0xff]  ;;  %v4405_v52 = vld [vmem:[%s8751_s13 + $0x168] sm:$0xff]  ;;  %v4406_v53 = vld [vmem:[%s8751_s13 + $0x170] sm:$0xff] }
 0x5e2   :  { %v7968_v51 = vpack.c.bf16 %v4404_v50, %v4403_v49  ;;  %v7978_v54 = vpack.c.bf16 %v4406_v53, %v4405_v52  ;;  %v4407_v55 = vld [vmem:[%s8751_s13 + $0x178] sm:$0xff]  ;;  %v4432_v49 = vld [vmem:[%s8751_s13 + $0x220] sm:$0xff]  ;;  %v4433_v52 = vld [vmem:[%s8751_s13 + $0x228] sm:$0xff] }
 0x5e3   :  { %8777 = vst [vmem:[#allocation5_spill] sm:$0xff] %v7807_v61  ;;  %5650 = vmatmul.mubr.msk.f32.vlgmr.msra.gmra.mrb[12].mxu0 %vm1879_vm11, %v7801_v58  ;;  %v2386_v8 = vrot.slane %v7801_v58, 1  ;;  %v2477_v44 = vrot.slane %v7801_v58, 2  ;;  %v7988_v10 = vpack.c.bf16 %v4408_v56, %v4407_v55  ;;  %v2568_v1 = vrot.slane %v7801_v58, 3  ;;  %v4434_v53 = vld [vmem:[%s8751_s13 + $0x230] sm:$0xff]  ;;  %v2267_v55 = vld [vmem:[%s8753_s15] sm:$0xff] }
 0x5e4   :  { %6605 = vmatpush3.bf16.msra.mxu0 %v7799_v57  ;;  %5678 = vmatprep.mubr.msk.f32.mxu0 %vm7078_vm5, %v8762_v20  ;;  %v2659_v45 = vrot.slane %v7801_v58, 4  ;;  %v8094_v50 = vpack.c.bf16 %v4432_v49, %v4431_v46  ;;  %v2268_v56 = vld [vmem:[%s8753_s15 + $0x8] sm:$0xff]  ;;  %v8120_v24 = vpack.c.bf16 %v4434_v53, %v4433_v52  ;;  %v2277_v53 = vld [vmem:[%s8753_s15 + $0x50] sm:$0xff]  ;;  %v4471_v61 = vld [vmem:[%s8751_s13 + $0x338] sm:$0xf] }
 0x5e5   :  { %6606 = vmatprep.subr.bf16.mxu0 %v8759_v9  ;;  %v8114_v14 = vpack.c.bf16 %v2268_v56, %v2267_v55  ;;  %v2276_v46 = vld [vmem:[%s8753_s15 + $0x48] sm:$0xff]  ;;  %v2278_v55 = vld [vmem:[%s8753_s15 + $0x58] sm:$0xff]  ;;  %v4444_v56 = vld [vmem:[%s8751_s13 + $0x270] sm:$0xff] }
 0x5e7   :  { %6767 = vmatpush3.bf16.msra.mxu1 %v8114_v14 }
 0x5e8   :  { %6608 = vmatpush3.bf16.msra.mxu0 %v7818_v48  ;;  %6768 = vmatprep.subr.bf16.mxu1 %v8759_v9 }
 0x5e9   :  { %6609 = vmatprep.subr.bf16.mxu0 %v8759_v9 }
 0x5ec   :  { %6611 = vmatpush3.bf16.msra.mxu0 %v7830_v28 }
 0x5ed   :  { %6612 = vmatprep.subr.bf16.mxu0 %v8759_v9 }
 0x5f0   :  { %6614 = vmatpush3.bf16.msra.mxu0 %v7840_v29 }
 0x5f1   :  { %6615 = vmatprep.subr.bf16.mxu0 %v8759_v9 }
 0x5f4   :  { %6617 = vmatpush3.bf16.msra.mxu0 %v7850_v0 }
 0x5f5   :  { %6618 = vmatprep.subr.bf16.mxu0 %v8759_v9 }
 0x5f8   :  { %6620 = vmatpush3.bf16.msra.mxu0 %v7860_v3 }
 0x5f9   :  { %5676 = vmatprep.subr.mxu0 %v8762_v20 }
 0x5fc   :  { %5677 = vmatpush3.msk.msra.mxu0 %vm1939_vm9, %v4381_v6  ;;  %v4418_v6 = vld [vmem:[%s8751_s13 + $0x1c0] sm:$0xff] }
 0x5fd   :  { %5679 = vmatmul.mubr.msk.f32.vlgmr.msra.gmra.mrb[12].mxu0 %vm1879_vm11, %v2386_v8  ;;  %6621 = vmatprep.subr.bf16.mxu0 %v8759_v9  ;;  %v4419_v8 = vld [vmem:[%s8751_s13 + $0x1c8] sm:$0xff] }
 0x5fe   :  { %6623 = vmatpush3.bf16.msra.mxu0 %v7874_v7  ;;  %5707 = vmatprep.mubr.msk.f32.mxu0 %vm7078_vm5, %v8762_v20  ;;  %v8037_v11 = vpack.c.bf16 %v4419_v8, %v4418_v6  ;;  %v2272_v6 = vld [vmem:[%s8753_s15 + $0x28] sm:$0xff] }
 0x5ff   :  { %6624 = vmatprep.subr.bf16.mxu0 %v8759_v9  ;;  %v8146_v16 = vpack.c.bf16 %v2272_v6, %v2271_v4  ;;  %v2750_v4 = vrot.slane %v7801_v58, 5  ;;  %v4446_v6 = vld [vmem:[%s8751_s13 + $0x280] sm:$0xff] }
 0x600   :  { %v8222_v22 = vpack.c.bf16 %v4447_v12, %v4446_v6  ;;  %v4459_v6 = vld [vmem:[%s8751_s13 + $0x2d8] sm:$0xff]  ;;  %v4460_v12 = vld [vmem:[%s8751_s13 + $0x2e0] sm:$0xff] }
 0x602   :  { %6626 = vmatpush3.bf16.msra.mxu0 %v7887_v15 }
 0x603   :  { %6627 = vmatprep.subr.bf16.mxu0 %v8759_v9 }
 0x606   :  { %6629 = vmatpush3.bf16.msra.mxu0 %v7899_v21 }
 0x607   :  { %6630 = vmatprep.subr.bf16.mxu0 %v8759_v9 }
 0x60a   :  { %6632 = vmatpush3.bf16.msra.mxu0 %v7909_v26 }
 0x60b   :  { %6633 = vmatprep.subr.bf16.mxu0 %v8759_v9 }
 0x60e   :  { %6635 = vmatpush3.bf16.msra.mxu0 %v7919_v32 }
 0x60f   :  { %6636 = vmatprep.subr.bf16.mxu0 %v8759_v9 }
 0x612   :  { %6638 = vmatpush3.bf16.msra.mxu0 %v7929_v37 }
 0x613   :  { %5705 = vmatprep.subr.mxu0 %v8762_v20 }
 0x616   :  { %5706 = vmatpush3.msk.msra.mxu0 %vm1939_vm9, %v4396_v41  ;;  %v4426_v41 = vld [vmem:[%s8751_s13 + $0x200] sm:$0xf] }
 0x617   :  { %5708 = vmatmul.mubr.msk.f32.vlgmr.msra.gmra.mrb[12].mxu0 %vm1879_vm11, %v2477_v44  ;;  %6639 = vmatprep.subr.bf16.mxu0 %v8759_v9  ;;  %v8081_v44 = vpack.c.bf16 %v4430_v40, %v4429_v38  ;;  %v4439_v38 = vld [vmem:[%s8751_s13 + $0x258] sm:$0xff]  ;;  %v8166_v40 = vpack.c.bf16 %v2274_v31, %v2273_v23  ;;  %v4448_v23 = vld [vmem:[%s8751_s13 + $0x290] sm:$0xff] }
 0x618   :  { %6641 = vmatpush3.bf16.msra.mxu0 %v7943_v43  ;;  %5736 = vmatprep.mubr.msk.f32.mxu0 %vm7078_vm5, %v8762_v20  ;;  %v4449_v31 = vld [vmem:[%s8751_s13 + $0x298] sm:$0xff] }
 0x619   :  { %6642 = vmatprep.subr.bf16.mxu0 %v8759_v9 }
 0x61c   :  { %6644 = vmatpush3.bf16.msra.mxu0 %v7956_v47 }
 0x61d   :  { %6645 = vmatprep.subr.bf16.mxu0 %v8759_v9 }
 0x620   :  { %6647 = vmatpush3.bf16.msra.mxu0 %v7968_v51 }
 0x621   :  { %6648 = vmatprep.subr.bf16.mxu0 %v8759_v9 }
 0x624   :  { %6650 = vmatpush3.bf16.msra.mxu0 %v7978_v54 }
 0x625   :  { %6651 = vmatprep.subr.bf16.mxu0 %v8759_v9 }
 0x628   :  { %6653 = vmatpush3.bf16.msra.mxu0 %v7988_v10 }
 0x629   :  { %6654 = vmatprep.subr.bf16.mxu0 %v8759_v9 }
 0x62c   :  { %6656 = vmatpush3.bf16.msra.mxu0 %v7998_v18 }
 0x62d   :  { %5734 = vmatprep.subr.mxu0 %v8762_v20 }
 0x630   :  { %5735 = vmatpush3.msk.msra.mxu0 %vm1939_vm9, %v4411_v63  ;;  %v4435_v63 = vld [vmem:[%s8751_s13 + $0x238] sm:$0xff] }
 0x631   :  { %5737 = vmatmul.mubr.msk.f32.vlgmr.msra.gmra.mrb[12].mxu0 %vm1879_vm11, %v2568_v1  ;;  %6657 = vmatprep.subr.bf16.mxu0 %v8759_v9  ;;  %v8126_v1 = vpack.c.bf16 %v2270_v62, %v2269_v13  ;;  %v8140_v8 = vpack.c.bf16 %v4436_v2, %v4435_v63  ;;  %v4445_v13 = vld [vmem:[%s8751_s13 + $0x278] sm:$0xff]  ;;  %v8201_v62 = vpack.c.bf16 %v2278_v55, %v2277_v53  ;;  %v4441_v63 = vld [vmem:[%s8751_s13 + $0x268] sm:$0xf]  ;;  %v4452_v53 = vld [vmem:[%s8751_s13 + $0x2b0] sm:$0xff] }
 0x632   :  { %6659 = vmatpush3.bf16.msra.mxu0 %v8012_v25  ;;  %5765 = vmatprep.mubr.msk.f32.mxu0 %vm7078_vm5, %v8762_v20  ;;  %v8208_v2 = vpack.c.bf16 %v4445_v13, %v4444_v56  ;;  %v4453_v55 = vld [vmem:[%s8751_s13 + $0x2b8] sm:$0xff]  ;;  %v4454_v13 = vld [vmem:[%s8751_s13 + $0x2c0] sm:$0xff] }
 0x633   :  { %6660 = vmatprep.subr.bf16.mxu0 %v8759_v9  ;;  %6770 = vmatpush3.bf16.msra.mxu1 %v8126_v1  ;;  %v8255_v56 = vpack.c.bf16 %v4453_v55, %v4452_v53  ;;  %v4462_v53 = vld [vmem:[%s8751_s13 + $0x2f0] sm:$0xff] }
 0x634   :  { %6771 = vmatprep.subr.bf16.mxu1 %v8759_v9 }
 0x636   :  { %6662 = vmatpush3.bf16.msra.mxu0 %v8025_v5 }
 0x637   :  { %6663 = vmatprep.subr.bf16.mxu0 %v8759_v9  ;;  %6773 = vmatpush3.bf16.msra.mxu1 %v8146_v16 }
 0x638   :  { %6774 = vmatprep.subr.bf16.mxu1 %v8759_v9 }
 0x63a   :  { %6665 = vmatpush3.bf16.msra.mxu0 %v8037_v11 }
 0x63b   :  { %6666 = vmatprep.subr.bf16.mxu0 %v8759_v9  ;;  %6776 = vmatpush3.bf16.msra.mxu1 %v8166_v40 }
 0x63c   :  { %6777 = vmatprep.subr.bf16.mxu1 %v8759_v9 }
 0x63e   :  { %6668 = vmatpush3.bf16.msra.mxu0 %v8047_v19 }
 0x63f   :  { %6669 = vmatprep.subr.bf16.mxu0 %v8759_v9 }
 0x642   :  { %6671 = vmatpush3.bf16.msra.mxu0 %v8057_v30 }
 0x643   :  { %6672 = vmatprep.subr.bf16.mxu0 %v8759_v9 }
 0x646   :  { %6674 = vmatpush3.bf16.msra.mxu0 %v8067_v35 }
 0x647   :  { %5763 = vmatprep.subr.mxu0 %v8762_v20 }
 0x64a   :  { %5764 = vmatpush3.msk.msra.mxu0 %vm1939_vm9, %v4426_v41  ;;  %v4440_v41 = vld [vmem:[%s8751_s13 + $0x260] sm:$0xff] }
 0x64b   :  { %5766 = vmatmul.mubr.msk.f32.vlgmr.msra.gmra.mrb[12].mxu0 %vm1879_vm11, %v2659_v45  ;;  %6675 = vmatprep.subr.bf16.mxu0 %v8759_v9  ;;  %v2275_v45 = vld [vmem:[%s8753_s15 + $0x40] sm:$0xff]  ;;  %v8180_v49 = vpack.c.bf16 %v4440_v41, %v4439_v38  ;;  %v8235_v38 = vpack.c.bf16 %v4449_v31, %v4448_v23  ;;  %v4456_v23 = vld [vmem:[%s8751_s13 + $0x2d0] sm:$0xf]  ;;  %v8279_v31 = vpack.c.bf16 %v4460_v12, %v4459_v6  ;;  %v4465_v12 = vld [vmem:[%s8751_s13 + $0x308] sm:$0xff] }
 0x64c   :  { %6677 = vmatpush3.bf16.msra.mxu0 %v8081_v44  ;;  %5794 = vmatprep.mubr.msk.f32.mxu0 %vm7078_vm5, %v8762_v20  ;;  %v8183_v52 = vpack.c.bf16 %v2276_v46, %v2275_v45  ;;  %v4450_v41 = vld [vmem:[%s8751_s13 + $0x2a0] sm:$0xff]  ;;  %v4451_v45 = vld [vmem:[%s8751_s13 + $0x2a8] sm:$0xff] }
 0x64d   :  { %6678 = vmatprep.subr.bf16.mxu0 %v8759_v9  ;;  %v8245_v46 = vpack.c.bf16 %v4451_v45, %v4450_v41  ;;  %v2841_v41 = vrot.slane %v7801_v58, 6  ;;  %v4461_v45 = vld [vmem:[%s8751_s13 + $0x2e8] sm:$0xff] }
 0x64e   :  { %6779 = vmatpush3.bf16.msra.mxu1 %v8183_v52  ;;  %v8292_v55 = vpack.c.bf16 %v4462_v53, %v4461_v45  ;;  %v4467_v45 = vld [vmem:[%s8751_s13 + $0x318] sm:$0xff]  ;;  %v4468_v53 = vld [vmem:[%s8751_s13 + $0x320] sm:$0xff] }
 0x64f   :  { %6780 = vmatprep.subr.bf16.mxu1 %v8759_v9 }
 0x650   :  { %6680 = vmatpush3.bf16.msra.mxu0 %v8094_v50 }
 0x651   :  { %6681 = vmatprep.subr.bf16.mxu0 %v8759_v9 }
 0x652   :  { %6782 = vmatpush3.bf16.msra.mxu1 %v8201_v62 }
 0x653   :  { %5937 = vmatprep.subr.mxu1 %v8762_v20 }
 0x654   :  { %6683 = vmatpush3.bf16.msra.mxu0 %v8120_v24 }
 0x655   :  { %6684 = vmatprep.subr.bf16.mxu0 %v8759_v9 }
 0x658   :  { %6686 = vmatpush3.bf16.msra.mxu0 %v8140_v8 }
 0x659   :  { %6687 = vmatprep.subr.bf16.mxu0 %v8759_v9 }
 0x65c   :  { %6689 = vmatpush3.bf16.msra.mxu0 %v8160_v34 }
 0x65d   :  { %6690 = vmatprep.subr.bf16.mxu0 %v8759_v9 }
 0x660   :  { %6692 = vmatpush3.bf16.msra.mxu0 %v8180_v49 }
 0x661   :  { %5792 = vmatprep.subr.mxu0 %v8762_v20 }
 0x664   :  { %5793 = vmatpush3.msk.msra.mxu0 %vm1939_vm9, %v4441_v63  ;;  %v4455_v63 = vld [vmem:[%s8751_s13 + $0x2c8] sm:$0xff] }
 0x665   :  { %5795 = vmatmul.mubr.msk.f32.vlgmr.msra.gmra.mrb[12].mxu0 %vm1879_vm11, %v2750_v4  ;;  %6693 = vmatprep.subr.bf16.mxu0 %v8759_v9  ;;  %v8265_v4 = vpack.c.bf16 %v4455_v63, %v4454_v13  ;;  %v4463_v13 = vld [vmem:[%s8751_s13 + $0x2f8] sm:$0xff]  ;;  %v4464_v63 = vld [vmem:[%s8751_s13 + $0x300] sm:$0xff] }
 0x666   :  { %6695 = vmatpush3.bf16.msra.mxu0 %v8208_v2  ;;  %5823 = vmatprep.mubr.msk.f32.mxu0 %vm7078_vm5, %v8762_v20  ;;  %v8304_v6 = vpack.c.bf16 %v4464_v63, %v4463_v13  ;;  %v8324_v13 = vpack.c.bf16 %v4468_v53, %v4467_v45  ;;  %v4469_v63 = vld [vmem:[%s8751_s13 + $0x328] sm:$0xff]  ;;  %v4474_v45 = vld [vmem:[%s8751_s13 + $0x340] sm:$0xff] }
 0x667   :  { %6696 = vmatprep.subr.bf16.mxu0 %v8759_v9  ;;  %v4475_v53 = vld [vmem:[%s8751_s13 + $0x348] sm:$0xff] }
 0x668   :  { %8778 = vst [vmem:[#allocation6_spill] sm:$0xff] %v8324_v13 }
 0x66a   :  { %6698 = vmatpush3.bf16.msra.mxu0 %v8222_v22 }
 0x66b   :  { %6699 = vmatprep.subr.bf16.mxu0 %v8759_v9 }
 0x66e   :  { %6701 = vmatpush3.bf16.msra.mxu0 %v8235_v38 }
 0x66f   :  { %6702 = vmatprep.subr.bf16.mxu0 %v8759_v9 }
 0x672   :  { %6704 = vmatpush3.bf16.msra.mxu0 %v8245_v46 }
 0x673   :  { %6705 = vmatprep.subr.bf16.mxu0 %v8759_v9 }
 0x676   :  { %6707 = vmatpush3.bf16.msra.mxu0 %v8255_v56 }
 0x677   :  { %6708 = vmatprep.subr.bf16.mxu0 %v8759_v9 }
 0x67a   :  { %6710 = vmatpush3.bf16.msra.mxu0 %v8265_v4 }
 0x67b   :  { %5821 = vmatprep.subr.mxu0 %v8762_v20 }
 0x67e   :  { %5822 = vmatpush3.msk.msra.mxu0 %vm1939_vm9, %v4456_v23  ;;  %v4466_v23 = vld [vmem:[%s8751_s13 + $0x310] sm:$0xff] }
 0x67f   :  { %5824 = vmatmul.mubr.msk.f32.vlgmr.msra.gmra.mrb[12].mxu0 %vm1879_vm11, %v2841_v41  ;;  %6711 = vmatprep.subr.bf16.mxu0 %v8759_v9  ;;  %v8314_v41 = vpack.c.bf16 %v4466_v23, %v4465_v12  ;;  %v4470_v12 = vld [vmem:[%s8751_s13 + $0x330] sm:$0xff] }
 0x680   :  { %6713 = vmatpush3.bf16.msra.mxu0 %v8279_v31  ;;  %5852 = vmatprep.mubr.msk.f32.mxu0 %vm7078_vm5, %v8762_v20  ;;  %v8334_v23 = vpack.c.bf16 %v4470_v12, %v4469_v63  ;;  %v8348_v63 = vpack.c.bf16 %v4475_v53, %v4474_v45  ;;  %v2932_v12 = vrot.slane %v7801_v58, 7  ;;  %v8782_v53 = vmov 0.0   ;;  %v4478_v58 = vld [vmem:[%s8751_s13 + $0x360] sm:$0xff] }
 0x681   :  { %6714 = vmatprep.subr.bf16.mxu0 %v8759_v9 }
 0x682   :  { %8779 = vst [vmem:[#allocation7_spill] sm:$0xff] %v8348_v63 }
 0x684   :  { %6716 = vmatpush3.bf16.msra.mxu0 %v8292_v55 }
 0x685   :  { %6717 = vmatprep.subr.bf16.mxu0 %v8759_v9 }
 0x688   :  { %6719 = vmatpush3.bf16.msra.mxu0 %v8304_v6 }
 0x689   :  { %6720 = vmatprep.subr.bf16.mxu0 %v8759_v9 }
 0x68c   :  { %6722 = vmatpush3.bf16.msra.mxu0 %v8314_v41 }
 0x68d   :  { %6723 = vmatprep.subr.bf16.mxu0 %v8759_v9 }
 0x690   :  { %6725 = vmatpush3.bf16.msra.mxu0 %v8324_v13  ;;  %v4477_v13 = vld [vmem:[%s8751_s13 + $0x358] sm:$0xff] }
 0x691   :  { %6726 = vmatprep.subr.bf16.mxu0 %v8759_v9  ;;  %v4476_v9 = vld [vmem:[%s8751_s13 + $0x350] sm:$0xff] }
 0x692   :  { %v8361_v45 = vpack.c.bf16 %v4477_v13, %v4476_v9  ;;  %v4480_v9 = vld [vmem:[%s8751_s13 + $0x370] sm:$0xff]  ;;  %v4481_v13 = vld [vmem:[%s8751_s13 + $0x378] sm:$0xff] }
 0x694   :  { %6728 = vmatpush3.bf16.msra.mxu0 %v8334_v23  ;;  %8781 = vst [vmem:[#allocation8_spill] sm:$0xff] %v8361_v45 }
 0x695   :  { %5850 = vmatprep.subr.mxu0 %v8762_v20  ;;  %v8780_v20 = vmov 0.0|0.0  }
 0x698   :  { %5851 = vmatpush3.msk.msra.mxu0 %vm1939_vm9, %v4471_v61  ;;  %v4479_v61 = vld [vmem:[%s8751_s13 + $0x368] sm:$0xff] }
 0x699   :  { %5853 = vmatmul.mubr.msk.f32.vlgmr.msra.gmra.mrb[12].mxu0 %vm1879_vm11, %v2932_v12  ;;  %6729 = vmatprep.subr.bf16.mxu0 %v8780_v20  ;;  %v8373_v12 = vpack.c.bf16 %v4479_v61, %v4478_v58  ;;  %v4482_v58 = vld [vmem:[%s8751_s13 + $0x380] sm:$0xff]  ;;  %v4483_v61 = vld [vmem:[%s8751_s13 + $0x388] sm:$0xff] }
 0x69a   :  { %6731 = vmatpush3.bf16.msra.mxu0 %v8348_v63  ;;  %5881 = vmatprep.mubr.msk.f32.mxu0 %vm7078_vm5, %v8782_v53  ;;  %v8383_v63 = vpack.c.bf16 %v4481_v13, %v4480_v9  ;;  %v4484_v9 = vld [vmem:[%s8751_s13 + $0x390] sm:$0xff]  ;;  %v4485_v13 = vld [vmem:[%s8751_s13 + $0x398] sm:$0xff] }
 0x69b   :  { %6732 = vmatprep.subr.bf16.mxu0 %v8780_v20  ;;  %8783 = vst [vmem:[#allocation9_spill] sm:$0xff] %v8373_v12 }
 0x69c   :  { %8784 = vst [vmem:[#allocation10_spill] sm:$0xff] %v8383_v63 }
 0x69e   :  { %6734 = vmatpush3.bf16.msra.mxu0 %v8361_v45  ;;  %v8393_v45 = vpack.c.bf16 %v4483_v61, %v4482_v58  ;;  %v4489_v58 = vld [vmem:[%s8751_s13 + $0x3a8] sm:$0xff]  ;;  %v4490_v61 = vld [vmem:[%s8751_s13 + $0x3b0] sm:$0xff] }
 0x69f   :  { %6735 = vmatprep.subr.bf16.mxu0 %v8780_v20 }
 0x6a0   :  { %8785 = vst [vmem:[#allocation11_spill] sm:$0xff] %v8393_v45 }
 0x6a2   :  { %6737 = vmatpush3.bf16.msra.mxu0 %v8373_v12  ;;  %v8403_v12 = vpack.c.bf16 %v4485_v13, %v4484_v9  ;;  %v8417_v9 = vpack.c.bf16 %v4490_v61, %v4489_v58  ;;  %v4491_v13 = vld [vmem:[%s8751_s13 + $0x3b8] sm:$0xff]  ;;  %v4493_v58 = vld [vmem:[%s8751_s13 + $0x3c8] sm:$0xff] }
 0x6a3   :  { %6738 = vmatprep.subr.bf16.mxu0 %v8780_v20 }
 0x6a4   :  { %8786 = vst [vmem:[#allocation12_spill] sm:$0xff] %v8403_v12  ;;  %8787 = vst [vmem:[#allocation13_spill] sm:$0xff] %v8417_v9 }
 0x6a6   :  { %6740 = vmatpush3.bf16.msra.mxu0 %v8383_v63  ;;  %v4492_v63 = vld [vmem:[%s8751_s13 + $0x3c0] sm:$0xff] }
 0x6a7   :  { %6741 = vmatprep.subr.bf16.mxu0 %v8780_v20 }
 0x6aa   :  { %6743 = vmatpush3.bf16.msra.mxu0 %v8393_v45  ;;  %v4486_v45 = vld [vmem:[%s8751_s13 + $0x3a0] sm:$0xf] }
 0x6ab   :  { %6744 = vmatprep.subr.bf16.mxu0 %v8780_v20 }
 0x6ae   :  { %6746 = vmatpush3.bf16.msra.mxu0 %v8403_v12  ;;  %v8430_v12 = vpack.c.bf16 %v4492_v63, %v4491_v13  ;;  %v4495_v63 = vld [vmem:[%s8751_s13 + $0x3d8] sm:$0xff]  ;;  %v4496_v13 = vld [vmem:[%s8751_s13 + $0x3e0] sm:$0xff] }
 0x6af   :  { %5879 = vmatprep.subr.mxu0 %v8782_v53 }
 0x6b0   :  { %8788 = vst [vmem:[#allocation14_spill] sm:$0xff] %v8430_v12 }
 0x6b2   :  { %5880 = vmatpush3.msk.msra.mxu0 %vm1939_vm9, %v4486_v45  ;;  %v4494_v45 = vld [vmem:[%s8751_s13 + $0x3d0] sm:$0xff] }
 0x6b3   :  { %5882 = vmatmul.mubr.msk.f32.vlgmr.msra.gmra.mrb[12].mxu0 %vm1879_vm11, %v7803_v59  ;;  %6747 = vmatprep.subr.bf16.mxu0 %v8780_v20  ;;  %v8442_v61 = vpack.c.bf16 %v4494_v45, %v4493_v58  ;;  %v4497_v58 = vld [vmem:[%s8751_s13 + $0x3e8] sm:$0xff]  ;;  %v4498_v45 = vld [vmem:[%s8751_s13 + $0x3f0] sm:$0xff] }
 0x6b4   :  { %6749 = vmatpush3.bf16.msra.mxu0 %v8417_v9  ;;  %5910 = vmatprep.mubr.msk.f32.mxu0 %vm7078_vm5, %v8782_v53  ;;  %v8452_v9 = vpack.c.bf16 %v4496_v13, %v4495_v63  ;;  %v4499_v63 = vld [vmem:[%s8751_s13 + $0x3f8] sm:$0xff]  ;;  %v4500_v13 = vld [vmem:[%s8751_s13 + $0x400] sm:$0xff] }
 0x6b5   :  { %6750 = vmatprep.subr.bf16.mxu0 %v8780_v20  ;;  %8789 = vst [vmem:[#allocation15_spill] sm:$0xff] %v8442_v61 }
 0x6b8   :  { %6752 = vmatpush3.bf16.msra.mxu0 %v8430_v12  ;;  %v8462_v12 = vpack.c.bf16 %v4498_v45, %v4497_v58  ;;  %v4501_v58 = vld [vmem:[%s8751_s13 + $0x408] sm:$0xf]  ;;  %v3114_v45 = vrot.slane %v7803_v59, 1  ;;  %v2279_v59 = vld [vmem:[%s8753_s15 + $0x60] sm:$0xf] }
 0x6b9   :  { %6753 = vmatprep.subr.bf16.mxu0 %v8780_v20  ;;  %5938 = vmatpush3.msk.msra.mxu1 %vm1939_vm9, %v2279_v59 }
 0x6ba   :  { %6783 = vmatprep.subr.bf16.mxu1 %v8780_v20 }
 0x6bc   :  { %6755 = vmatpush3.bf16.msra.mxu0 %v8442_v61  ;;  %v8472_v61 = vpack.c.bf16 %v4500_v13, %v4499_v63 }
 0x6bd   :  { %6756 = vmatprep.subr.bf16.mxu0 %v8780_v20 }
 0x6c0   :  { %6758 = vmatpush3.bf16.msra.mxu0 %v8452_v9 }
 0x6c1   :  { %6759 = vmatprep.subr.bf16.mxu0 %v8780_v20 }
 0x6c4   :  { %6761 = vmatpush3.bf16.msra.mxu0 %v8462_v12 }
 0x6c5   :  { %6762 = vmatprep.subr.bf16.mxu0 %v8780_v20 }
 0x6c8   :  { %6764 = vmatpush3.bf16.msra.mxu0 %v8472_v61 }
 0x6c9   :  { %5908 = vmatprep.subr.mxu0 %v8782_v53 }
 0x6cc   :  { %5909 = vmatpush3.msk.msra.mxu0 %vm1939_vm9, %v4501_v58 }
 0x6cd   :  { %5911 = vmatmul.mubr.msk.f32.vlgmr.msra.gmra.mrb[12].mxu0 %vm1879_vm11, %v3114_v45  ;;  %6963 = vmatprep.subr.bf16.mxu0 %v8780_v20 }
 0x6ce   :  { %6965 = vmatpush3.bf16.msra.mxu0 %v8114_v14  ;;  %6258 = vmatprep.mubr.msk.f32.mxu0 %vm7078_vm5, %v8782_v53  ;;  %v2281_v14 = vld [vmem:[%s8752_s14] sm:$0x1] }
 0x6cf   :  { %6966 = vmatprep.subr.bf16.mxu0 %v8780_v20 }
 0x6d2   :  { %6968 = vmatpush3.bf16.msra.mxu0 %v8126_v1 }
 0x6d3   :  { %6969 = vmatprep.subr.bf16.mxu0 %v8780_v20 }
 0x6d6   :  { %6971 = vmatpush3.bf16.msra.mxu0 %v8146_v16 }
 0x6d7   :  { %6972 = vmatprep.subr.bf16.mxu0 %v8780_v20 }
 0x6da   :  { %6974 = vmatpush3.bf16.msra.mxu0 %v8166_v40 }
 0x6db   :  { %6975 = vmatprep.subr.bf16.mxu0 %v8780_v20 }
 0x6de   :  { %6977 = vmatpush3.bf16.msra.mxu0 %v8183_v52 }
 0x6df   :  { %6978 = vmatprep.subr.bf16.mxu0 %v8780_v20 }
 0x6e2   :  { %6980 = vmatpush3.bf16.msra.mxu0 %v8201_v62 }
 0x6e3   :  { %6256 = vmatprep.subr.mxu0 %v8782_v53 }
 0x6e6   :  { %6257 = vmatpush3.msk.msra.mxu0 %vm1939_vm9, %v2279_v59 }
 0x7a0   :  { %v3186_v1 = vpop.f32.mrb[12].mxu0 }
 0x7a1   :  { %v6981_v16 = vadd.f32 %v3186_v1, %v2281_v14  ;;  %v5912_v40 = vpop.f32.mrb[13].mxu0 }
 0x7a3   :  { %5940 = vmatmul.mubr.msk.f32.vlgmr.msra.gmra.mrb[12].mxu1 %vm1879_vm11, %v6981_v16 }
 0x7a4   :  { %6785 = vmatpush3.bf16.msra.mxu1 %v7721_v17  ;;  %5968 = vmatprep.mubr.msk.f32.mxu1 %vm7078_vm5, %v8782_v53  ;;  %v3282_v17 = vld [vmem:[%s8751_s13 + $0x60] sm:$0xf] }
 0x7a5   :  { %6786 = vmatprep.subr.bf16.mxu1 %v8780_v20 }
 0x7a8   :  { %6788 = vmatpush3.bf16.msra.mxu1 %v7733_v27  ;;  %v4520_v27 = vld [vmem:[%s8751_s13 + $0xc8] sm:$0xf] }
 0x7a9   :  { %6789 = vmatprep.subr.bf16.mxu1 %v8780_v20 }
 0x7ac   :  { %6791 = vmatpush3.bf16.msra.mxu1 %v7745_v33  ;;  %v3373_v33 = vrot.slane %v7805_v60, 1 }
 0x7ad   :  { %6792 = vmatprep.subr.bf16.mxu1 %v8780_v20 }
 0x7b0   :  { %6794 = vmatpush3.bf16.msra.mxu1 %v7757_v36  ;;  %v4535_v36 = vld [vmem:[%s8751_s13 + $0x130] sm:$0xf] }
 0x7b1   :  { %6795 = vmatprep.subr.bf16.mxu1 %v8780_v20 }
 0x7b4   :  { %6797 = vmatpush3.bf16.msra.mxu1 %v7767_v39  ;;  %v3463_v39 = vrot.slane %v7805_v60, 2 }
 0x7b5   :  { %6798 = vmatprep.subr.bf16.mxu1 %v8780_v20 }
 0x7b8   :  { %6800 = vmatpush3.bf16.msra.mxu1 %v7778_v42  ;;  %v4550_v42 = vld [vmem:[%s8751_s13 + $0x198] sm:$0xf] }
 0x7b9   :  { %5966 = vmatprep.subr.mxu1 %v8782_v53 }
 0x7bc   :  { %5967 = vmatpush3.msk.msra.mxu1 %vm1939_vm9, %v3282_v17 }
 0x7bd   :  { %5969 = vmatmul.mubr.msk.f32.vlgmr.msra.gmra.mrb[14].mxu1 %vm1879_vm11, %v7805_v60  ;;  %6801 = vmatprep.subr.bf16.mxu1 %v8780_v20 }
 0x7be   :  { %6803 = vmatpush3.bf16.msra.mxu1 %v7799_v57  ;;  %5997 = vmatprep.mubr.msk.f32.mxu1 %vm7078_vm5, %v8782_v53  ;;  %v3553_v57 = vrot.slane %v7805_v60, 3 }
 0x7bf   :  { %6804 = vmatprep.subr.bf16.mxu1 %v8780_v20 }
 0x7c2   :  { %6806 = vmatpush3.bf16.msra.mxu1 %v7818_v48  ;;  %v4565_v48 = vld [vmem:[%s8751_s13 + $0x200] sm:$0xf] }
 0x7c3   :  { %6807 = vmatprep.subr.bf16.mxu1 %v8780_v20 }
 0x7c6   :  { %6809 = vmatpush3.bf16.msra.mxu1 %v7830_v28  ;;  %v3643_v28 = vrot.slane %v7805_v60, 4 }
 0x7c7   :  { %6810 = vmatprep.subr.bf16.mxu1 %v8780_v20 }
 0x7ca   :  { %6812 = vmatpush3.bf16.msra.mxu1 %v7840_v29  ;;  %v4580_v29 = vld [vmem:[%s8751_s13 + $0x268] sm:$0xf] }
 0x7cb   :  { %6813 = vmatprep.subr.bf16.mxu1 %v8780_v20 }
 0x7ce   :  { %6815 = vmatpush3.bf16.msra.mxu1 %v7850_v0  ;;  %v3733_v0 = vrot.slane %v7805_v60, 5 }
 0x7cf   :  { %6816 = vmatprep.subr.bf16.mxu1 %v8780_v20 }
 0x7d2   :  { %6818 = vmatpush3.bf16.msra.mxu1 %v7860_v3  ;;  %v4595_v3 = vld [vmem:[%s8751_s13 + $0x2d0] sm:$0xf] }
 0x7d3   :  { %5995 = vmatprep.subr.mxu1 %v8782_v53 }
 0x7d6   :  { %5996 = vmatpush3.msk.msra.mxu1 %vm1939_vm9, %v4520_v27 }
 0x7d7   :  { %5998 = vmatmul.mubr.msk.f32.vlgmr.msra.gmra.mrb[14].mxu1 %vm1879_vm11, %v3373_v33  ;;  %6819 = vmatprep.subr.bf16.mxu1 %v8780_v20 }
 0x7d8   :  { %6821 = vmatpush3.bf16.msra.mxu1 %v7874_v7  ;;  %6026 = vmatprep.mubr.msk.f32.mxu1 %vm7078_vm5, %v8782_v53  ;;  %v3823_v7 = vrot.slane %v7805_v60, 6 }
 0x7d9   :  { %6822 = vmatprep.subr.bf16.mxu1 %v8780_v20 }
 0x7dc   :  { %6824 = vmatpush3.bf16.msra.mxu1 %v7887_v15  ;;  %v8790_v15 = vld [vmem:[#allocation6_spill] sm:$0xff] }
 0x7dd   :  { %6825 = vmatprep.subr.bf16.mxu1 %v8780_v20 }
 0x7e0   :  { %6827 = vmatpush3.bf16.msra.mxu1 %v7899_v21  ;;  %v4610_v21 = vld [vmem:[%s8751_s13 + $0x338] sm:$0xf] }
 0x7e1   :  { %6828 = vmatprep.subr.bf16.mxu1 %v8780_v20 }
 0x7e4   :  { %6830 = vmatpush3.bf16.msra.mxu1 %v7909_v26  ;;  %v3913_v26 = vrot.slane %v7805_v60, 7 }
 0x7e5   :  { %6831 = vmatprep.subr.bf16.mxu1 %v8780_v20 }
 0x7e8   :  { %6833 = vmatpush3.bf16.msra.mxu1 %v7919_v32  ;;  %v8791_v32 = vld [vmem:[#allocation7_spill] sm:$0xff] }
 0x7e9   :  { %6834 = vmatprep.subr.bf16.mxu1 %v8780_v20 }
 0x7ec   :  { %6836 = vmatpush3.bf16.msra.mxu1 %v7929_v37  ;;  %v2280_v37 = vld [vmem:[%s8754_s16] sm:$0x1] }
 0x7ed   :  { %6024 = vmatprep.subr.mxu1 %v8782_v53 }
 0x7f0   :  { %6025 = vmatpush3.msk.msra.mxu1 %vm1939_vm9, %v4535_v36 }
 0x7f1   :  { %6027 = vmatmul.mubr.msk.f32.vlgmr.msra.gmra.mrb[14].mxu1 %vm1879_vm11, %v3463_v39  ;;  %6837 = vmatprep.subr.bf16.mxu1 %v8780_v20 }
 0x7f2   :  { %6839 = vmatpush3.bf16.msra.mxu1 %v7943_v43  ;;  %6055 = vmatprep.mubr.msk.f32.mxu1 %vm7078_vm5, %v8782_v53 }
 0x7f3   :  { %6840 = vmatprep.subr.bf16.mxu1 %v8780_v20 }
 0x7f6   :  { %6842 = vmatpush3.bf16.msra.mxu1 %v7956_v47 }
 0x7f7   :  { %6843 = vmatprep.subr.bf16.mxu1 %v8780_v20 }
 0x7fa   :  { %6845 = vmatpush3.bf16.msra.mxu1 %v7968_v51  ;;  %v8792_v51 = vld [vmem:[#allocation8_spill] sm:$0xff] }
 0x7fb   :  { %6846 = vmatprep.subr.bf16.mxu1 %v8780_v20 }
 0x7fe   :  { %6848 = vmatpush3.bf16.msra.mxu1 %v7978_v54  ;;  %v8793_v54 = vld [vmem:[#allocation9_spill] sm:$0xff] }
 0x7ff   :  { %6849 = vmatprep.subr.bf16.mxu1 %v8780_v20 }
 0x802   :  { %6851 = vmatpush3.bf16.msra.mxu1 %v7988_v10  ;;  %v8794_v10 = vld [vmem:[#allocation10_spill] sm:$0xff] }
 0x803   :  { %6852 = vmatprep.subr.bf16.mxu1 %v8780_v20 }
 0x806   :  { %6854 = vmatpush3.bf16.msra.mxu1 %v7998_v18  ;;  %v8795_v18 = vld [vmem:[#allocation11_spill] sm:$0xff] }
 0x807   :  { %6053 = vmatprep.subr.mxu1 %v8782_v53 }
 0x80a   :  { %6054 = vmatpush3.msk.msra.mxu1 %vm1939_vm9, %v4550_v42 }
 0x80b   :  { %6056 = vmatmul.mubr.msk.f32.vlgmr.msra.gmra.mrb[14].mxu1 %vm1879_vm11, %v3553_v57  ;;  %6855 = vmatprep.subr.bf16.mxu1 %v8780_v20 }
 0x80c   :  { %6857 = vmatpush3.bf16.msra.mxu1 %v8012_v25  ;;  %6084 = vmatprep.mubr.msk.f32.mxu1 %vm7078_vm5, %v8782_v53  ;;  %v8796_v25 = vld [vmem:[#allocation12_spill] sm:$0xff] }
 0x80d   :  { %6858 = vmatprep.subr.bf16.mxu1 %v8780_v20 }
 0x810   :  { %6860 = vmatpush3.bf16.msra.mxu1 %v8025_v5  ;;  %v4625_v5 = vld [vmem:[%s8751_s13 + $0x3a0] sm:$0xf] }
 0x811   :  { %6861 = vmatprep.subr.bf16.mxu1 %v8780_v20 }
 0x814   :  { %6863 = vmatpush3.bf16.msra.mxu1 %v8037_v11  ;;  %v8797_v11 = vld [vmem:[#allocation5_spill] sm:$0xff] }
 0x815   :  { %6864 = vmatprep.subr.bf16.mxu1 %v8780_v20 }
 0x818   :  { %6866 = vmatpush3.bf16.msra.mxu1 %v8047_v19  ;;  %v8798_v19 = vld [vmem:[#allocation13_spill] sm:$0xff] }
 0x819   :  { %6867 = vmatprep.subr.bf16.mxu1 %v8780_v20 }
 0x81c   :  { %6869 = vmatpush3.bf16.msra.mxu1 %v8057_v30  ;;  %v8799_v30 = vld [vmem:[#allocation14_spill] sm:$0xff] }
 0x81d   :  { %6870 = vmatprep.subr.bf16.mxu1 %v8780_v20 }
 0x820   :  { %6872 = vmatpush3.bf16.msra.mxu1 %v8067_v35  ;;  %v8800_v35 = vld [vmem:[#allocation15_spill] sm:$0xff] }
 0x821   :  { %6082 = vmatprep.subr.mxu1 %v8782_v53 }
 0x824   :  { %6083 = vmatpush3.msk.msra.mxu1 %vm1939_vm9, %v4565_v48 }
 0x825   :  { %6085 = vmatmul.mubr.msk.f32.vlgmr.msra.gmra.mrb[14].mxu1 %vm1879_vm11, %v3643_v28  ;;  %6873 = vmatprep.subr.bf16.mxu1 %v8780_v20 }
 0x826   :  { %6875 = vmatpush3.bf16.msra.mxu1 %v8081_v44  ;;  %6113 = vmatprep.mubr.msk.f32.mxu1 %vm7078_vm5, %v8782_v53  ;;  %v4640_v44 = vld [vmem:[%s8751_s13 + $0x408] sm:$0xf]  ;;  %s7052_s13 = scalar_lea.vmem %s4251_s22, 32 }
 0x827   :  { %6876 = vmatprep.subr.bf16.mxu1 %v8780_v20  ;;  %p7053_p0 = scmp.ne.s32.totalorder %s4251_s22, %s7052_s13  ;;  %p7058_p2 = scmp.lt.s32.totalorder %s7052_s13, %s7052_s13 }
 0x829   :  { %p7059_p3 = por %p7058_p2, %p7057_p1 }
 0x82a   :  { %6878 = vmatpush3.bf16.msra.mxu1 %v8094_v50  ;;  %v4093_v50 = vrot.slane %v8797_v11, 1 }
 0x82b   :  { %6879 = vmatprep.subr.bf16.mxu1 %v8780_v20  ;;  %p7060_p4 = pnand %p7059_p3, %p7053_p0 }
 0x82e   :  { %6881 = vmatpush3.bf16.msra.mxu1 %v8120_v24  ;;  %v3269_v24 = vld [vmem:[%s8752_s14] sm:$0x1] }
 0x82f   :  { %6882 = vmatprep.subr.bf16.mxu1 %v8780_v20 }
 0x832   :  { %6884 = vmatpush3.bf16.msra.mxu1 %v8140_v8 }
 0x833   :  { %6885 = vmatprep.subr.bf16.mxu1 %v8780_v20 }
 0x836   :  { %6887 = vmatpush3.bf16.msra.mxu1 %v8160_v34 }
 0x837   :  { %6888 = vmatprep.subr.bf16.mxu1 %v8780_v20 }
 0x83a   :  { %6890 = vmatpush3.bf16.msra.mxu1 %v8180_v49 }
 0x83b   :  { %6111 = vmatprep.subr.mxu1 %v8782_v53 }
 0x83e   :  { %6112 = vmatpush3.msk.msra.mxu1 %vm1939_vm9, %v4580_v29 }
 0x83f   :  { %6114 = vmatmul.mubr.msk.f32.vlgmr.msra.gmra.mrb[14].mxu1 %vm1879_vm11, %v3733_v0  ;;  %6891 = vmatprep.subr.bf16.mxu1 %v8780_v20 }
 0x840   :  { %6893 = vmatpush3.bf16.msra.mxu1 %v8208_v2  ;;  %6142 = vmatprep.mubr.msk.f32.mxu1 %vm7078_vm5, %v8782_v53 }
 0x841   :  { %6894 = vmatprep.subr.bf16.mxu1 %v8780_v20 }
 0x844   :  { %6896 = vmatpush3.bf16.msra.mxu1 %v8222_v22 }
 0x845   :  { %6897 = vmatprep.subr.bf16.mxu1 %v8780_v20 }
 0x848   :  { %6899 = vmatpush3.bf16.msra.mxu1 %v8235_v38 }
 0x849   :  { %6900 = vmatprep.subr.bf16.mxu1 %v8780_v20 }
 0x84c   :  { %6902 = vmatpush3.bf16.msra.mxu1 %v8245_v46 }
 0x84d   :  { %6903 = vmatprep.subr.bf16.mxu1 %v8780_v20 }
 0x850   :  { %6905 = vmatpush3.bf16.msra.mxu1 %v8255_v56 }
 0x851   :  { %6906 = vmatprep.subr.bf16.mxu1 %v8780_v20 }
 0x854   :  { %6908 = vmatpush3.bf16.msra.mxu1 %v8265_v4 }
 0x855   :  { %6140 = vmatprep.subr.mxu1 %v8782_v53 }
 0x858   :  { %6141 = vmatpush3.msk.msra.mxu1 %vm1939_vm9, %v4595_v3 }
 0x859   :  { %6143 = vmatmul.mubr.msk.f32.vlgmr.msra.gmra.mrb[14].mxu1 %vm1879_vm11, %v3823_v7  ;;  %6909 = vmatprep.subr.bf16.mxu1 %v8780_v20 }
 0x85a   :  { %6911 = vmatpush3.bf16.msra.mxu1 %v8279_v31  ;;  %6171 = vmatprep.mubr.msk.f32.mxu1 %vm7078_vm5, %v8782_v53 }
 0x85b   :  { %6912 = vmatprep.subr.bf16.mxu1 %v8780_v20 }
 0x85e   :  { %6914 = vmatpush3.bf16.msra.mxu1 %v8292_v55 }
 0x85f   :  { %6915 = vmatprep.subr.bf16.mxu1 %v8780_v20 }
 0x862   :  { %6917 = vmatpush3.bf16.msra.mxu1 %v8304_v6 }
 0x863   :  { %6918 = vmatprep.subr.bf16.mxu1 %v8780_v20 }
 0x866   :  { %6920 = vmatpush3.bf16.msra.mxu1 %v8314_v41 }
 0x867   :  { %6921 = vmatprep.subr.bf16.mxu1 %v8780_v20 }
 0x86a   :  { %6923 = vmatpush3.bf16.msra.mxu1 %v8790_v15 }
 0x86b   :  { %6924 = vmatprep.subr.bf16.mxu1 %v8780_v20 }
 0x86e   :  { %6926 = vmatpush3.bf16.msra.mxu1 %v8334_v23 }
 0x86f   :  { %6169 = vmatprep.subr.mxu1 %v8782_v53 }
 0x872   :  { %6170 = vmatpush3.msk.msra.mxu1 %vm1939_vm9, %v4610_v21 }
 0x873   :  { %6172 = vmatmul.mubr.msk.f32.vlgmr.msra.gmra.mrb[14].mxu1 %vm1879_vm11, %v3913_v26  ;;  %6927 = vmatprep.subr.bf16.mxu1 %v8780_v20 }
 0x874   :  { %6929 = vmatpush3.bf16.msra.mxu1 %v8791_v32  ;;  %6200 = vmatprep.mubr.msk.f32.mxu1 %vm7078_vm5, %v8782_v53 }
 0x875   :  { %6930 = vmatprep.subr.bf16.mxu1 %v8780_v20 }
 0x876   :  { %v3263_v43 = vpop.f32.mrb[12].mxu1 }
 0x877   :  { %v3264_v60 = vadd.f32 %v3263_v43, %v2280_v37  ;;  %v5941_v47 = vpop.f32.mrb[13].mxu1 }
 0x878   :  { %6932 = vmatpush3.bf16.msra.mxu1 %v8792_v51 }
 0x879   :  { %3268 = vst.msk [vmem:[#allocation2] sm:$0x1] %vm3267_vm0, %v3264_v60  ;;  %6933 = vmatprep.subr.bf16.mxu1 %v8780_v20 }
 0x87c   :  { %6935 = vmatpush3.bf16.msra.mxu1 %v8793_v54 }
 0x87d   :  { %6936 = vmatprep.subr.bf16.mxu1 %v8780_v20 }
 0x880   :  { %6938 = vmatpush3.bf16.msra.mxu1 %v8794_v10 }
 0x881   :  { %6939 = vmatprep.subr.bf16.mxu1 %v8780_v20 }
 0x884   :  { %6941 = vmatpush3.bf16.msra.mxu1 %v8795_v18 }
 0x885   :  { %6942 = vmatprep.subr.bf16.mxu1 %v8780_v20 }
 0x888   :  { %6944 = vmatpush3.bf16.msra.mxu1 %v8796_v25 }
 0x889   :  { %6198 = vmatprep.subr.mxu1 %v8782_v53 }
 0x88c   :  { %6199 = vmatpush3.msk.msra.mxu1 %vm1939_vm9, %v4625_v5 }
 0x88d   :  { %6201 = vmatmul.mubr.msk.f32.vlgmr.msra.gmra.mrb[14].mxu1 %vm1879_vm11, %v8797_v11  ;;  %6945 = vmatprep.subr.bf16.mxu1 %v8780_v20 }
 0x88e   :  { %6947 = vmatpush3.bf16.msra.mxu1 %v8798_v19  ;;  %6229 = vmatprep.mubr.msk.f32.mxu1 %vm7078_vm5, %v8782_v53 }
 0x88f   :  { %6948 = vmatprep.subr.bf16.mxu1 %v8780_v20 }
 0x892   :  { %6950 = vmatpush3.bf16.msra.mxu1 %v8799_v30 }
 0x893   :  { %6951 = vmatprep.subr.bf16.mxu1 %v8780_v20 }
 0x896   :  { %6953 = vmatpush3.bf16.msra.mxu1 %v8800_v35 }
 0x897   :  { %6954 = vmatprep.subr.bf16.mxu1 %v8780_v20 }
 0x89a   :  { %6956 = vmatpush3.bf16.msra.mxu1 %v8452_v9 }
 0x89b   :  { %6957 = vmatprep.subr.bf16.mxu1 %v8780_v20 }
 0x89e   :  { %6959 = vmatpush3.bf16.msra.mxu1 %v8462_v12 }
 0x89f   :  { %6960 = vmatprep.subr.bf16.mxu1 %v8780_v20 }
 0x8a2   :  { %6962 = vmatpush3.bf16.msra.mxu1 %v8472_v61 }
 0x8a3   :  { %6227 = vmatprep.subr.mxu1 %v8782_v53 }
 0x8a6   :  { %6228 = vmatpush3.msk.msra.mxu1 %vm1939_vm9, %v4640_v44 }
 0x8a7   :  { %6230 = vmatmul.mubr.msk.f32.vlgmr.msra.gmra.mrb[14].mxu1 %vm1879_vm11, %v4093_v50 }
 0x97a   :  { %v4165_v8 = vpop.f32.mrb[14].mxu1 }
 0x97b   :  { %v6982_v20 = vadd.f32 %v4165_v8, %v3269_v24  ;;  %v6231_v34 = vpop.f32.mrb[15].mxu1 }
 0x97d   :  { %6259 = vmatmul.mubr.msk.f32.vlgmr.msra.gmra.mrb[14].mxu0 %vm1879_vm11, %v6982_v20 }
 0xa50   :  { %v4239_v49 = vpop.f32.mrb[14].mxu0 }
 0xa51   :  { %v4240_v52 = vadd.f32 %v4239_v49, %v2280_v37  ;;  %v6260_v62 = vpop.f32.mrb[15].mxu0 }
 0xa53   :  { %4243 = vst.msk [vmem:[#allocation2 + $0x1] sm:$0x1] %vm3267_vm0, %v4240_v52 }
 0xa54   :  { %7063 = shalt.err (!%p7060_p4)
}
 0xa55   :  { %s7064_s24 = scalar_lea.hbm %s8755_s17, 32 }
 0xa56   :  { %p7065_p5 = scmp.ne.s32.totalorder %s8755_s17, %s7064_s24  ;;  %p7068_p6 = scmp.lt.u32.totalorder %s7064_s24, %s8755_s17 }
 0xa58   :  { %p7070_p7 = pnand %p7068_p6, %p7065_p5 }
 0xa5a   :  { %7073 = shalt.err (!%p7070_p7)
}
 0xa5b   :  { %4253 = dma.vmem_to_hbm [thread:$0]  %s4251_s22, 32, %s8755_s17, [#allocation3]  }
 0xa5c   :  { %7074 = dma.done.wait [#allocation3], 32  }
 0xa5d   :  { %7075 = vsyncadd [#allocation3], 4294967264 }
 0xa5e   :  { %4257 = vsyncpa [#allocation3], 1 }

</bundles_post_ra>
